<compile_context>
chip_gen: v7x
topology: tpu7x:2x2x1
jax: 0.10.0
libtpu: 0.0.40
codegen_flags: <defaults>
</compile_context>

<pallas_src>
import jax
import jax.numpy as jnp
from jax.experimental import pallas as pl
from jax.experimental.pallas import tpu as pltpu

_EPS = 1e-5


# ----------------------------- Pallas kernels ------------------------------ #

def _stats_kernel(x_ref, sum_ref, sq_ref):
    """Per-block partial BN statistics: per-channel sum and sum of squares."""
    Bt, H, W, C = x_ref.shape
    x2 = x_ref[...].reshape(Bt * H * W, C)
    sum_ref[0] = jnp.sum(x2, axis=0, keepdims=True)           # (1, C)
    sq_ref[0] = jnp.sum(x2 * x2, axis=0, keepdims=True)


def _conv3x3_folded(t, w_ref):
    """3x3 'SAME' conv of t (Bt,H,W,C) as 3 accumulated MXU matmuls.

    The 3 kw taps are folded into the contraction: each patch row is
    [t(h', w-1) | t(h', w) | t(h', w+1)]  (3*C wide, built once in f32 then
    cast to bf16), and the 3 kh variants are zero-row shifts along the untiled
    H axis (no sublane relayout).  w_ref is (3, 3*C, C) bf16; the accumulator
    stays f32.
    """
    Bt, H, W, C = t.shape

    # W-shifted variants (built once, reused for all 3 kh rows).
    zcol = jnp.zeros((Bt, H, 1, C), t.dtype)
    t_m1 = jnp.concatenate([zcol, t[:, :, :W - 1, :]], axis=2)     # tap at w-1
    t_p1 = jnp.concatenate([t[:, :, 1:, :], zcol], axis=2)         # tap at w+1
    tcat = jnp.concatenate([t_m1, t, t_p1], axis=3).astype(jnp.bfloat16)

    # kh shifts: H is an outer (untiled) axis, so these are cheap.
    zrow = jnp.zeros((Bt, 1, W, 3 * C), jnp.bfloat16)
    rows = (jnp.concatenate([zrow, tcat[:, :H - 1]], axis=1),      # kh=0: row h-1
            tcat,                                                  # kh=1: row h
            jnp.concatenate([tcat[:, 1:], zrow], axis=1))          # kh=2: row h+1

    acc = jnp.zeros((Bt * H * W, C), jnp.float32)
    for kh in range(3):
        patch = rows[kh].reshape(Bt * H * W, 3 * C)                # aligned reshape
        acc = acc + jnp.dot(patch, w_ref[kh],
                            preferred_element_type=jnp.float32)
    return acc                                                     # (Bt*H*W, C) f32


def _stage1_kernel(x_ref, scale_ref, shift_ref, w_ref, y_ref, sum_ref, sq_ref):
    """y1 = conv1(relu(bn1(x))) fused; also emits partial bn2 stats of y1."""
    Bt, H, W, C = x_ref.shape
    # bn1 folded to per-channel scale/shift (computed in the wrapper) + relu.
    t = jnp.maximum(x_ref[...] * scale_ref[...] + shift_ref[...], 0.0)   # f32
    acc = _conv3x3_folded(t, w_ref)                                      # f32
    y_ref[...] = acc.reshape(Bt, H, W, C)
    # single-pass sum / sum-of-squares partials (two-phase BN reduction).
    sum_ref[0] = jnp.sum(acc, axis=0, keepdims=True)
    sq_ref[0] = jnp.sum(acc * acc, axis=0, keepdims=True)


def _stage2_kernel(y_ref, x_ref, scale_ref, shift_ref, w_ref, o_ref):
    """out = conv2(relu(bn2(y1))) + x fused."""
    Bt, H, W, C = y_ref.shape
    t = jnp.maximum(y_ref[...] * scale_ref[...] + shift_ref[...], 0.0)
    acc = _conv3x3_folded(t, w_ref)
    o_ref[...] = acc.reshape(Bt, H, W, C) + x_ref[...]


# ------------------------------ JAX wrapper --------------------------------- #

def _pick_bt(n, per_image_bytes, target_bytes=4 << 20):
    """Images per grid step: large enough to amortize per-step overhead, small
    enough for VMEM, while keeping >= 2 grid steps (megacore / v7x)."""
    bt = int(max(1, min(n, target_bytes // max(per_image_bytes, 1))))
    if n >= 2:
        bt = max(1, min(bt, n // 2))
    while n % bt:
        bt -= 1
    return bt


def preact_block_forward(x_nchw, w1, w2, g1, b1, g2, b2):
    N, C, H, W = x_nchw.shape
    nhw = N * H * W

    # Layout glue at the PyTorch (NCHW) boundary; channels stay at true C.
    x_nhwc = jnp.transpose(x_nchw, (0, 2, 3, 1)).astype(jnp.float32)

    # Fold the 3 kw taps of each conv into the contraction:
    # (Cout, Cin, 3, 3) -> (kh, kw*Cin, Cout), matching the in-kernel patch
    # layout [t(w-1) | t(w) | t(w+1)].  Weights are bf16 MXU operands.
    def w_fold(w):
        wt = jnp.transpose(w.astype(jnp.float32), (2, 3, 1, 0))  # (kh,kw,Cin,Cout)
        return wt.reshape(3, 3 * C, C).astype(jnp.bfloat16)

    w1c, w2c = w_fold(w1), w_fold(w2)

    Bt = _pick_bt(N, H * W * C * 4)
    G = N // Bt

    img_spec = pl.BlockSpec((Bt, H, W, C), lambda i: (i, 0, 0, 0))
    vec_out_spec = pl.BlockSpec((1, 1, C), lambda i: (i, 0, 0))
    chan_spec = pl.BlockSpec((1, C), lambda i: (0, 0))
    w_spec = pl.BlockSpec((3, 3 * C, C), lambda i: (0, 0, 0))
    cparams = pltpu.CompilerParams(
        dimension_semantics=("parallel",),
        vmem_limit_bytes=32 * 1024 * 1024,
    )

    def fold_bn(sum_, sq_, g, b):
        mean = jnp.sum(sum_, axis=(0, 1)) / nhw
        var = jnp.maximum(jnp.sum(sq_, axis=(0, 1)) / nhw - mean * mean, 0.0)
        inv = jax.lax.rsqrt(var + _EPS) * g.astype(jnp.float32)
        scale = inv.reshape(1, C)
        shift = (b.astype(jnp.float32) - mean * inv).reshape(1, C)
        return scale, shift

    # ---- phase 0: bn1 batch statistics of x (two-phase grid reduction) ---- #
    s1, q1 = pl.pallas_call(
        _stats_kernel,
        out_shape=(jax.ShapeDtypeStruct((G, 1, C), jnp.float32),
                   jax.ShapeDtypeStruct((G, 1, C), jnp.float32)),
        grid=(G,),
        in_specs=[img_spec],
        out_specs=(vec_out_spec, vec_out_spec),
        compiler_params=cparams,
    )(x_nhwc)
    scale1, shift1 = fold_bn(s1, q1, g1, b1)

    # ---- phase 1: y1 = conv1(relu(bn1(x))) + partial bn2 stats of y1 ------ #
    y1, s2, q2 = pl.pallas_call(
        _stage1_kernel,
        out_shape=(jax.ShapeDtypeStruct((N, H, W, C), jnp.float32),
                   jax.ShapeDtypeStruct((G, 1, C), jnp.float32),
                   jax.ShapeDtypeStruct((G, 1, C), jnp.float32)),
        grid=(G,),
        in_specs=[img_spec, chan_spec, chan_spec, w_spec],
        out_specs=(img_spec, vec_out_spec, vec_out_spec),
        compiler_params=cparams,
    )(x_nhwc, scale1, shift1, w1c)
    scale2, shift2 = fold_bn(s2, q2, g2, b2)

    # ---- phase 2: out = conv2(relu(bn2(y1))) + x --------------------------- #
    out_nhwc = pl.pallas_call(
        _stage2_kernel,
        out_shape=jax.ShapeDtypeStruct((N, H, W, C), jnp.float32),
        grid=(G,),
        in_specs=[img_spec, img_spec, chan_spec, chan_spec, w_spec],
        out_specs=img_spec,
        compiler_params=cparams,
    )(y1, x_nhwc, scale2, shift2, w2c)

    return jnp.transpose(out_nhwc, (0, 3, 1, 2))


# --------------------------- pure-JAX reference ----------------------------- #

def _reference(x, w1, w2, g1, b1, g2, b2, conv_dtype=jnp.float32):
    def conv(x_, w):
        return jax.lax.conv_general_dilated(
            x_.astype(conv_dtype), w.astype(conv_dtype),
            window_strides=(1, 1), padding="SAME",
            dimension_numbers=("NCHW", "OIHW", "NCHW"),
            preferred_element_type=jnp.float32,
            precision=jax.lax.Precision.HIGHEST)

    def bn_train(x_, g, beta):
        m = jnp.mean(x_, axis=(0, 2, 3), keepdims=True)
        v = jnp.mean((x_ - m) ** 2, axis=(0, 2, 3), keepdims=True)
        return ((x_ - m) * jax.lax.rsqrt(v + _EPS)
                * g[None, :, None, None] + beta[None, :, None, None])

    out = jax.nn.relu(bn_train(x, g1, b1))
    shortcut = x                                  # stride=1, in_planes==planes
    out = conv(out, w1)
    out = conv(jax.nn.relu(bn_train(out, g2, b2)), w2)
    return out + shortcut


# --------------------------------- main ------------------------------------ #

if __name__ == "__main__":
    key = jax.random.PRNGKey(0)
    N, C, H, W = 2, 4, 16, 16
    ks = jax.random.split(key, 3)

    x = jax.random.normal(ks[0], (N, C, H, W), jnp.float32)
    # Conv2d(C, C, 3, padding=1, bias=False) weights, deterministic init.
    w1 = jax.random.normal(ks[1], (C, C, 3, 3), jnp.float32) * 0.2
    w2 = jax.random.normal(ks[2], (C, C, 3, 3), jnp.float32) * 0.2
    # BatchNorm2d default affine init (gamma=1, beta=0).
    g1 = jnp.ones((C,), jnp.float32); b1 = jnp.zeros((C,), jnp.float32)
    g2 = jnp.ones((C,), jnp.float32); b2 = jnp.zeros((C,), jnp.float32)

    out = jax.jit(preact_block_forward)(x, w1, w2, g1, b1, g2, b2)
    jax.block_until_ready(out)

    # Check 1: reference with the same conv operand precision (bf16 operands,
    # f32 accumulation) -- isolates kernel bugs from intentional bf16 rounding.
    ref_bf16 = _reference(x, w1, w2, g1, b1, g2, b2, conv_dtype=jnp.bfloat16)
    err_b = float(jnp.max(jnp.abs(out - ref_bf16)))
    assert jnp.allclose(out, ref_bf16, atol=1e-2, rtol=1e-2), (
        f"mismatch vs bf16-matched reference, max err={err_b}")

    # Check 2: full-f32 reference; the gap is bounded by bf16 MXU-operand
    # rounding (deliberate perf/accuracy trade-off from the review).
    ref_f32 = _reference(x, w1, w2, g1, b1, g2, b2, conv_dtype=jnp.float32)
    err_f = float(jnp.max(jnp.abs(out - ref_f32)))
    assert jnp.allclose(out, ref_f32, atol=5e-2, rtol=5e-2), (
        f"mismatch vs f32 reference, max err={err_f}")

    print("KERNEL_OK")
</pallas_src>

<mosaic_0001>
module attributes {stable_mosaic.version = 11 : i64} {
  func.func @_stats_kernel(%arg0: i32, %arg1: memref<1x16x16x4xf32, #tpu.memory_space<vmem>>, %arg2: memref<1x1x4xf32, #tpu.memory_space<vmem>>, %arg3: memref<1x1x4xf32, #tpu.memory_space<vmem>>) attributes {dimension_semantics = [#tpu.dimension_semantics<parallel>], iteration_bounds = array<i64: 2>, scalar_prefetch = 0 : i64, scratch_operands = 0 : i64, tpu.core_type = #tpu.core_type<tc>, window_params = [{transform_indices = @transform_0, window_bounds = array<i64: 1, 16, 16, 4>}, {transform_indices = @transform_1, window_bounds = array<i64: 1, 1, 4>}, {transform_indices = @transform_2, window_bounds = array<i64: 1, 1, 4>}]} {
    %c0 = arith.constant 0 : index
    %c0_0 = arith.constant 0 : index
    %c0_1 = arith.constant 0 : index
    %c0_2 = arith.constant 0 : index
    %0 = vector.load %arg1[%c0, %c0_0, %c0_1, %c0_2] : memref<1x16x16x4xf32, #tpu.memory_space<vmem>>, vector<1x16x16x4xf32>
    %1 = vector.shape_cast %0 : vector<1x16x16x4xf32> to vector<256x4xf32>
    %cst = arith.constant dense<0.000000e+00> : vector<4xf32>
    %2 = vector.multi_reduction <add>, %1, %cst [0] : vector<256x4xf32> to vector<4xf32>
    %3 = vector.shape_cast %2 : vector<4xf32> to vector<1x4xf32>
    %c0_3 = arith.constant 0 : index
    %c0_4 = arith.constant 0 : index
    %c0_5 = arith.constant 0 : index
    %4 = vector.load %arg2[%c0_3, %c0_4, %c0_5] : memref<1x1x4xf32, #tpu.memory_space<vmem>>, vector<1x1x4xf32>
    %5 = vector.shape_cast %4 : vector<1x1x4xf32> to vector<1x4xf32>
    %6 = vector.shape_cast %3 : vector<1x4xf32> to vector<1x1x4xf32>
    tpu.vector_store %arg2[%c0_3, %c0_4, %c0_5], %6 {strides = array<i32>} : memref<1x1x4xf32, #tpu.memory_space<vmem>>, vector<1x1x4xf32>,
    %7 = arith.mulf %1, %1 : vector<256x4xf32>
    %cst_6 = arith.constant dense<0.000000e+00> : vector<4xf32>
    %8 = vector.multi_reduction <add>, %7, %cst_6 [0] : vector<256x4xf32> to vector<4xf32>
    %9 = vector.shape_cast %8 : vector<4xf32> to vector<1x4xf32>
    %c0_7 = arith.constant 0 : index
    %c0_8 = arith.constant 0 : index
    %c0_9 = arith.constant 0 : index
    %10 = vector.load %arg3[%c0_7, %c0_8, %c0_9] : memref<1x1x4xf32, #tpu.memory_space<vmem>>, vector<1x1x4xf32>
    %11 = vector.shape_cast %10 : vector<1x1x4xf32> to vector<1x4xf32>
    %12 = vector.shape_cast %9 : vector<1x4xf32> to vector<1x1x4xf32>
    tpu.vector_store %arg3[%c0_7, %c0_8, %c0_9], %12 {strides = array<i32>} : memref<1x1x4xf32, #tpu.memory_space<vmem>>, vector<1x1x4xf32>,
    return
  }
  func.func @transform_0(%arg0: i32) -> (i32, i32, i32, i32) {
    %c0_i32 = arith.constant 0 : i32
    %c0_i32_0 = arith.constant 0 : i32
    %c0_i32_1 = arith.constant 0 : i32
    %c0_i32_2 = arith.constant 0 : i32
    return %arg0, %c0_i32, %c0_i32_0, %c0_i32_1 : i32, i32, i32, i32
  }
  func.func @transform_1(%arg0: i32) -> (i32, i32, i32) {
    %c0_i32 = arith.constant 0 : i32
    %c0_i32_0 = arith.constant 0 : i32
    %c0_i32_1 = arith.constant 0 : i32
    return %arg0, %c0_i32, %c0_i32_0 : i32, i32, i32
  }
  func.func @transform_2(%arg0: i32) -> (i32, i32, i32) {
    %c0_i32 = arith.constant 0 : i32
    %c0_i32_0 = arith.constant 0 : i32
    %c0_i32_1 = arith.constant 0 : i32
    return %arg0, %c0_i32, %c0_i32_0 : i32, i32, i32
  }
}

module attributes {stable_mosaic.version = 11 : i64} {
  func.func @_stage1_kernel(%arg0: i32, %arg1: memref<1x16x16x4xf32, #tpu.memory_space<vmem>>, %arg2: memref<1x4xf32, #tpu.memory_space<vmem>>, %arg3: memref<1x4xf32, #tpu.memory_space<vmem>>, %arg4: memref<3x12x4xbf16, #tpu.memory_space<vmem>>, %arg5: memref<1x16x16x4xf32, #tpu.memory_space<vmem>>, %arg6: memref<1x1x4xf32, #tpu.memory_space<vmem>>, %arg7: memref<1x1x4xf32, #tpu.memory_space<vmem>>) attributes {dimension_semantics = [#tpu.dimension_semantics<parallel>], iteration_bounds = array<i64: 2>, scalar_prefetch = 0 : i64, scratch_operands = 0 : i64, tpu.core_type = #tpu.core_type<tc>, window_params = [{transform_indices = @transform_0, window_bounds = array<i64: 1, 16, 16, 4>}, {pipeline_mode = #tpu.pipeline_mode<synchronous>, transform_indices = @transform_1, window_bounds = array<i64: 1, 4>}, {pipeline_mode = #tpu.pipeline_mode<synchronous>, transform_indices = @transform_2, window_bounds = array<i64: 1, 4>}, {pipeline_mode = #tpu.pipeline_mode<synchronous>, transform_indices = @transform_3, window_bounds = array<i64: 3, 12, 4>}, {transform_indices = @transform_4, window_bounds = array<i64: 1, 16, 16, 4>}, {transform_indices = @transform_5, window_bounds = array<i64: 1, 1, 4>}, {transform_indices = @transform_6, window_bounds = array<i64: 1, 1, 4>}]} {
    %c0 = arith.constant 0 : index
    %c0_0 = arith.constant 0 : index
    %c0_1 = arith.constant 0 : index
    %c0_2 = arith.constant 0 : index
    %0 = vector.load %arg1[%c0, %c0_0, %c0_1, %c0_2] : memref<1x16x16x4xf32, #tpu.memory_space<vmem>>, vector<1x16x16x4xf32>
    %c0_3 = arith.constant 0 : index
    %c0_4 = arith.constant 0 : index
    %1 = vector.load %arg2[%c0_3, %c0_4] : memref<1x4xf32, #tpu.memory_space<vmem>>, vector<1x4xf32>
    %2 = vector.shape_cast %1 : vector<1x4xf32> to vector<1x1x1x4xf32>
    %3 = vector.broadcast %2 : vector<1x1x1x4xf32> to vector<1x16x16x4xf32>
    %4 = arith.mulf %0, %3 : vector<1x16x16x4xf32>
    %c0_5 = arith.constant 0 : index
    %c0_6 = arith.constant 0 : index
    %5 = vector.load %arg3[%c0_5, %c0_6] : memref<1x4xf32, #tpu.memory_space<vmem>>, vector<1x4xf32>
    %6 = vector.shape_cast %5 : vector<1x4xf32> to vector<1x1x1x4xf32>
    %7 = vector.broadcast %6 : vector<1x1x1x4xf32> to vector<1x16x16x4xf32>
    %8 = arith.addf %4, %7 : vector<1x16x16x4xf32>
    %cst = arith.constant 0.000000e+00 : f32
    %9 = vector.broadcast %cst : f32 to vector<1x16x16x4xf32>
    %10 = arith.maximumf %8, %9 : vector<1x16x16x4xf32>
    %cst_7 = arith.constant 0.000000e+00 : f32
    %11 = vector.broadcast %cst_7 : f32 to vector<1x16x1x4xf32>
    %12 = vector.extract_strided_slice %10 {offsets = [0, 0, 0, 0], sizes = [1, 16, 15, 4], strides = [1, 1, 1, 1]} : vector<1x16x16x4xf32> to vector<1x16x15x4xf32>
    %13 = tpu.concatenate %11, %12 in 2 : vector<1x16x1x4xf32>, vector<1x16x15x4xf32> -> vector<1x16x16x4xf32>
    %14 = vector.extract_strided_slice %10 {offsets = [0, 0, 1, 0], sizes = [1, 16, 15, 4], strides = [1, 1, 1, 1]} : vector<1x16x16x4xf32> to vector<1x16x15x4xf32>
    %15 = tpu.concatenate %14, %11 in 2 : vector<1x16x15x4xf32>, vector<1x16x1x4xf32> -> vector<1x16x16x4xf32>
    %16 = tpu.concatenate %13, %10, %15 in 3 : vector<1x16x16x4xf32>, vector<1x16x16x4xf32>, vector<1x16x16x4xf32> -> vector<1x16x16x12xf32>
    %17 = arith.truncf %16 : vector<1x16x16x12xf32> to vector<1x16x16x12xbf16>
    %cst_8 = arith.constant 0.000000e+00 : bf16
    %18 = vector.broadcast %cst_8 : bf16 to vector<1x1x16x12xbf16>
    %19 = vector.extract_strided_slice %17 {offsets = [0, 0, 0, 0], sizes = [1, 15, 16, 12], strides = [1, 1, 1, 1]} : vector<1x16x16x12xbf16> to vector<1x15x16x12xbf16>
    %20 = tpu.concatenate %18, %19 in 1 : vector<1x1x16x12xbf16>, vector<1x15x16x12xbf16> -> vector<1x16x16x12xbf16>
    %21 = vector.extract_strided_slice %17 {offsets = [0, 1, 0, 0], sizes = [1, 15, 16, 12], strides = [1, 1, 1, 1]} : vector<1x16x16x12xbf16> to vector<1x15x16x12xbf16>
    %22 = tpu.concatenate %21, %18 in 1 : vector<1x15x16x12xbf16>, vector<1x1x16x12xbf16> -> vector<1x16x16x12xbf16>
    %cst_9 = arith.constant 0.000000e+00 : f32
    %23 = vector.broadcast %cst_9 : f32 to vector<256x4xf32>
    %24 = vector.shape_cast %20 : vector<1x16x16x12xbf16> to vector<256x12xbf16>
    %c0_10 = arith.constant 0 : index
    %c0_11 = arith.constant 0 : index
    %c0_12 = arith.constant 0 : index
    %25 = vector.load %arg4[%c0_10, %c0_11, %c0_12] : memref<3x12x4xbf16, #tpu.memory_space<vmem>>, vector<1x12x4xbf16>
    %26 = vector.shape_cast %25 : vector<1x12x4xbf16> to vector<12x4xbf16>
    %cst_13 = arith.constant dense<0.000000e+00> : vector<256x4xf32>
    %27 = tpu.matmul %24, %26, %cst_13 {dimension_numbers = #tpu.dot_dimension_numbers<[1], [0], [0], [1], [0, 0, 1, 1], [], []>} : vector<256x12xbf16>, vector<12x4xbf16>, vector<256x4xf32> -> vector<256x4xf32>
    %28 = arith.addf %23, %27 : vector<256x4xf32>
    %29 = vector.shape_cast %17 : vector<1x16x16x12xbf16> to vector<256x12xbf16>
    %c1 = arith.constant 1 : index
    %c0_14 = arith.constant 0 : index
    %c0_15 = arith.constant 0 : index
    %30 = vector.load %arg4[%c1, %c0_14, %c0_15] : memref<3x12x4xbf16, #tpu.memory_space<vmem>>, vector<1x12x4xbf16>
    %31 = vector.shape_cast %30 : vector<1x12x4xbf16> to vector<12x4xbf16>
    %cst_16 = arith.constant dense<0.000000e+00> : vector<256x4xf32>
    %32 = tpu.matmul %29, %31, %cst_16 {dimension_numbers = #tpu.dot_dimension_numbers<[1], [0], [0], [1], [0, 0, 1, 1], [], []>} : vector<256x12xbf16>, vector<12x4xbf16>, vector<256x4xf32> -> vector<256x4xf32>
    %33 = arith.addf %28, %32 : vector<256x4xf32>
    %34 = vector.shape_cast %22 : vector<1x16x16x12xbf16> to vector<256x12xbf16>
    %c2 = arith.constant 2 : index
    %c0_17 = arith.constant 0 : index
    %c0_18 = arith.constant 0 : index
    %35 = vector.load %arg4[%c2, %c0_17, %c0_18] : memref<3x12x4xbf16, #tpu.memory_space<vmem>>, vector<1x12x4xbf16>
    %36 = vector.shape_cast %35 : vector<1x12x4xbf16> to vector<12x4xbf16>
    %cst_19 = arith.constant dense<0.000000e+00> : vector<256x4xf32>
    %37 = tpu.matmul %34, %36, %cst_19 {dimension_numbers = #tpu.dot_dimension_numbers<[1], [0], [0], [1], [0, 0, 1, 1], [], []>} : vector<256x12xbf16>, vector<12x4xbf16>, vector<256x4xf32> -> vector<256x4xf32>
    %38 = arith.addf %33, %37 : vector<256x4xf32>
    %39 = vector.shape_cast %38 : vector<256x4xf32> to vector<1x16x16x4xf32>
    %c0_20 = arith.constant 0 : index
    %c0_21 = arith.constant 0 : index
    %c0_22 = arith.constant 0 : index
    %c0_23 = arith.constant 0 : index
    %40 = vector.load %arg5[%c0_20, %c0_21, %c0_22, %c0_23] : memref<1x16x16x4xf32, #tpu.memory_space<vmem>>, vector<1x16x16x4xf32>
    tpu.vector_store %arg5[%c0_20, %c0_21, %c0_22, %c0_23], %39 {strides = array<i32>} : memref<1x16x16x4xf32, #tpu.memory_space<vmem>>, vector<1x16x16x4xf32>,
    %cst_24 = arith.constant dense<0.000000e+00> : vector<4xf32>
    %41 = vector.multi_reduction <add>, %38, %cst_24 [0] : vector<256x4xf32> to vector<4xf32>
    %42 = vector.shape_cast %41 : vector<4xf32> to vector<1x4xf32>
    %c0_25 = arith.constant 0 : index
    %c0_26 = arith.constant 0 : index
    %c0_27 = arith.constant 0 : index
    %43 = vector.load %arg6[%c0_25, %c0_26, %c0_27] : memref<1x1x4xf32, #tpu.memory_space<vmem>>, vector<1x1x4xf32>
    %44 = vector.shape_cast %43 : vector<1x1x4xf32> to vector<1x4xf32>
    %45 = vector.shape_cast %42 : vector<1x4xf32> to vector<1x1x4xf32>
    tpu.vector_store %arg6[%c0_25, %c0_26, %c0_27], %45 {strides = array<i32>} : memref<1x1x4xf32, #tpu.memory_space<vmem>>, vector<1x1x4xf32>,
    %46 = arith.mulf %38, %38 : vector<256x4xf32>
    %cst_28 = arith.constant dense<0.000000e+00> : vector<4xf32>
    %47 = vector.multi_reduction <add>, %46, %cst_28 [0] : vector<256x4xf32> to vector<4xf32>
    %48 = vector.shape_cast %47 : vector<4xf32> to vector<1x4xf32>
    %c0_29 = arith.constant 0 : index
    %c0_30 = arith.constant 0 : index
    %c0_31 = arith.constant 0 : index
    %49 = vector.load %arg7[%c0_29, %c0_30, %c0_31] : memref<1x1x4xf32, #tpu.memory_space<vmem>>, vector<1x1x4xf32>
    %50 = vector.shape_cast %49 : vector<1x1x4xf32> to vector<1x4xf32>
    %51 = vector.shape_cast %48 : vector<1x4xf32> to vector<1x1x4xf32>
    tpu.vector_store %arg7[%c0_29, %c0_30, %c0_31], %51 {strides = array<i32>} : memref<1x1x4xf32, #tpu.memory_space<vmem>>, vector<1x1x4xf32>,
    return
  }
  func.func @transform_0(%arg0: i32) -> (i32, i32, i32, i32) {
    %c0_i32 = arith.constant 0 : i32
    %c0_i32_0 = arith.constant 0 : i32
    %c0_i32_1 = arith.constant 0 : i32
    %c0_i32_2 = arith.constant 0 : i32
    return %arg0, %c0_i32, %c0_i32_0, %c0_i32_1 : i32, i32, i32, i32
  }
  func.func @transform_1(%arg0: i32) -> (i32, i32) {
    %c0_i32 = arith.constant 0 : i32
    %c0_i32_0 = arith.constant 0 : i32
    %c0_i32_1 = arith.constant 0 : i32
    return %c0_i32, %c0_i32_0 : i32, i32
  }
  func.func @transform_2(%arg0: i32) -> (i32, i32) {
    %c0_i32 = arith.constant 0 : i32
    %c0_i32_0 = arith.constant 0 : i32
    %c0_i32_1 = arith.constant 0 : i32
    return %c0_i32, %c0_i32_0 : i32, i32
  }
  func.func @transform_3(%arg0: i32) -> (i32, i32, i32) {
    %c0_i32 = arith.constant 0 : i32
    %c0_i32_0 = arith.constant 0 : i32
    %c0_i32_1 = arith.constant 0 : i32
    %c0_i32_2 = arith.constant 0 : i32
    return %c0_i32, %c0_i32_0, %c0_i32_1 : i32, i32, i32
  }
  func.func @transform_4(%arg0: i32) -> (i32, i32, i32, i32) {
    %c0_i32 = arith.constant 0 : i32
    %c0_i32_0 = arith.constant 0 : i32
    %c0_i32_1 = arith.constant 0 : i32
    %c0_i32_2 = arith.constant 0 : i32
    return %arg0, %c0_i32, %c0_i32_0, %c0_i32_1 : i32, i32, i32, i32
  }
  func.func @transform_5(%arg0: i32) -> (i32, i32, i32) {
    %c0_i32 = arith.constant 0 : i32
    %c0_i32_0 = arith.constant 0 : i32
    %c0_i32_1 = arith.constant 0 : i32
    return %arg0, %c0_i32, %c0_i32_0 : i32, i32, i32
  }
  func.func @transform_6(%arg0: i32) -> (i32, i32, i32) {
    %c0_i32 = arith.constant 0 : i32
    %c0_i32_0 = arith.constant 0 : i32
    %c0_i32_1 = arith.constant 0 : i32
    return %arg0, %c0_i32, %c0_i32_0 : i32, i32, i32
  }
}

module attributes {stable_mosaic.version = 11 : i64} {
  func.func @_stage2_kernel(%arg0: i32, %arg1: memref<1x16x16x4xf32, #tpu.memory_space<vmem>>, %arg2: memref<1x16x16x4xf32, #tpu.memory_space<vmem>>, %arg3: memref<1x4xf32, #tpu.memory_space<vmem>>, %arg4: memref<1x4xf32, #tpu.memory_space<vmem>>, %arg5: memref<3x12x4xbf16, #tpu.memory_space<vmem>>, %arg6: memref<1x16x16x4xf32, #tpu.memory_space<vmem>>) attributes {dimension_semantics = [#tpu.dimension_semantics<parallel>], iteration_bounds = array<i64: 2>, scalar_prefetch = 0 : i64, scratch_operands = 0 : i64, tpu.core_type = #tpu.core_type<tc>, window_params = [{transform_indices = @transform_0, window_bounds = array<i64: 1, 16, 16, 4>}, {transform_indices = @transform_1, window_bounds = array<i64: 1, 16, 16, 4>}, {pipeline_mode = #tpu.pipeline_mode<synchronous>, transform_indices = @transform_2, window_bounds = array<i64: 1, 4>}, {pipeline_mode = #tpu.pipeline_mode<synchronous>, transform_indices = @transform_3, window_bounds = array<i64: 1, 4>}, {pipeline_mode = #tpu.pipeline_mode<synchronous>, transform_indices = @transform_4, window_bounds = array<i64: 3, 12, 4>}, {transform_indices = @transform_5, window_bounds = array<i64: 1, 16, 16, 4>}]} {
    %c0 = arith.constant 0 : index
    %c0_0 = arith.constant 0 : index
    %c0_1 = arith.constant 0 : index
    %c0_2 = arith.constant 0 : index
    %0 = vector.load %arg1[%c0, %c0_0, %c0_1, %c0_2] : memref<1x16x16x4xf32, #tpu.memory_space<vmem>>, vector<1x16x16x4xf32>
    %c0_3 = arith.constant 0 : index
    %c0_4 = arith.constant 0 : index
    %1 = vector.load %arg3[%c0_3, %c0_4] : memref<1x4xf32, #tpu.memory_space<vmem>>, vector<1x4xf32>
    %2 = vector.shape_cast %1 : vector<1x4xf32> to vector<1x1x1x4xf32>
    %3 = vector.broadcast %2 : vector<1x1x1x4xf32> to vector<1x16x16x4xf32>
    %4 = arith.mulf %0, %3 : vector<1x16x16x4xf32>
    %c0_5 = arith.constant 0 : index
    %c0_6 = arith.constant 0 : index
    %5 = vector.load %arg4[%c0_5, %c0_6] : memref<1x4xf32, #tpu.memory_space<vmem>>, vector<1x4xf32>
    %6 = vector.shape_cast %5 : vector<1x4xf32> to vector<1x1x1x4xf32>
    %7 = vector.broadcast %6 : vector<1x1x1x4xf32> to vector<1x16x16x4xf32>
    %8 = arith.addf %4, %7 : vector<1x16x16x4xf32>
    %cst = arith.constant 0.000000e+00 : f32
    %9 = vector.broadcast %cst : f32 to vector<1x16x16x4xf32>
    %10 = arith.maximumf %8, %9 : vector<1x16x16x4xf32>
    %cst_7 = arith.constant 0.000000e+00 : f32
    %11 = vector.broadcast %cst_7 : f32 to vector<1x16x1x4xf32>
    %12 = vector.extract_strided_slice %10 {offsets = [0, 0, 0, 0], sizes = [1, 16, 15, 4], strides = [1, 1, 1, 1]} : vector<1x16x16x4xf32> to vector<1x16x15x4xf32>
    %13 = tpu.concatenate %11, %12 in 2 : vector<1x16x1x4xf32>, vector<1x16x15x4xf32> -> vector<1x16x16x4xf32>
    %14 = vector.extract_strided_slice %10 {offsets = [0, 0, 1, 0], sizes = [1, 16, 15, 4], strides = [1, 1, 1, 1]} : vector<1x16x16x4xf32> to vector<1x16x15x4xf32>
    %15 = tpu.concatenate %14, %11 in 2 : vector<1x16x15x4xf32>, vector<1x16x1x4xf32> -> vector<1x16x16x4xf32>
    %16 = tpu.concatenate %13, %10, %15 in 3 : vector<1x16x16x4xf32>, vector<1x16x16x4xf32>, vector<1x16x16x4xf32> -> vector<1x16x16x12xf32>
    %17 = arith.truncf %16 : vector<1x16x16x12xf32> to vector<1x16x16x12xbf16>
    %cst_8 = arith.constant 0.000000e+00 : bf16
    %18 = vector.broadcast %cst_8 : bf16 to vector<1x1x16x12xbf16>
    %19 = vector.extract_strided_slice %17 {offsets = [0, 0, 0, 0], sizes = [1, 15, 16, 12], strides = [1, 1, 1, 1]} : vector<1x16x16x12xbf16> to vector<1x15x16x12xbf16>
    %20 = tpu.concatenate %18, %19 in 1 : vector<1x1x16x12xbf16>, vector<1x15x16x12xbf16> -> vector<1x16x16x12xbf16>
    %21 = vector.extract_strided_slice %17 {offsets = [0, 1, 0, 0], sizes = [1, 15, 16, 12], strides = [1, 1, 1, 1]} : vector<1x16x16x12xbf16> to vector<1x15x16x12xbf16>
    %22 = tpu.concatenate %21, %18 in 1 : vector<1x15x16x12xbf16>, vector<1x1x16x12xbf16> -> vector<1x16x16x12xbf16>
    %cst_9 = arith.constant 0.000000e+00 : f32
    %23 = vector.broadcast %cst_9 : f32 to vector<256x4xf32>
    %24 = vector.shape_cast %20 : vector<1x16x16x12xbf16> to vector<256x12xbf16>
    %c0_10 = arith.constant 0 : index
    %c0_11 = arith.constant 0 : index
    %c0_12 = arith.constant 0 : index
    %25 = vector.load %arg5[%c0_10, %c0_11, %c0_12] : memref<3x12x4xbf16, #tpu.memory_space<vmem>>, vector<1x12x4xbf16>
    %26 = vector.shape_cast %25 : vector<1x12x4xbf16> to vector<12x4xbf16>
    %cst_13 = arith.constant dense<0.000000e+00> : vector<256x4xf32>
    %27 = tpu.matmul %24, %26, %cst_13 {dimension_numbers = #tpu.dot_dimension_numbers<[1], [0], [0], [1], [0, 0, 1, 1], [], []>} : vector<256x12xbf16>, vector<12x4xbf16>, vector<256x4xf32> -> vector<256x4xf32>
    %28 = arith.addf %23, %27 : vector<256x4xf32>
    %29 = vector.shape_cast %17 : vector<1x16x16x12xbf16> to vector<256x12xbf16>
    %c1 = arith.constant 1 : index
    %c0_14 = arith.constant 0 : index
    %c0_15 = arith.constant 0 : index
    %30 = vector.load %arg5[%c1, %c0_14, %c0_15] : memref<3x12x4xbf16, #tpu.memory_space<vmem>>, vector<1x12x4xbf16>
    %31 = vector.shape_cast %30 : vector<1x12x4xbf16> to vector<12x4xbf16>
    %cst_16 = arith.constant dense<0.000000e+00> : vector<256x4xf32>
    %32 = tpu.matmul %29, %31, %cst_16 {dimension_numbers = #tpu.dot_dimension_numbers<[1], [0], [0], [1], [0, 0, 1, 1], [], []>} : vector<256x12xbf16>, vector<12x4xbf16>, vector<256x4xf32> -> vector<256x4xf32>
    %33 = arith.addf %28, %32 : vector<256x4xf32>
    %34 = vector.shape_cast %22 : vector<1x16x16x12xbf16> to vector<256x12xbf16>
    %c2 = arith.constant 2 : index
    %c0_17 = arith.constant 0 : index
    %c0_18 = arith.constant 0 : index
    %35 = vector.load %arg5[%c2, %c0_17, %c0_18] : memref<3x12x4xbf16, #tpu.memory_space<vmem>>, vector<1x12x4xbf16>
    %36 = vector.shape_cast %35 : vector<1x12x4xbf16> to vector<12x4xbf16>
    %cst_19 = arith.constant dense<0.000000e+00> : vector<256x4xf32>
    %37 = tpu.matmul %34, %36, %cst_19 {dimension_numbers = #tpu.dot_dimension_numbers<[1], [0], [0], [1], [0, 0, 1, 1], [], []>} : vector<256x12xbf16>, vector<12x4xbf16>, vector<256x4xf32> -> vector<256x4xf32>
    %38 = arith.addf %33, %37 : vector<256x4xf32>
    %39 = vector.shape_cast %38 : vector<256x4xf32> to vector<1x16x16x4xf32>
    %c0_20 = arith.constant 0 : index
    %c0_21 = arith.constant 0 : index
    %c0_22 = arith.constant 0 : index
    %c0_23 = arith.constant 0 : index
    %40 = vector.load %arg2[%c0_20, %c0_21, %c0_22, %c0_23] : memref<1x16x16x4xf32, #tpu.memory_space<vmem>>, vector<1x16x16x4xf32>
    %41 = arith.addf %39, %40 : vector<1x16x16x4xf32>
    %c0_24 = arith.constant 0 : index
    %c0_25 = arith.constant 0 : index
    %c0_26 = arith.constant 0 : index
    %c0_27 = arith.constant 0 : index
    %42 = vector.load %arg6[%c0_24, %c0_25, %c0_26, %c0_27] : memref<1x16x16x4xf32, #tpu.memory_space<vmem>>, vector<1x16x16x4xf32>
    tpu.vector_store %arg6[%c0_24, %c0_25, %c0_26, %c0_27], %41 {strides = array<i32>} : memref<1x16x16x4xf32, #tpu.memory_space<vmem>>, vector<1x16x16x4xf32>,
    return
  }
  func.func @transform_0(%arg0: i32) -> (i32, i32, i32, i32) {
    %c0_i32 = arith.constant 0 : i32
    %c0_i32_0 = arith.constant 0 : i32
    %c0_i32_1 = arith.constant 0 : i32
    %c0_i32_2 = arith.constant 0 : i32
    return %arg0, %c0_i32, %c0_i32_0, %c0_i32_1 : i32, i32, i32, i32
  }
  func.func @transform_1(%arg0: i32) -> (i32, i32, i32, i32) {
    %c0_i32 = arith.constant 0 : i32
    %c0_i32_0 = arith.constant 0 : i32
    %c0_i32_1 = arith.constant 0 : i32
    %c0_i32_2 = arith.constant 0 : i32
    return %arg0, %c0_i32, %c0_i32_0, %c0_i32_1 : i32, i32, i32, i32
  }
  func.func @transform_2(%arg0: i32) -> (i32, i32) {
    %c0_i32 = arith.constant 0 : i32
    %c0_i32_0 = arith.constant 0 : i32
    %c0_i32_1 = arith.constant 0 : i32
    return %c0_i32, %c0_i32_0 : i32, i32
  }
  func.func @transform_3(%arg0: i32) -> (i32, i32) {
    %c0_i32 = arith.constant 0 : i32
    %c0_i32_0 = arith.constant 0 : i32
    %c0_i32_1 = arith.constant 0 : i32
    return %c0_i32, %c0_i32_0 : i32, i32
  }
  func.func @transform_4(%arg0: i32) -> (i32, i32, i32) {
    %c0_i32 = arith.constant 0 : i32
    %c0_i32_0 = arith.constant 0 : i32
    %c0_i32_1 = arith.constant 0 : i32
    %c0_i32_2 = arith.constant 0 : i32
    return %c0_i32, %c0_i32_0, %c0_i32_1 : i32, i32, i32
  }
  func.func @transform_5(%arg0: i32) -> (i32, i32, i32, i32) {
    %c0_i32 = arith.constant 0 : i32
    %c0_i32_0 = arith.constant 0 : i32
    %c0_i32_1 = arith.constant 0 : i32
    %c0_i32_2 = arith.constant 0 : i32
    return %arg0, %c0_i32, %c0_i32_0, %c0_i32_1 : i32, i32, i32, i32
  }
}

</mosaic_0001>

<bundles_post_ra>
// kernel: preact_block_forward.3
= control target key start
LH: loop header
LB: loop body
LE: loop exit
PB: predicated region body
PF: predicated region fallthrough
CT: control target
= control target key end

     0   :  { %s468_s9 = smov 0   ;;  %s593_s0 = inlined_call_operand.vmem [shape: f32[2,16,16,4], index: 0, kind: input, shape index: {}]   ;;  %s594_s1 = inlined_call_operand.vmem [shape: f32[2,1,4], index: 1, kind: output, shape index: {0}]   ;;  %s595_s2 = inlined_call_operand.vmem [shape: f32[2,1,4], index: 2, kind: output, shape index: {1}]  }
   0x1 LB: > { %s427_s10 = sadd.s32 4294967295, %s451_s9   ;;  %p431_p0 = scmp.ge.s32.totalorder %s451_s9, 1  ;;  %s451_s9 = sphi %s468_s9, %s13_s9  }
   0x2   : > { %p115_p1 = scmp.lt.s32.totalorder %s451_s9, 3 }
   0x4   : > { %p116_p2 = pnand %p431_p0, %p115_p1 }
   0x5   : > { %p138_p3 = scmp.lt.s32.totalorder (!%p116_p2), %s427_s10, 1  ;;  %vm181_vm0 = vcmask (!%p116_p2), 31744   ;;  %vm251_vm1 = vcmask (!%p116_p2), 24576  }
   0x6   : > { %119 = sbr.rel (%p116_p2) target bundleno = 98 (0x62), region = 24 }
   0xd   : > { %s597_s10 = smov (!%p138_p3, %s427_s10), 1 }
   0xe   : > { %s436_s11 = sshll.u32 %s597_s10, 8  ;;  %s145_s17 = scalar_lea.vmem %s594_s1, %s597_s10 }
   0xf   : > { %s482_s14 = scalar_lea.vmem %s593_s0, %s436_s11  ;;  %s148_s20 = scalar_lea.vmem %s595_s2, %s597_s10 }
  0x10   : > { %v149_v0 = vld [vmem:[%s482_s14] sm:$0xff]  ;;  %v150_v1 = vld [vmem:[%s482_s14 + $0x8] sm:$0xff]  ;;  %v151_v2 = vld [vmem:[%s482_s14 + $0x10] sm:$0xff] }
  0x11   : > { %v182_v3 = vsel %vm181_vm0, %v149_v0, 0.0  ;;  %v183_v4 = vsel %vm181_vm0, %v150_v1, 0.0  ;;  %v185_v5 = vsel %vm181_vm0, %v151_v2, 0.0  ;;  %v152_v6 = vld [vmem:[%s482_s14 + $0x18] sm:$0xff]  ;;  %v153_v9 = vld [vmem:[%s482_s14 + $0x20] sm:$0xff]  ;;  %v154_v12 = vld [vmem:[%s482_s14 + $0x28] sm:$0xff]  ;;  %v253_v27 = vmul.f32 %v149_v0, %v149_v0 }
  0x12   : > { %v184_v7 = vadd.f32 %v183_v4, %v182_v3  ;;  %v187_v8 = vsel %vm181_vm0, %v152_v6, 0.0  ;;  %v189_v11 = vsel %vm181_vm0, %v153_v9, 0.0  ;;  %v191_v14 = vsel %vm181_vm0, %v154_v12, 0.0  ;;  %v155_v15 = vld [vmem:[%s482_s14 + $0x30] sm:$0xff]  ;;  %v156_v18 = vld [vmem:[%s482_s14 + $0x38] sm:$0xff]  ;;  %v157_v21 = vld [vmem:[%s482_s14 + $0x40] sm:$0xff] }
  0x13   : > { %v193_v17 = vsel %vm181_vm0, %v155_v15, 0.0  ;;  %v195_v20 = vsel %vm181_vm0, %v156_v18, 0.0  ;;  %v197_v23 = vsel %vm181_vm0, %v157_v21, 0.0  ;;  %v158_v24 = vld [vmem:[%s482_s14 + $0x48] sm:$0xff]  ;;  %v254_v28 = vmul.f32 %v150_v1, %v150_v1  ;;  %v159_v30 = vld [vmem:[%s482_s14 + $0x50] sm:$0xff]  ;;  %v160_v32 = vld [vmem:[%s482_s14 + $0x58] sm:$0xff] }
  0x14   : > { %v186_v10 = vadd.f32 %v185_v5, %v184_v7  ;;  %v199_v26 = vsel %vm181_vm0, %v158_v24, 0.0  ;;  %v255_v29 = vmul.f32 %v151_v2, %v151_v2  ;;  %v201_v33 = vsel %vm181_vm0, %v159_v30, 0.0  ;;  %v161_v41 = vld [vmem:[%s482_s14 + $0x60] sm:$0xff]  ;;  %v162_v47 = vld [vmem:[%s482_s14 + $0x68] sm:$0xff]  ;;  %v163_v53 = vld [vmem:[%s482_s14 + $0x70] sm:$0xff] }
  0x15   : > { %v256_v34 = vmul.f32 %v152_v6, %v152_v6  ;;  %v203_v36 = vsel %vm181_vm0, %v160_v32, 0.0  ;;  %v257_v37 = vmul.f32 %v153_v9, %v153_v9  ;;  %v285_v38 = vsel %vm181_vm0, %v253_v27, 0.0  ;;  %v164_v59 = vld [vmem:[%s482_s14 + $0x78] sm:$0xff]  ;;  %v165_v1 = vld [vmem:[%s482_s14 + $0x80] sm:$0xff]  ;;  %v166_v7 = vld [vmem:[%s482_s14 + $0x88] sm:$0xff] }
  0x16   : > { %v188_v13 = vadd.f32 %v187_v8, %v186_v10  ;;  %v286_v39 = vsel %vm181_vm0, %v254_v28, 0.0  ;;  %v288_v40 = vsel %vm181_vm0, %v255_v29, 0.0  ;;  %v205_v44 = vsel %vm181_vm0, %v161_v41, 0.0 }
  0x17   : > { %v287_v43 = vadd.f32 %v286_v39, %v285_v38  ;;  %v258_v45 = vmul.f32 %v154_v12, %v154_v12  ;;  %v290_v46 = vsel %vm181_vm0, %v256_v34, 0.0  ;;  %v207_v50 = vsel %vm181_vm0, %v162_v47, 0.0 }
  0x18   : > { %v190_v16 = vadd.f32 %v189_v11, %v188_v13  ;;  %v259_v51 = vmul.f32 %v155_v15, %v155_v15  ;;  %v292_v52 = vsel %vm181_vm0, %v257_v37, 0.0  ;;  %v209_v56 = vsel %vm181_vm0, %v163_v53, 0.0  ;;  %v167_v13 = vld [vmem:[%s482_s14 + $0x90] sm:$0xff] }
  0x19   : > { %v289_v49 = vadd.f32 %v288_v40, %v287_v43  ;;  %v260_v57 = vmul.f32 %v156_v18, %v156_v18  ;;  %v294_v58 = vsel %vm181_vm0, %v258_v45, 0.0  ;;  %v211_v62 = vsel %vm181_vm0, %v164_v59, 0.0  ;;  %v171_v37 = vld [vmem:[%s482_s14 + $0xb0] sm:$0xff]  ;;  %v172_v43 = vld [vmem:[%s482_s14 + $0xb8] sm:$0xff] }
  0x1a   : > { %v192_v19 = vadd.f32 %v191_v14, %v190_v16  ;;  %v261_v63 = vmul.f32 %v157_v21, %v157_v21  ;;  %v296_v0 = vsel %vm181_vm0, %v259_v51, 0.0  ;;  %v213_v4 = vsel %vm181_vm0, %v165_v1, 0.0 }
  0x1b   : > { %v291_v55 = vadd.f32 %v290_v46, %v289_v49  ;;  %v262_v5 = vmul.f32 %v158_v24, %v158_v24  ;;  %v298_v6 = vsel %vm181_vm0, %v260_v57, 0.0  ;;  %v215_v10 = vsel %vm181_vm0, %v166_v7, 0.0  ;;  %v173_v49 = vld [vmem:[%s482_s14 + $0xc0] sm:$0xff] }
  0x1c   : > { %v194_v22 = vadd.f32 %v193_v17, %v192_v19  ;;  %v263_v11 = vmul.f32 %v159_v30, %v159_v30  ;;  %v300_v12 = vsel %vm181_vm0, %v261_v63, 0.0  ;;  %v217_v16 = vsel %vm181_vm0, %v167_v13, 0.0  ;;  %v168_v19 = vld [vmem:[%s482_s14 + $0x98] sm:$0xff] }
  0x1d   : > { %v293_v61 = vadd.f32 %v292_v52, %v291_v55  ;;  %v264_v17 = vmul.f32 %v160_v32, %v160_v32  ;;  %v302_v18 = vsel %vm181_vm0, %v262_v5, 0.0  ;;  %v266_v29 = vmul.f32 %v162_v47, %v162_v47  ;;  %v174_v55 = vld [vmem:[%s482_s14 + $0xc8] sm:$0xff] }
  0x1e   : > { %v196_v25 = vadd.f32 %v195_v20, %v194_v22  ;;  %v219_v22 = vsel %vm181_vm0, %v168_v19, 0.0  ;;  %v304_v24 = vsel %vm181_vm0, %v263_v11, 0.0  ;;  %v225_v40 = vsel %vm181_vm0, %v171_v37, 0.0 }
  0x1f   : > { %v295_v3 = vadd.f32 %v294_v58, %v293_v61  ;;  %v306_v30 = vsel %vm181_vm0, %v264_v17, 0.0  ;;  %v227_v46 = vsel %vm181_vm0, %v172_v43, 0.0  ;;  %v269_v47 = vmul.f32 %v165_v1, %v165_v1  ;;  %v175_v61 = vld [vmem:[%s482_s14 + $0xd0] sm:$0xff] }
  0x20   : > { %v198_v31 = vadd.f32 %v197_v23, %v196_v25  ;;  %v265_v23 = vmul.f32 %v161_v41, %v161_v41  ;;  %v169_v25 = vld [vmem:[%s482_s14 + $0xa0] sm:$0xff]  ;;  %v268_v41 = vmul.f32 %v164_v59, %v164_v59  ;;  %v229_v52 = vsel %vm181_vm0, %v173_v49, 0.0 }
  0x21   : > { %v297_v9 = vadd.f32 %v296_v0, %v295_v3  ;;  %v221_v28 = vsel %vm181_vm0, %v169_v25, 0.0  ;;  %v231_v58 = vsel %vm181_vm0, %v174_v55, 0.0  ;;  %v271_v59 = vmul.f32 %v167_v13, %v167_v13  ;;  %v176_v3 = vld [vmem:[%s482_s14 + $0xd8] sm:$0xff] }
  0x22   : > { %v200_v35 = vadd.f32 %v199_v26, %v198_v31  ;;  %v170_v31 = vld [vmem:[%s482_s14 + $0xa8] sm:$0xff]  ;;  %v233_v0 = vsel %vm181_vm0, %v175_v61, 0.0  ;;  %v272_v1 = vmul.f32 %v168_v19, %v168_v19  ;;  %v275_v19 = vmul.f32 %v171_v37, %v171_v37 }
  0x23   : > { %v299_v15 = vadd.f32 %v298_v6, %v297_v9  ;;  %v223_v34 = vsel %vm181_vm0, %v170_v31, 0.0  ;;  %v235_v6 = vsel %vm181_vm0, %v176_v3, 0.0  ;;  %v177_v9 = vld [vmem:[%s482_s14 + $0xe0] sm:$0xff]  ;;  %v274_v13 = vmul.f32 %v170_v31, %v170_v31 }
  0x24   : > { %v202_v42 = vadd.f32 %v201_v33, %v200_v35  ;;  %v267_v35 = vmul.f32 %v163_v53, %v163_v53  ;;  %v270_v53 = vmul.f32 %v166_v7, %v166_v7  ;;  %v273_v7 = vmul.f32 %v169_v25, %v169_v25 }
  0x25   : > { %v301_v21 = vadd.f32 %v300_v12, %v299_v15  ;;  %v237_v12 = vsel %vm181_vm0, %v177_v9, 0.0  ;;  %v178_v15 = vld [vmem:[%s482_s14 + $0xe8] sm:$0xff]  ;;  %v276_v25 = vmul.f32 %v172_v43, %v172_v43  ;;  %v277_v31 = vmul.f32 %v173_v49, %v173_v49 }
  0x26   : > { %v204_v48 = vadd.f32 %v203_v36, %v202_v42  ;;  %v308_v36 = vsel %vm181_vm0, %v265_v23, 0.0  ;;  %v310_v42 = vsel %vm181_vm0, %v266_v29, 0.0  ;;  %v280_v43 = vmul.f32 %v176_v3, %v176_v3 }
  0x27   : > { %v303_v27 = vadd.f32 %v302_v18, %v301_v21  ;;  %v239_v18 = vsel %vm181_vm0, %v178_v15, 0.0  ;;  %v179_v21 = vld [vmem:[%s482_s14 + $0xf0] sm:$0xff] }
  0x28   : > { %v206_v54 = vadd.f32 %v205_v44, %v204_v48  ;;  %v312_v48 = vsel %vm181_vm0, %v267_v35, 0.0  ;;  %v278_v35 = vmul.f32 %v174_v55, %v174_v55  ;;  %v283_v55 = vmul.f32 %v179_v21, %v179_v21 }
  0x29   : > { %v305_v33 = vadd.f32 %v304_v24, %v303_v27  ;;  %v241_v24 = vsel %vm181_vm0, %v179_v21, 0.0  ;;  %v180_v27 = vld [vmem:[%s482_s14 + $0xf8] sm:$0xff] }
  0x2a   : > { %v208_v60 = vadd.f32 %v207_v50, %v206_v54  ;;  %v314_v54 = vsel %vm181_vm0, %v268_v41, 0.0 }
  0x2b   : > { %v307_v39 = vadd.f32 %v306_v30, %v305_v33  ;;  %v243_v30 = vsel %vm181_vm0, %v180_v27, 0.0 }
  0x2c   : > { %v210_v2 = vadd.f32 %v209_v56, %v208_v60  ;;  %v316_v60 = vsel %vm181_vm0, %v269_v47, 0.0  ;;  %v281_v47 = vmul.f32 %v177_v9, %v177_v9 }
  0x2d   : > { %v309_v45 = vadd.f32 %v308_v36, %v307_v39  ;;  %v330_v36 = vsel %vm181_vm0, %v276_v25, 0.0  ;;  %v279_v39 = vmul.f32 %v175_v61, %v175_v61 }
  0x2e   : > { %v212_v8 = vadd.f32 %v211_v62, %v210_v2  ;;  %v318_v2 = vsel %vm181_vm0, %v270_v53, 0.0 }
  0x2f   : > { %v311_v51 = vadd.f32 %v310_v42, %v309_v45 }
  0x30   : > { %v214_v14 = vadd.f32 %v213_v4, %v212_v8  ;;  %v320_v8 = vsel %vm181_vm0, %v271_v59, 0.0  ;;  %v284_v59 = vmul.f32 %v180_v27, %v180_v27 }
  0x31   : > { %v313_v57 = vadd.f32 %v312_v48, %v311_v51  ;;  %v336_v48 = vsel %vm181_vm0, %v279_v39, 0.0  ;;  %v282_v51 = vmul.f32 %v178_v15, %v178_v15 }
  0x32   : > { %v216_v20 = vadd.f32 %v215_v10, %v214_v14  ;;  %v322_v14 = vsel %vm181_vm0, %v272_v1, 0.0  ;;  %v346_v1 = vsel %vm181_vm0, %v284_v59, 0.0 }
  0x33   : > { %v315_v63 = vadd.f32 %v314_v54, %v313_v57 }
  0x34   : > { %v218_v26 = vadd.f32 %v217_v16, %v216_v20  ;;  %v324_v20 = vsel %vm181_vm0, %v273_v7, 0.0 }
  0x35   : > { %v317_v5 = vadd.f32 %v316_v60, %v315_v63  ;;  %v342_v60 = vsel %vm181_vm0, %v282_v51, 0.0  ;;  %v344_v63 = vsel %vm181_vm0, %v283_v55, 0.0 }
  0x36   : > { %v220_v32 = vadd.f32 %v219_v22, %v218_v26  ;;  %v326_v26 = vsel %vm181_vm0, %v274_v13, 0.0 }
  0x37   : > { %v319_v11 = vadd.f32 %v318_v2, %v317_v5 }
  0x38   : > { %v222_v38 = vadd.f32 %v221_v28, %v220_v32  ;;  %v328_v32 = vsel %vm181_vm0, %v275_v19, 0.0 }
  0x39   : > { %v321_v17 = vadd.f32 %v320_v8, %v319_v11 }
  0x3a   : > { %v224_v44 = vadd.f32 %v223_v34, %v222_v38 }
  0x3b   : > { %v323_v23 = vadd.f32 %v322_v14, %v321_v17 }
  0x3c   : > { %v226_v50 = vadd.f32 %v225_v40, %v224_v44  ;;  %v332_v40 = vsel %vm181_vm0, %v277_v31, 0.0  ;;  %v334_v44 = vsel %vm181_vm0, %v278_v35, 0.0 }
  0x3d   : > { %v325_v29 = vadd.f32 %v324_v20, %v323_v23 }
  0x3e   : > { %v228_v56 = vadd.f32 %v227_v46, %v226_v50 }
  0x3f   : > { %v327_v34 = vadd.f32 %v326_v26, %v325_v29 }
  0x40   : > { %v230_v62 = vadd.f32 %v229_v52, %v228_v56  ;;  %v338_v52 = vsel %vm181_vm0, %v280_v43, 0.0  ;;  %v340_v56 = vsel %vm181_vm0, %v281_v47, 0.0 }
  0x41   : > { %v329_v38 = vadd.f32 %v328_v32, %v327_v34 }
  0x42   : > { %v232_v4 = vadd.f32 %v231_v58, %v230_v62 }
  0x43   : > { %v331_v42 = vadd.f32 %v330_v36, %v329_v38 }
  0x44   : > { %v234_v10 = vadd.f32 %v233_v0, %v232_v4 }
  0x45   : > { %v333_v46 = vadd.f32 %v332_v40, %v331_v42 }
  0x46   : > { %v236_v16 = vadd.f32 %v235_v6, %v234_v10 }
  0x47   : > { %v335_v50 = vadd.f32 %v334_v44, %v333_v46 }
  0x48   : > { %v238_v22 = vadd.f32 %v237_v12, %v236_v16 }
  0x49   : > { %v337_v54 = vadd.f32 %v336_v48, %v335_v50 }
  0x4a   : > { %v240_v28 = vadd.f32 %v239_v18, %v238_v22 }
  0x4b   : > { %v339_v58 = vadd.f32 %v338_v52, %v337_v54 }
  0x4c   : > { %v242_v33 = vadd.f32 %v241_v24, %v240_v28 }
  0x4d   : > { %v341_v62 = vadd.f32 %v340_v56, %v339_v58 }
  0x4e   : > { %v244_v37 = vadd.f32 %v243_v30, %v242_v33 }
  0x4f   : > { %v343_v0 = vadd.f32 %v342_v60, %v341_v62 }
  0x50   : > { %v245_v41 = vrot.slane %v244_v37, 4 }
  0x51   : > { %v345_v2 = vadd.f32 %v344_v63, %v343_v0 }
  0x52   : > { %v246_v45 = vadd.f32 %v245_v41, %v244_v37 }
  0x53   : > { %v347_v3 = vadd.f32 %v346_v1, %v345_v2 }
  0x54   : > { %v247_v49 = vrot.slane %v246_v45, 2 }
  0x55   : > { %v348_v4 = vrot.slane %v347_v3, 4 }
  0x56   : > { %v248_v53 = vadd.f32 %v247_v49, %v246_v45 }
  0x57   : > { %v349_v5 = vadd.f32 %v348_v4, %v347_v3 }
  0x58   : > { %v249_v57 = vrot.slane %v248_v53, 1 }
  0x59   : > { %v350_v6 = vrot.slane %v349_v5, 2 }
  0x5a   : > { %v250_v61 = vadd.f32 %v249_v57, %v248_v53 }
  0x5b   : > { %v351_v7 = vadd.f32 %v350_v6, %v349_v5 }
  0x5c   : > { %252 = vst.msk [vmem:[%s145_s17] sm:$0x1] %vm251_vm1, %v250_v61 }
  0x5d   : > { %v352_v8 = vrot.slane %v351_v7, 1 }
  0x5f   : > { %v353_v9 = vadd.f32 %v352_v8, %v351_v7 }
  0x61   : > { %354 = vst.msk [vmem:[%s148_s20] sm:$0x1] %vm251_vm1, %v353_v9 }
  0x62 PF: > { %s13_s9 = sadd.s32 1, %s451_s9  }
  0x63   : > { %p10_p4 = scmp.ge.s32.totalorder %s13_s9, 4  }
  0x65   :  { %12 = sbr.rel (!%p10_p4) target bundleno = 1 (0x1), region = 66 }

// kernel: preact_block_forward.4
= control target key start
LH: loop header
LB: loop body
LE: loop exit
PB: predicated region body
PF: predicated region fallthrough
CT: control target
= control target key end

     0   :  { %s2333_s21 = smov 0   ;;  %s3199_s0 = inlined_call_operand.vmem [shape: f32[2,16,16,4], index: 0, kind: input, shape index: {}]   ;;  %s3200_s1 = inlined_call_operand.vmem [shape: f32[1,4], index: 1, kind: input, shape index: {}]   ;;  %s3201_s2 = inlined_call_operand.vmem [shape: f32[1,4], index: 2, kind: input, shape index: {}]   ;;  %s3202_s3 = inlined_call_operand.vmem [shape: bf16[3,12,4], index: 3, kind: input, shape index: {}]   ;;  %s3203_s4 = inlined_call_operand.vmem [shape: f32[2,16,16,4], index: 4, kind: output, shape index: {0}]   ;;  %s3204_s5 = inlined_call_operand.vmem [shape: f32[2,1,4], index: 5, kind: output, shape index: {1}]   ;;  %s3205_s6 = inlined_call_operand.vmem [shape: f32[2,1,4], index: 6, kind: output, shape index: {2}]  }
   0x1 LB: > { %s1822_s22 = sadd.s32 4294967295, %s2293_s21   ;;  %p1826_p0 = scmp.ge.s32.totalorder %s2293_s21, 1  ;;  %s2293_s21 = sphi %s2333_s21, %s17_s21  }
   0x2   : > { %p217_p1 = scmp.lt.s32.totalorder %s2293_s21, 3 }
   0x4   : > { %p218_p2 = pnand %p1826_p0, %p217_p1 }
   0x5   : > { %p253_p3 = scmp.lt.s32.totalorder (!%p218_p2), %s1822_s22, 1  ;;  %v2347_v0 = vld [vmem:[%s3200_s1] ss:$0 sm:$0xff] (!%p218_p2)  ;;  %vm971_vm0 = vcmask (!%p218_p2), 1045504   ;;  %v3206_v22 = vmov (!%p218_p2), 0   ;;  %vm541_vm1 = vcmask (!%p218_p2), 1046528  }
   0x6   : > { %221 = sbr.rel (%p218_p2) target bundleno = 479 (0x1df), region = 36  ;;  %v2352_v1 = vld [vmem:[%s3202_s3] sm:$0x3f] (!%p218_p2)   ;;  %1977 = vmatprep.mubr.bf16.mxu0 (!%p218_p2), %v3206_v22  ;;  %s2296_s9 = smov (!%p218_p2), 4   ;;  %v2436_v54 = vld [vmem:[%s3202_s3 + $0x8] sm:$0x3f] (!%p218_p2)  }
   0x7   : > { %v2364_v2 = vld [vmem:[%s3201_s2] ss:$0 sm:$0xff] (!%p218_p2)  ;;  %2110 = vmatprep.subr.msk.bf16.mxu0 (!%p218_p2), %vm971_vm0, %v2352_v1  ;;  %v2373_v6 = vsel (!%p218_p2), %vm971_vm0, %v2352_v1, 0  ;;  %v2445_v59 = vld [vmem:[%s3202_s3 + $0x10] sm:$0x3f] (!%p218_p2)   ;;  %s2297_s14 = smov (!%p218_p2), 8   ;;  %2109 = vmatprep.subr.msk.bf16.mxu1 (!%p218_p2), %vm971_vm0, %v2436_v54 }
   0x8   : > { %1976 = vmatpush3.bf16.msra.mxu0 (!%p218_p2), %v2373_v6  ;;  %vm444_vm2 = vcmask (!%p218_p2), 1040384   ;;  %vm830_vm3 = vcmask (!%p218_p2), 31744   ;;  %vm863_vm4 = vcmask (!%p218_p2), 64512   ;;  %vm922_vm5 = vcmask (!%p218_p2), 97280  }
   0x9   : > { %2112 = vmatprep.subr.msk.bf16.mxu0 (!%p218_p2), %vm971_vm0, %v2445_v59  ;;  %vm1613_vm6 = vcmask (!%p218_p2), 24576  }
   0xd   : > { %s3209_s22 = smov (!%p253_p3, %s1822_s22), 1 }
   0xe   : > { %s1888_s23 = sshll.u32 %s3209_s22, 8  ;;  %s265_s20 = scalar_lea.vmem %s3204_s5, %s3209_s22 }
   0xf   : > { %s2359_s30 = scalar_lea.vmem %s3199_s0, %s1888_s23  ;;  %s3050_s17 = scalar_lea.vmem %s3203_s4, %s1888_s23 }
  0x10   : > { %v270_v3 = vld [vmem:[%s2359_s30] sm:$0xff]  ;;  %v271_v4 = vld [vmem:[%s2359_s30 + $0x8] sm:$0xff]  ;;  %v272_v5 = vld [vmem:[%s2359_s30 + $0x10] sm:$0xff]  ;;  %s268_s25 = scalar_lea.vmem %s3205_s6, %s3209_s22 }
  0x11   : > { %v309_v7 = vmul.f32 %v2347_v0, %v270_v3  ;;  %v310_v8 = vmul.f32 %v2347_v0, %v271_v4  ;;  %v273_v9 = vld [vmem:[%s2359_s30 + $0x18] sm:$0xff]  ;;  %v311_v10 = vmul.f32 %v2347_v0, %v272_v5  ;;  %v274_v11 = vld [vmem:[%s2359_s30 + $0x20] sm:$0xff]  ;;  %v275_v12 = vld [vmem:[%s2359_s30 + $0x28] sm:$0xff] }
  0x12   : > { %v312_v13 = vmul.f32 %v2347_v0, %v273_v9  ;;  %v313_v14 = vmul.f32 %v2347_v0, %v274_v11  ;;  %v314_v15 = vmul.f32 %v2347_v0, %v275_v12  ;;  %v276_v16 = vld [vmem:[%s2359_s30 + $0x30] sm:$0xff]  ;;  %v277_v17 = vld [vmem:[%s2359_s30 + $0x38] sm:$0xff]  ;;  %v278_v45 = vld [vmem:[%s2359_s30 + $0x40] sm:$0xff] }
  0x13   : > { %v348_v18 = vadd.f32 %v2364_v2, %v309_v7  ;;  %v349_v19 = vadd.f32 %v2364_v2, %v310_v8  ;;  %v350_v20 = vadd.f32 %v2364_v2, %v311_v10  ;;  %v315_v21 = vmul.f32 %v2347_v0, %v276_v16  ;;  %v279_v46 = vld [vmem:[%s2359_s30 + $0x48] sm:$0xff]  ;;  %v280_v47 = vld [vmem:[%s2359_s30 + $0x50] sm:$0xff]  ;;  %v281_v52 = vld [vmem:[%s2359_s30 + $0x58] sm:$0xff] }
  0x14   : > { %v351_v23 = vadd.f32 %v2364_v2, %v312_v13  ;;  %v352_v24 = vadd.f32 %v2364_v2, %v313_v14  ;;  %v353_v25 = vadd.f32 %v2364_v2, %v314_v15  ;;  %v316_v26 = vmul.f32 %v2347_v0, %v277_v17  ;;  %v282_v53 = vld [vmem:[%s2359_s30 + $0x60] sm:$0xff]  ;;  %v283_v7 = vld [vmem:[%s2359_s30 + $0x68] sm:$0xff]  ;;  %v284_v9 = vld [vmem:[%s2359_s30 + $0x70] sm:$0xff] }
  0x15   : > { %v2396_v27 = vmax.f32 %v348_v18, 0.0  ;;  %v2398_v28 = vmax.f32 %v349_v19, 0.0  ;;  %v2400_v29 = vmax.f32 %v350_v20, 0.0  ;;  %v354_v30 = vadd.f32 %v2364_v2, %v315_v21  ;;  %v285_v14 = vld [vmem:[%s2359_s30 + $0x78] sm:$0xff] }
  0x16   : > { %v2403_v31 = vmax.f32 %v351_v23, 0.0  ;;  %v2405_v32 = vmax.f32 %v352_v24, 0.0  ;;  %v355_v33 = vadd.f32 %v2364_v2, %v316_v26  ;;  %v2412_v37 = vmax.f32 %v353_v25, 0.0 }
  0x17   : > { %v2124_v34 = vpack.i.bf16 %v2398_v28, %v2396_v27  ;;  %v542_v35 = vrot.slane %v2396_v27, 1  ;;  %v543_v36 = vrot.slane %v2398_v28, 1  ;;  %v545_v39 = vrot.slane %v2400_v29, 1 }
  0x18   : > { %v2129_v38 = vpack.i.bf16 %v2403_v31, %v2400_v29  ;;  %v546_v40 = vrot.slane %v2403_v31, 1  ;;  %v2421_v43 = vmax.f32 %v354_v30, 0.0  ;;  %v2423_v44 = vmax.f32 %v355_v33, 0.0 }
  0x19   : > { %2125 = vrot.lane.b32.xlu0 %v2124_v34, %s2296_s9  ;;  %v544_v41 = vsel %vm541_vm1, %v542_v35, %v543_v36  ;;  %v606_v42 = vsel %vm541_vm1, %v543_v36, 0.0  ;;  %v548_v51 = vrot.slane %v2405_v32, 1  ;;  %v2134_v56 = vpack.i.bf16 %v2412_v37, %v2405_v32  ;;  %v286_v36 = vld [vmem:[%s2359_s30 + $0x80] sm:$0xff] }
  0x1a   : > { %v2139_v48 = vpack.i.bf16 %v606_v42, %v544_v41  ;;  %v547_v49 = vsel %vm541_vm1, %v545_v39, %v546_v40  ;;  %v607_v50 = vsel %vm541_vm1, %v546_v40, 0.0  ;;  %v549_v57 = vrot.slane %v2412_v37, 1 }
  0x1b   : > { %v2144_v55 = vpack.i.bf16 %v607_v50, %v547_v49  ;;  %v551_v58 = vrot.slane %v2421_v43, 1  ;;  %v552_v60 = vrot.slane %v2423_v44, 1  ;;  %v317_v61 = vmul.f32 %v2347_v0, %v278_v45  ;;  %v288_v50 = vld [vmem:[%s2359_s30 + $0x90] sm:$0xff] }
  0x1c   : > { %2140 = vrot.lane.b32.xlu1 %v2139_v48, %s2297_s14  ;;  %v318_v62 = vmul.f32 %v2347_v0, %v279_v46  ;;  %v319_v63 = vmul.f32 %v2347_v0, %v280_v47  ;;  %v550_v3 = vsel %vm541_vm1, %v548_v51, %v549_v57  ;;  %v608_v4 = vsel %vm541_vm1, %v549_v57, 0.0  ;;  %v287_v48 = vld [vmem:[%s2359_s30 + $0x88] sm:$0xff]  ;;  %v289_v51 = vld [vmem:[%s2359_s30 + $0x98] sm:$0xff] }
  0x1d   : > { %2130 = vrot.lane.b32.xlu0 %v2129_v38, %s2296_s9  ;;  %v320_v5 = vmul.f32 %v2347_v0, %v281_v52  ;;  %v321_v8 = vmul.f32 %v2347_v0, %v282_v53  ;;  %v2149_v10 = vpack.i.bf16 %v2423_v44, %v2421_v43  ;;  %v2154_v11 = vpack.i.bf16 %v608_v4, %v550_v3 }
  0x1e   : > { %v553_v12 = vsel %vm541_vm1, %v551_v58, %v552_v60  ;;  %v356_v13 = vadd.f32 %v2364_v2, %v317_v61  ;;  %v609_v15 = vsel %vm541_vm1, %v552_v60, 0.0  ;;  %v357_v16 = vadd.f32 %v2364_v2, %v318_v62 }
  0x1f   : > { %v358_v17 = vadd.f32 %v2364_v2, %v319_v63  ;;  %v359_v18 = vadd.f32 %v2364_v2, %v320_v5  ;;  %v322_v20 = vmul.f32 %v2347_v0, %v283_v7  ;;  %v360_v21 = vadd.f32 %v2364_v2, %v321_v8  ;;  %v290_v8 = vld [vmem:[%s2359_s30 + $0xa0] sm:$0xff] }
  0x20   : > { %2145 = vrot.lane.b32.xlu1 %v2144_v55, %s2297_s14  ;;  %v2473_v19 = vmax.f32 %v356_v13, 0.0  ;;  %v323_v23 = vmul.f32 %v2347_v0, %v284_v9  ;;  %v2479_v24 = vmax.f32 %v357_v16, 0.0  ;;  %v324_v30 = vmul.f32 %v2347_v0, %v285_v14  ;;  %v293_v16 = vld [vmem:[%s2359_s30 + $0xb8] sm:$0xff] }
  0x21   : > { %2135 = vrot.lane.b32.xlu0 %v2134_v56, %s2296_s9  ;;  %v2481_v25 = vmax.f32 %v358_v17, 0.0  ;;  %v2483_v26 = vmax.f32 %v359_v18, 0.0  ;;  %v361_v34 = vadd.f32 %v2364_v2, %v322_v20  ;;  %v2492_v40 = vmax.f32 %v360_v21, 0.0 }
  0x22   : > { %v554_v33 = vrot.slane %v2473_v19, 1  ;;  %v362_v35 = vadd.f32 %v2364_v2, %v323_v23  ;;  %v555_v38 = vrot.slane %v2479_v24, 1  ;;  %v2164_v41 = vpack.i.bf16 %v609_v15, %v553_v12  ;;  %v292_v12 = vld [vmem:[%s2359_s30 + $0xb0] sm:$0xff] }
  0x23   : > { %v557_v39 = vrot.slane %v2481_v25, 1  ;;  %v558_v42 = vrot.slane %v2483_v26, 1  ;;  %v2496_v45 = vmax.f32 %v361_v34, 0.0  ;;  %v363_v46 = vadd.f32 %v2364_v2, %v324_v30 }
  0x24   : > { %2150 = vrot.lane.b32.xlu1 %v2149_v10, %s2296_s9  ;;  %v2159_v47 = vpack.i.bf16 %v2479_v24, %v2473_v19  ;;  %v325_v49 = vmul.f32 %v2347_v0, %v286_v36  ;;  %v2169_v52 = vpack.i.bf16 %v2483_v26, %v2481_v25  ;;  %v556_v53 = vsel %vm541_vm1, %v554_v33, %v555_v38 }
  0x25   : > { %2155 = vrot.lane.b32.xlu0 %v2154_v11, %s2297_s14  ;;  %v610_v55 = vsel %vm541_vm1, %v555_v38, 0.0  ;;  %v2510_v56 = vmax.f32 %v362_v35, 0.0  ;;  %v559_v57 = vsel %vm541_vm1, %v557_v39, %v558_v42  ;;  %v611_v58 = vsel %vm541_vm1, %v558_v42, 0.0  ;;  %v291_v11 = vld [vmem:[%s2359_s30 + $0xa8] sm:$0xff] }
  0x26   : > { %v2514_v60 = vmax.f32 %v363_v46, 0.0  ;;  %v560_v61 = vrot.slane %v2492_v40, 1  ;;  %v561_v62 = vrot.slane %v2496_v45, 1  ;;  %v326_v63 = vmul.f32 %v2347_v0, %v287_v48 }
  0x27   : > { %v327_v3 = vmul.f32 %v2347_v0, %v288_v50  ;;  %v328_v4 = vmul.f32 %v2347_v0, %v289_v51  ;;  %v2174_v5 = vpack.i.bf16 %v610_v55, %v556_v53  ;;  %v364_v7 = vadd.f32 %v2364_v2, %v325_v49  ;;  %v294_v49 = vld [vmem:[%s2359_s30 + $0xc0] sm:$0xff]  ;;  %v295_v50 = vld [vmem:[%s2359_s30 + $0xc8] sm:$0xff]  ;;  %v296_v55 = vld [vmem:[%s2359_s30 + $0xd0] sm:$0xff] }
  0x28   : > { %2165 = vrot.lane.b32.xlu1 %v2164_v41, %s2297_s14  ;;  %v365_v9 = vadd.f32 %v2364_v2, %v326_v63  ;;  %v2179_v13 = vpack.i.bf16 %v611_v58, %v559_v57  ;;  %v2184_v14 = vpack.i.bf16 %v2496_v45, %v2492_v40  ;;  %v562_v17 = vsel %vm541_vm1, %v560_v61, %v561_v62 }
  0x29   : > { %2160 = vrot.lane.b32.xlu0 %v2159_v47, %s2296_s9  ;;  %v366_v10 = vadd.f32 %v2364_v2, %v327_v3  ;;  %v367_v15 = vadd.f32 %v2364_v2, %v328_v4  ;;  %v563_v18 = vrot.slane %v2510_v56, 1  ;;  %v564_v20 = vrot.slane %v2514_v60, 1 }
  0x2a   : > { %v329_v21 = vmul.f32 %v2347_v0, %v290_v8  ;;  %v612_v23 = vsel %vm541_vm1, %v561_v62, 0.0  ;;  %v2540_v30 = vmax.f32 %v364_v7, 0.0  ;;  %v330_v33 = vmul.f32 %v2347_v0, %v291_v11 }
  0x2b   : > { %v331_v34 = vmul.f32 %v2347_v0, %v292_v12  ;;  %v2544_v35 = vmax.f32 %v365_v9, 0.0  ;;  %v2546_v36 = vmax.f32 %v366_v10, 0.0  ;;  %v2548_v38 = vmax.f32 %v367_v15, 0.0 }
  0x2c   : > { %2170 = vrot.lane.b32.xlu1 %v2169_v52, %s2296_s9  ;;  %v332_v39 = vmul.f32 %v2347_v0, %v293_v16  ;;  %v2189_v41 = vpack.i.bf16 %v2514_v60, %v2510_v56  ;;  %v565_v42 = vsel %vm541_vm1, %v563_v18, %v564_v20  ;;  %v613_v46 = vsel %vm541_vm1, %v564_v20, 0.0  ;;  %v298_v20 = vld [vmem:[%s2359_s30 + $0xe0] sm:$0xff] }
  0x2d   : > { %2175 = vrot.lane.b32.xlu0 %v2174_v5, %s2297_s14  ;;  %v368_v47 = vadd.f32 %v2364_v2, %v329_v21  ;;  %v369_v48 = vadd.f32 %v2364_v2, %v330_v33  ;;  %v2194_v51 = vpack.i.bf16 %v612_v23, %v562_v17  ;;  %v370_v52 = vadd.f32 %v2364_v2, %v331_v34  ;;  %v297_v5 = vld [vmem:[%s2359_s30 + $0xd8] sm:$0xff] }
  0x2e   : > { %v371_v53 = vadd.f32 %v2364_v2, %v332_v39  ;;  %v566_v57 = vrot.slane %v2540_v30, 1  ;;  %v567_v58 = vrot.slane %v2544_v35, 1  ;;  %v569_v61 = vrot.slane %v2546_v36, 1  ;;  %v299_v39 = vld [vmem:[%s2359_s30 + $0xe8] sm:$0xff] }
  0x2f   : > { %v570_v62 = vrot.slane %v2548_v38, 1  ;;  %v2199_v63 = vpack.i.bf16 %v613_v46, %v565_v42  ;;  %v333_v3 = vmul.f32 %v2347_v0, %v294_v49  ;;  %v334_v4 = vmul.f32 %v2347_v0, %v295_v50 }
  0x30   : > { %2180 = vrot.lane.b32.xlu1 %v2179_v13, %s2297_s14  ;;  %v2204_v7 = vpack.i.bf16 %v2544_v35, %v2540_v30  ;;  %v2574_v8 = vmax.f32 %v368_v47, 0.0  ;;  %v2576_v9 = vmax.f32 %v369_v48, 0.0  ;;  %v335_v10 = vmul.f32 %v2347_v0, %v296_v55 }
  0x31   : > { %2185 = vrot.lane.b32.xlu0 %v2184_v14, %s2296_s9  ;;  %v2580_v11 = vmax.f32 %v370_v52, 0.0  ;;  %v2582_v12 = vmax.f32 %v371_v53, 0.0  ;;  %v372_v13 = vadd.f32 %v2364_v2, %v333_v3  ;;  %v373_v14 = vadd.f32 %v2364_v2, %v334_v4  ;;  %v300_v52 = vld [vmem:[%s2359_s30 + $0xf0] sm:$0xff]  ;;  %v301_v3 = vld [vmem:[%s2359_s30 + $0xf8] sm:$0xff] }
  0x32   : > { %v568_v15 = vsel %vm541_vm1, %v566_v57, %v567_v58  ;;  %v614_v16 = vsel %vm541_vm1, %v567_v58, 0.0  ;;  %v571_v17 = vsel %vm541_vm1, %v569_v61, %v570_v62  ;;  %v336_v18 = vmul.f32 %v2347_v0, %v297_v5 }
  0x33   : > { %v615_v21 = vsel %vm541_vm1, %v570_v62, 0.0  ;;  %v2592_v23 = vmax.f32 %v372_v13, 0.0  ;;  %v2594_v33 = vmax.f32 %v373_v14, 0.0  ;;  %v374_v34 = vadd.f32 %v2364_v2, %v335_v10 }
  0x34   : > { %2190 = vrot.lane.b32.xlu1 %v2189_v41, %s2296_s9  ;;  %v2209_v41 = vpack.i.bf16 %v2548_v38, %v2546_v36  ;;  %v572_v42 = vrot.slane %v2574_v8, 1  ;;  %v573_v46 = vrot.slane %v2576_v9, 1  ;;  %v375_v47 = vadd.f32 %v2364_v2, %v336_v18 }
  0x35   : > { %2195 = vrot.lane.b32.xlu0 %v2194_v51, %s2297_s14  ;;  %v2214_v48 = vpack.i.bf16 %v614_v16, %v568_v15  ;;  %v575_v49 = vrot.slane %v2580_v11, 1  ;;  %v576_v50 = vrot.slane %v2582_v12, 1  ;;  %v337_v51 = vmul.f32 %v2347_v0, %v298_v20 }
  0x36   : > { %v446_v53 = vrot.slane %v2398_v28, 7  ;;  %v2219_v55 = vpack.i.bf16 %v615_v21, %v571_v17  ;;  %v338_v57 = vmul.f32 %v2347_v0, %v299_v39  ;;  %v2611_v58 = vmax.f32 %v374_v34, 0.0 }
  0x37   : > { %v2613_v61 = vmax.f32 %v375_v47, 0.0  ;;  %v578_v62 = vrot.slane %v2592_v23, 1  ;;  %v2224_v4 = vpack.i.bf16 %v2576_v9, %v2574_v8  ;;  %v2229_v28 = vpack.i.bf16 %v2582_v12, %v2580_v11 }
  0x38   : > { %2200 = vrot.lane.b32.xlu1 %v2199_v63, %s2297_s14  ;;  %v579_v63 = vrot.slane %v2594_v33, 1  ;;  %v574_v5 = vsel %vm541_vm1, %v572_v42, %v573_v46  ;;  %v616_v10 = vsel %vm541_vm1, %v573_v46, 0.0  ;;  %v577_v13 = vsel %vm541_vm1, %v575_v49, %v576_v50 }
  0x39   : > { %2205 = vrot.lane.b32.xlu0 %v2204_v7, %s2296_s9  ;;  %v339_v7 = vmul.f32 %v2347_v0, %v300_v52  ;;  %v376_v14 = vadd.f32 %v2364_v2, %v337_v51  ;;  %v448_v15 = vrot.slane %v2400_v29, 7  ;;  %v617_v16 = vsel %vm541_vm1, %v576_v50, 0.0 }
  0x3a   : > { %v377_v17 = vadd.f32 %v2364_v2, %v338_v57  ;;  %v340_v18 = vmul.f32 %v2347_v0, %v301_v3  ;;  %v449_v20 = vrot.slane %v2403_v31, 7  ;;  %v2635_v21 = vsel %vm541_vm1, %v578_v62, %v579_v63 }
  0x3b   : > { %v2638_v34 = vsel %vm541_vm1, %v579_v63, 0.0  ;;  %v581_v39 = vrot.slane %v2611_v58, 1  ;;  %v2234_v42 = vpack.i.bf16 %v616_v10, %v574_v5  ;;  %v378_v46 = vadd.f32 %v2364_v2, %v339_v7 }
  0x3c   : > { %2210 = vrot.lane.b32.xlu1 %v2209_v41, %s2296_s9  ;;  %v582_v41 = vrot.slane %v2613_v61, 1  ;;  %v2647_v0 = vsel %vm444_vm2, %v448_v15, %v449_v20  ;;  %v451_v31 = vrot.slane %v2405_v32, 7  ;;  %v2239_v47 = vpack.i.bf16 %v617_v16, %v577_v13 }
  0x3d   : > { %2215 = vrot.lane.b32.xlu0 %v2214_v48, %s2297_s14  ;;  %v2244_v48 = vpack.i.bf16 %v2594_v33, %v2592_v23  ;;  %v2249_v49 = vpack.i.bf16 %v2613_v61, %v2611_v58  ;;  %v2655_v50 = vmax.f32 %v376_v14, 0.0  ;;  %v2254_v51 = vpack.i.bf16 %v2638_v34, %v2635_v21 }
  0x3e   : > { %v2659_v52 = vmax.f32 %v377_v17, 0.0  ;;  %v973_v57 = vsel %vm971_vm0, %v2436_v54, 0  ;;  %v583_v62 = vsel %vm541_vm1, %v581_v39, %v582_v41  ;;  %v619_v63 = vsel %vm541_vm1, %v582_v41, 0.0 }
  0x3f   : > { %v379_v3 = vadd.f32 %v2364_v2, %v340_v18  ;;  %1942 = vmatpush3.bf16.msra.mxu1 %v973_v57  ;;  %v2669_v5 = vmax.f32 %v378_v46, 0.0  ;;  %v454_v54 = vrot.slane %v2421_v43, 7  ;;  %v455_v7 = vrot.slane %v2423_v44, 7 }
  0x40   : > { %2220 = vrot.lane.b32.xlu1 %v2219_v55, %s2297_s14  ;;  %v452_v55 = vrot.slane %v2412_v37, 7  ;;  %2111 = vmatprep.subr.msk.bf16.mxu1 %vm971_vm0, %v2352_v1  ;;  %v584_v2 = vrot.slane %v2655_v50, 1  ;;  %v2689_v10 = vsel %vm971_vm0, %v2445_v59, 0  ;;  %v457_v13 = vrot.slane %v2473_v19, 7 }
  0x41   : > { %2225 = vrot.lane.b32.xlu0 %v2224_v4, %s2296_s9  ;;  %v445_v4 = vrot.slane %v2396_v27, 7  ;;  %v2259_v14 = vpack.i.bf16 %v619_v63, %v583_v62  ;;  %v2695_v1 = vsel %vm444_vm2, %v454_v54, %v455_v7  ;;  %v458_v44 = vrot.slane %v2479_v24, 7 }
  0x42   : > { %v2674_v37 = vsel %vm444_vm2, %v451_v31, %v452_v55  ;;  %v460_v16 = vrot.slane %v2481_v25, 7  ;;  %v585_v17 = vrot.slane %v2659_v52, 1  ;;  %v463_v18 = vrot.slane %v2492_v40, 7 }
  0x43   : > { %v464_v59 = vrot.slane %v2496_v45, 7  ;;  %v2264_v20 = vpack.i.bf16 %v2659_v52, %v2655_v50  ;;  %v2709_v21 = vsel %vm444_vm2, %v457_v13, %v458_v44  ;;  %v466_v24 = vrot.slane %v2510_v56, 7 }
  0x44   : > { %2230 = vrot.lane.b32.xlu1 %v2229_v28, %s2296_s9  ;;  %v2685_v28 = vsel %vm444_vm2, %v445_v4, %v446_v53  ;;  %v461_v53 = vrot.slane %v2483_v26, 7  ;;  %v467_v34 = vrot.slane %v2514_v60, 7  ;;  %v411_v26 = vmax.f32 %v379_v3, 0.0 }
  0x45   : > { %2235 = vrot.lane.b32.xlu0 %v2234_v42, %s2297_s14  ;;  %v2722_v39 = vsel %vm444_vm2, %v463_v18, %v464_v59  ;;  %v469_v41 = vrot.slane %v2540_v30, 7  ;;  %v587_v42 = vrot.slane %v2669_v5, 1  ;;  %v470_v46 = vrot.slane %v2544_v35, 7 }
  0x46   : > { %v2717_v45 = vsel %vm444_vm2, %v460_v16, %v461_v53  ;;  %v2729_v60 = vsel %vm444_vm2, %v466_v24, %v467_v34  ;;  %v473_v55 = vrot.slane %v2548_v38, 7  ;;  %v475_v57 = vrot.slane %v2574_v8, 7 }
  0x47   : > { %v476_v62 = vrot.slane %v2576_v9, 7  ;;  %v620_v63 = vsel %vm541_vm1, %v585_v17, 0.0  ;;  %v2742_v3 = vsel %vm444_vm2, %v469_v41, %v470_v46  ;;  %v478_v35 = vrot.slane %v2580_v11, 7 }
  0x48   : > { %2240 = vrot.lane.b32.xlu1 %v2239_v47, %s2297_s14  ;;  %v472_v47 = vrot.slane %v2546_v36, 7  ;;  %v479_v7 = vrot.slane %v2582_v12, 7  ;;  %v588_v38 = vrot.slane %v411_v26, 1  ;;  %v482_v12 = vrot.slane %v2594_v33, 7 }
  0x49   : > { %2245 = vrot.lane.b32.xlu0 %v2244_v48, %s2296_s9  ;;  %v586_v48 = vsel %vm541_vm1, %v584_v2, %v585_v17  ;;  %v481_v2 = vrot.slane %v2592_v23, 7  ;;  %v2269_v17 = vpack.i.bf16 %v411_v26, %v2669_v5  ;;  %v485_v53 = vrot.slane %v2613_v61, 7 }
  0x4a   : > { %v2750_v9 = vsel %vm444_vm2, %v472_v47, %v473_v55  ;;  %v2761_v44 = vsel %vm444_vm2, %v478_v35, %v479_v7  ;;  %v487_v59 = vrot.slane %v2655_v50, 7  ;;  %v488_v34 = vrot.slane %v2659_v52, 7 }
  0x4b   : > { %v2274_v46 = vpack.i.bf16 %v620_v63, %v586_v48  ;;  %v2773_v55 = vsel %vm444_vm2, %v481_v2, %v482_v12  ;;  %v490_v33 = vrot.slane %v2669_v5, 7  ;;  %v589_v7 = vsel %vm541_vm1, %v587_v42, %v588_v38 }
  0x4c   : > { %2250 = vrot.lane.b32.xlu1 %v2249_v49, %s2296_s9  ;;  %v2755_v49 = vsel %vm444_vm2, %v475_v57, %v476_v62  ;;  %v491_v62 = vrot.slane %v411_v26, 7  ;;  %v621_v61 = vsel %vm541_vm1, %v588_v38, 0.0  ;;  %v525_v48 = vsel %vm444_vm2, 0.0, %v445_v4 }
  0x4d   : > { %2255 = vrot.lane.b32.xlu0 %v2254_v51, %s2297_s14  ;;  %v484_v51 = vrot.slane %v2611_v58, 7 }
  0x4e   : > { %v2792_v26 = vsel %vm444_vm2, %v490_v33, %v491_v62 }
  0x4f   : > { %v2782_v52 = vsel %vm444_vm2, %v484_v51, %v485_v53 }
  0x50   : > { %2260 = vrot.lane.b32.xlu1 %v2259_v14, %s2297_s14  ;;  %v2787_v14 = vsel %vm444_vm2, %v487_v59, %v488_v34 }
  0x51   : > { %2265 = vrot.lane.b32.xlu0 %v2264_v20, %s2296_s9  ;;  %v2279_v20 = vpack.i.bf16 %v621_v61, %v589_v7 }
  0x54   : > { %2270 = vrot.lane.b32.xlu1 %v2269_v17, %s2296_s9 }
  0x55   : > { %2275 = vrot.lane.b32.xlu0 %v2274_v46, %s2297_s14  ;;  %v526_v46 = vsel %vm444_vm2, 0.0, %v448_v15  ;;  %v527_v15 = vsel %vm444_vm2, 0.0, %v451_v31 }
  0x58   : > { %2280 = vrot.lane.b32.xlu1 %v2279_v20, %s2297_s14 }
  0x8b   : > { %v2126_v42 = vpop.permute.xlu0 %2125 }
  0x8c   : > { %v2128_v63 = vunpack.i.h.bf16 %v2126_v42  ;;  %v2127_v38 = vunpack.i.l.bf16 %v2126_v42 }
  0x8e   : > { %v2141_v12 = vpop.permute.xlu1 %2140  ;;  %v831_v53 = vsel %vm830_vm3, %v525_v48, %v2127_v38  ;;  %v832_v17 = vsel %vm830_vm3, %v2685_v28, %v2128_v63 }
  0x8f   : > { %v2143_v34 = vunpack.i.h.bf16 %v2141_v12  ;;  %v2142_v62 = vunpack.i.l.bf16 %v2141_v12  ;;  %v2131_v7 = vpop.permute.xlu0 %2130 }
  0x90   : > { %v2133_v61 = vunpack.i.h.bf16 %v2131_v7  ;;  %v2132_v27 = vunpack.i.l.bf16 %v2131_v7 }
  0x91   : > { %v864_v4 = vsel %vm863_vm4, %v831_v53, %v2142_v62  ;;  %v865_v20 = vsel %vm863_vm4, %v832_v17, %v2143_v34 }
  0x92   : > { %v834_v42 = vsel %vm830_vm3, %v2647_v0, %v2133_v61  ;;  %v833_v48 = vsel %vm830_vm3, %v526_v46, %v2132_v27  ;;  %v2146_v28 = vpop.permute.xlu1 %2145  ;;  %v896_v63 = vpack.c.bf16 %v865_v20, %v864_v4 }
  0x93   : > { %v2148_v38 = vunpack.i.h.bf16 %v2146_v28  ;;  %v2147_v12 = vunpack.i.l.bf16 %v2146_v28  ;;  %v2136_v29 = vpop.permute.xlu0 %2135 }
  0x94   : > { %v2138_v7 = vunpack.i.h.bf16 %v2136_v29  ;;  %v2137_v22 = vunpack.i.l.bf16 %v2136_v29  ;;  %1943 = vmatprep.mubr.msk.bf16.mxu1 %vm922_vm5, %v896_v63  ;;  %1978 = vmatmul.mubr.msk.bf16.vlgmr.msra.gmra.mrb[0].mxu0 %vm922_vm5, %v896_v63  ;;  %v529_v63 = vsel %vm444_vm2, 0.0, %v457_v13 }
  0x95   : > { %v867_v53 = vsel %vm863_vm4, %v834_v42, %v2148_v38  ;;  %v866_v0 = vsel %vm863_vm4, %v833_v48, %v2147_v12  ;;  %2010 = vmatpush3.bf16.msra.mxu0 %v2689_v10  ;;  %v528_v10 = vsel %vm444_vm2, 0.0, %v454_v54 }
  0x96   : > { %v2819_v17 = vpack.c.bf16 %v867_v53, %v866_v0  ;;  %v2151_v34 = vpop.permute.xlu1 %2150  ;;  %v836_v32 = vsel %vm830_vm3, %v2674_v37, %v2138_v7  ;;  %v835_v31 = vsel %vm830_vm3, %v527_v15, %v2137_v22 }
  0x97   : > { %v2156_v62 = vpop.permute.xlu0 %2155  ;;  %v2153_v46 = vunpack.i.h.bf16 %v2151_v34  ;;  %v2152_v61 = vunpack.i.l.bf16 %v2151_v34 }
  0x98   : > { %v2158_v27 = vunpack.i.h.bf16 %v2156_v62  ;;  %v2157_v4 = vunpack.i.l.bf16 %v2156_v62  ;;  %1944 = vmatmul.mubr.msk.bf16.vlgmr.msra.gmra.mrb[0].mxu1 %vm922_vm5, %v2819_v17  ;;  %1981 = vmatprep.mubr.msk.bf16.mxu0 %vm922_vm5, %v2819_v17  ;;  %v530_v62 = vsel %vm444_vm2, 0.0, %v460_v16 }
  0x99   : > { %2044 = vmatpush3.bf16.msra.mxu1 %v2373_v6  ;;  %v838_v43 = vsel %vm830_vm3, %v2695_v1, %v2153_v46  ;;  %v837_v54 = vsel %vm830_vm3, %v528_v10, %v2152_v61 }
  0x9a   : > { %v868_v37 = vsel %vm863_vm4, %v835_v31, %v2157_v4  ;;  %v869_v22 = vsel %vm863_vm4, %v836_v32, %v2158_v27  ;;  %v2166_v20 = vpop.permute.xlu1 %2165 }
  0x9b   : > { %v2834_v42 = vpack.c.bf16 %v869_v22, %v868_v37  ;;  %v2168_v48 = vunpack.i.h.bf16 %v2166_v20  ;;  %v2167_v28 = vunpack.i.l.bf16 %v2166_v20  ;;  %v2161_v38 = vpop.permute.xlu0 %2160  ;;  %v531_v37 = vsel %vm444_vm2, 0.0, %v463_v18 }
  0x9c   : > { %v2163_v6 = vunpack.i.h.bf16 %v2161_v38  ;;  %v2162_v12 = vunpack.i.l.bf16 %v2161_v38 }
  0x9d   : > { %v870_v29 = vsel %vm863_vm4, %v837_v54, %v2167_v28  ;;  %v871_v15 = vsel %vm863_vm4, %v838_v43, %v2168_v48  ;;  %1947 = vmatprep.mubr.msk.bf16.mxu1 %vm922_vm5, %v2834_v42  ;;  %1982 = vmatmul.mubr.msk.bf16.gmra.mrb[4].mxu0 %vm922_vm5, %v2834_v42 }
  0x9e   : > { %v2848_v19 = vpack.c.bf16 %v871_v15, %v870_v29  ;;  %v2171_v13 = vpop.permute.xlu1 %2170  ;;  %v840_v1 = vsel %vm830_vm3, %v2709_v21, %v2163_v6  ;;  %v839_v7 = vsel %vm830_vm3, %v529_v63, %v2162_v12  ;;  %v532_v15 = vsel %vm444_vm2, 0.0, %v466_v24 }
  0x9f   : > { %v2176_v53 = vpop.permute.xlu0 %2175  ;;  %v2173_v0 = vunpack.i.h.bf16 %v2171_v13  ;;  %v2172_v34 = vunpack.i.l.bf16 %v2171_v13 }
  0xa0   : > { %v2178_v32 = vunpack.i.h.bf16 %v2176_v53  ;;  %v2177_v31 = vunpack.i.l.bf16 %v2176_v53  ;;  %1948 = vmatmul.mubr.msk.bf16.gmra.mrb[4].mxu1 %vm922_vm5, %v2848_v19  ;;  %1985 = vmatprep.mubr.msk.bf16.mxu0 %vm922_vm5, %v2848_v19 }
  0xa1   : > { %v842_v20 = vsel %vm830_vm3, %v2717_v45, %v2173_v0  ;;  %v841_v25 = vsel %vm830_vm3, %v530_v62, %v2172_v34  ;;  %v533_v34 = vsel %vm444_vm2, 0.0, %v469_v41 }
  0xa2   : > { %v872_v46 = vsel %vm863_vm4, %v839_v7, %v2177_v31  ;;  %v873_v21 = vsel %vm863_vm4, %v840_v1, %v2178_v32  ;;  %v2181_v61 = vpop.permute.xlu1 %2180 }
  0xa3   : > { %v2862_v27 = vpack.c.bf16 %v873_v21, %v872_v46  ;;  %v2183_v4 = vunpack.i.h.bf16 %v2181_v61  ;;  %v2182_v10 = vunpack.i.l.bf16 %v2181_v61  ;;  %v2186_v22 = vpop.permute.xlu0 %2185 }
  0xa4   : > { %v2188_v16 = vunpack.i.h.bf16 %v2186_v22  ;;  %v2187_v48 = vunpack.i.l.bf16 %v2186_v22 }
  0xa5   : > { %v874_v28 = vsel %vm863_vm4, %v841_v25, %v2182_v10  ;;  %v875_v63 = vsel %vm863_vm4, %v842_v20, %v2183_v4  ;;  %1951 = vmatprep.mubr.msk.bf16.mxu1 %vm922_vm5, %v2862_v27  ;;  %1986 = vmatmul.mubr.msk.bf16.gmra.mrb[8].mxu0 %vm922_vm5, %v2862_v27  ;;  %v534_v25 = vsel %vm444_vm2, 0.0, %v472_v47 }
  0xa6   : > { %v2876_v40 = vpack.c.bf16 %v875_v63, %v874_v28  ;;  %v2191_v18 = vpop.permute.xlu1 %2190  ;;  %v844_v45 = vsel %vm830_vm3, %v2722_v39, %v2188_v16  ;;  %v843_v38 = vsel %vm830_vm3, %v531_v37, %v2187_v48 }
  0xa7   : > { %v2196_v43 = vpop.permute.xlu0 %2195  ;;  %v2193_v54 = vunpack.i.h.bf16 %v2191_v18  ;;  %v2192_v6 = vunpack.i.l.bf16 %v2191_v18  ;;  %v535_v18 = vsel %vm444_vm2, 0.0, %v475_v57 }
  0xa8   : > { %v2198_v12 = vunpack.i.h.bf16 %v2196_v43  ;;  %v2197_v29 = vunpack.i.l.bf16 %v2196_v43  ;;  %1952 = vmatmul.mubr.msk.bf16.gmra.mrb[8].mxu1 %vm922_vm5, %v2876_v40  ;;  %1989 = vmatprep.mubr.msk.bf16.mxu0 %vm922_vm5, %v2876_v40 }
  0xa9   : > { %v846_v31 = vsel %vm830_vm3, %v2729_v60, %v2193_v54  ;;  %v845_v56 = vsel %vm830_vm3, %v532_v15, %v2192_v6 }
  0xaa   : > { %v876_v13 = vsel %vm863_vm4, %v843_v38, %v2197_v29  ;;  %v877_v39 = vsel %vm863_vm4, %v844_v45, %v2198_v12  ;;  %v2201_v1 = vpop.permute.xlu1 %2200 }
  0xab   : > { %v2890_v7 = vpack.c.bf16 %v877_v39, %v876_v13  ;;  %v2203_v53 = vunpack.i.h.bf16 %v2201_v1  ;;  %v2202_v0 = vunpack.i.l.bf16 %v2201_v1  ;;  %v2206_v32 = vpop.permute.xlu0 %2205 }
  0xac   : > { %v2208_v24 = vunpack.i.h.bf16 %v2206_v32  ;;  %v2207_v62 = vunpack.i.l.bf16 %v2206_v32 }
  0xad   : > { %v878_v46 = vsel %vm863_vm4, %v845_v56, %v2202_v0  ;;  %v879_v21 = vsel %vm863_vm4, %v846_v31, %v2203_v53  ;;  %1955 = vmatprep.mubr.msk.bf16.mxu1 %vm922_vm5, %v2890_v7  ;;  %1990 = vmatmul.mubr.msk.bf16.gmra.mrb[12].mxu0 %vm922_vm5, %v2890_v7  ;;  %v537_v31 = vsel %vm444_vm2, 0.0, %v481_v2 }
  0xae   : > { %v2904_v30 = vpack.c.bf16 %v879_v21, %v878_v46  ;;  %v2211_v41 = vpop.permute.xlu1 %2210  ;;  %2011 = vmatprep.mubr.msk.bf16.mxu0 %vm922_vm5, %v2819_v17  ;;  %v848_v60 = vsel %vm830_vm3, %v2742_v3, %v2208_v24  ;;  %v847_v61 = vsel %vm830_vm3, %v533_v34, %v2207_v62 }
  0xaf   : > { %v2216_v4 = vpop.permute.xlu0 %2215  ;;  %v2213_v10 = vunpack.i.h.bf16 %v2211_v41  ;;  %v2212_v37 = vunpack.i.l.bf16 %v2211_v41 }
  0xb0   : > { %v2218_v22 = vunpack.i.h.bf16 %v2216_v4  ;;  %v2217_v20 = vunpack.i.l.bf16 %v2216_v4  ;;  %1956 = vmatmul.mubr.msk.bf16.gmra.mrb[12].mxu1 %vm922_vm5, %v2904_v30 }
  0xb1   : > { %v850_v38 = vsel %vm830_vm3, %v2750_v9, %v2213_v10  ;;  %v849_v36 = vsel %vm830_vm3, %v534_v25, %v2212_v37 }
  0xb2   : > { %v880_v16 = vsel %vm863_vm4, %v847_v61, %v2217_v20  ;;  %v881_v17 = vsel %vm863_vm4, %v848_v60, %v2218_v22  ;;  %v2221_v48 = vpop.permute.xlu1 %2220 }
  0xb3   : > { %v2918_v3 = vpack.c.bf16 %v881_v17, %v880_v16  ;;  %v2223_v28 = vunpack.i.h.bf16 %v2221_v48  ;;  %v2222_v63 = vunpack.i.l.bf16 %v2221_v48  ;;  %v2226_v45 = vpop.permute.xlu0 %2225  ;;  %v539_v17 = vsel %vm444_vm2, 0.0, %v487_v59 }
  0xb4   : > { %v2228_v47 = vunpack.i.h.bf16 %v2226_v45  ;;  %v2227_v43 = vunpack.i.l.bf16 %v2226_v45 }
  0xb5   : > { %v882_v54 = vsel %vm863_vm4, %v849_v36, %v2222_v63  ;;  %v883_v6 = vsel %vm863_vm4, %v850_v38, %v2223_v28  ;;  %1959 = vmatprep.mubr.msk.bf16.mxu1 %vm922_vm5, %v2918_v3  ;;  %2012 = vmatmul.mubr.msk.bf16.vlgmr.msra.gmra.mrb[0].mxu0 %vm922_vm5, %v2834_v42  ;;  %v536_v42 = vsel %vm444_vm2, 0.0, %v478_v35 }
  0xb6   : > { %v2932_v8 = vpack.c.bf16 %v883_v6, %v882_v54  ;;  %v2231_v57 = vpop.permute.xlu1 %2230  ;;  %2015 = vmatprep.mubr.msk.bf16.mxu0 %vm922_vm5, %v2848_v19  ;;  %v852_v9 = vsel %vm830_vm3, %v2755_v49, %v2228_v47  ;;  %v851_v12 = vsel %vm830_vm3, %v535_v18, %v2227_v43 }
  0xb7   : > { %v2236_v29 = vpop.permute.xlu0 %2235  ;;  %v2233_v15 = vunpack.i.h.bf16 %v2231_v57  ;;  %v2232_v13 = vunpack.i.l.bf16 %v2231_v57 }
  0xb8   : > { %v2238_v39 = vunpack.i.h.bf16 %v2236_v29  ;;  %v2237_v1 = vunpack.i.l.bf16 %v2236_v29  ;;  %1960 = vmatmul.mubr.msk.bf16.gmra.mrb[16].mxu1 %vm922_vm5, %v2932_v8 }
  0xb9   : > { %v854_v24 = vsel %vm830_vm3, %v2761_v44, %v2233_v15  ;;  %v853_v11 = vsel %vm830_vm3, %v536_v42, %v2232_v13 }
  0xba   : > { %v884_v53 = vsel %vm863_vm4, %v851_v12, %v2237_v1  ;;  %v885_v19 = vsel %vm863_vm4, %v852_v9, %v2238_v39  ;;  %v2241_v0 = vpop.permute.xlu1 %2240 }
  0xbb   : > { %v2946_v49 = vpack.c.bf16 %v885_v19, %v884_v53  ;;  %v2243_v34 = vunpack.i.h.bf16 %v2241_v0  ;;  %v2242_v32 = vunpack.i.l.bf16 %v2241_v0  ;;  %v2246_v56 = vpop.permute.xlu0 %2245 }
  0xbc   : > { %v2248_v35 = vunpack.i.h.bf16 %v2246_v56  ;;  %v2247_v62 = vunpack.i.l.bf16 %v2246_v56 }
  0xbd   : > { %v886_v46 = vsel %vm863_vm4, %v853_v11, %v2242_v32  ;;  %v887_v21 = vsel %vm863_vm4, %v854_v24, %v2243_v34  ;;  %1963 = vmatprep.mubr.msk.bf16.mxu1 %vm922_vm5, %v2946_v49  ;;  %2016 = vmatmul.mubr.msk.bf16.gmra.mrb[4].mxu0 %vm922_vm5, %v2862_v27  ;;  %v538_v27 = vsel %vm444_vm2, 0.0, %v484_v51 }
  0xbe   : > { %v2960_v23 = vpack.c.bf16 %v887_v21, %v886_v46  ;;  %v2251_v2 = vpop.permute.xlu1 %2250  ;;  %2019 = vmatprep.mubr.msk.bf16.mxu0 %vm922_vm5, %v2876_v40  ;;  %v856_v44 = vsel %vm830_vm3, %v2773_v55, %v2248_v35  ;;  %v855_v41 = vsel %vm830_vm3, %v537_v31, %v2247_v62 }
  0xbf   : > { %v2256_v60 = vpop.permute.xlu0 %2255  ;;  %v2253_v61 = vunpack.i.h.bf16 %v2251_v2  ;;  %v2252_v4 = vunpack.i.l.bf16 %v2251_v2 }
  0xc0   : > { %v2258_v10 = vunpack.i.h.bf16 %v2256_v60  ;;  %v2257_v37 = vunpack.i.l.bf16 %v2256_v60  ;;  %1964 = vmatmul.mubr.msk.bf16.gmra.mrb[20].mxu1 %vm922_vm5, %v2960_v23 }
  0xc1   : > { %v858_v28 = vsel %vm830_vm3, %v2782_v52, %v2253_v61  ;;  %v857_v58 = vsel %vm830_vm3, %v538_v27, %v2252_v4 }
  0xc2   : > { %v888_v22 = vsel %vm863_vm4, %v855_v41, %v2257_v37  ;;  %v889_v40 = vsel %vm863_vm4, %v856_v44, %v2258_v10  ;;  %v2261_v20 = vpop.permute.xlu1 %2260 }
  0xc3   : > { %v908_v55 = vpack.c.bf16 %v889_v40, %v888_v22  ;;  %v2263_v25 = vunpack.i.h.bf16 %v2261_v20  ;;  %v2262_v16 = vunpack.i.l.bf16 %v2261_v20  ;;  %v2266_v48 = vpop.permute.xlu0 %2265 }
  0xc4   : > { %v2268_v63 = vunpack.i.h.bf16 %v2266_v48  ;;  %v2267_v51 = vunpack.i.l.bf16 %v2266_v48 }
  0xc5   : > { %v890_v18 = vsel %vm863_vm4, %v857_v58, %v2262_v16  ;;  %v891_v45 = vsel %vm863_vm4, %v858_v28, %v2263_v25  ;;  %1967 = vmatprep.mubr.msk.bf16.mxu1 %vm922_vm5, %v908_v55  ;;  %2020 = vmatmul.mubr.msk.bf16.gmra.mrb[8].mxu0 %vm922_vm5, %v2890_v7  ;;  %v540_v7 = vsel %vm444_vm2, 0.0, %v490_v33  ;;  %v3207_v33 = vmov 0  }
  0xc6   : > { %v909_v50 = vpack.c.bf16 %v891_v45, %v890_v18  ;;  %v2271_v38 = vpop.permute.xlu1 %2270  ;;  %2023 = vmatprep.mubr.msk.bf16.mxu0 %vm922_vm5, %v2904_v30  ;;  %v860_v59 = vsel %vm830_vm3, %v2787_v14, %v2268_v63  ;;  %v859_v52 = vsel %vm830_vm3, %v539_v17, %v2267_v51 }
  0xc7   : > { %v2276_v36 = vpop.permute.xlu0 %2275  ;;  %v2273_v47 = vunpack.i.h.bf16 %v2271_v38  ;;  %v2272_v43 = vunpack.i.l.bf16 %v2271_v38 }
  0xc8   : > { %v2278_v54 = vunpack.i.h.bf16 %v2276_v36  ;;  %v2277_v6 = vunpack.i.l.bf16 %v2276_v36  ;;  %1968 = vmatmul.mubr.msk.bf16.gmra.mrb[24].mxu1 %vm922_vm5, %v909_v50 }
  0xc9   : > { %v862_v13 = vsel %vm830_vm3, %v2792_v26, %v2273_v47  ;;  %v861_v39 = vsel %vm830_vm3, %v540_v7, %v2272_v43 }
  0xca   : > { %v892_v57 = vsel %vm863_vm4, %v859_v52, %v2277_v6  ;;  %v893_v9 = vsel %vm863_vm4, %v860_v59, %v2278_v54  ;;  %v2281_v12 = vpop.permute.xlu1 %2280 }
  0xcb   : > { %v910_v29 = vpack.c.bf16 %v893_v9, %v892_v57  ;;  %v2283_v14 = vunpack.i.h.bf16 %v2281_v12  ;;  %v2282_v15 = vunpack.i.l.bf16 %v2281_v12 }
  0xcd   : > { %v894_v1 = vsel %vm863_vm4, %v861_v39, %v2282_v15  ;;  %v895_v42 = vsel %vm863_vm4, %v862_v13, %v2283_v14  ;;  %1971 = vmatprep.mubr.msk.bf16.mxu1 %vm922_vm5, %v910_v29  ;;  %2024 = vmatmul.mubr.msk.bf16.gmra.mrb[12].mxu0 %vm922_vm5, %v2918_v3 }
  0xce   : > { %v911_v5 = vpack.c.bf16 %v895_v42, %v894_v1  ;;  %2027 = vmatprep.mubr.msk.bf16.mxu0 %vm922_vm5, %v2932_v8 }
  0xd0   : > { %1972 = vmatmul.mubr.msk.bf16.gmra.mrb[28].mxu1 %vm922_vm5, %v911_v5 }
  0xd1   : > { %1993 = vmatprep.mubr.msk.bf16.mxu1 %vm922_vm5, %v2904_v30 }
  0xd5   : > { %2028 = vmatmul.mubr.msk.bf16.gmra.mrb[16].mxu0 %vm922_vm5, %v2946_v49 }
  0xd6   : > { %2031 = vmatprep.mubr.msk.bf16.mxu0 %vm922_vm5, %v2960_v23 }
  0xd8   : > { %1994 = vmatmul.mubr.msk.bf16.vlgmr.msra.gmra.mrb[16].mxu1 %vm922_vm5, %v2918_v3 }
  0xd9   : > { %1997 = vmatprep.mubr.msk.bf16.mxu1 %vm922_vm5, %v2932_v8 }
  0xdd   : > { %2032 = vmatmul.mubr.msk.bf16.gmra.mrb[20].mxu0 %vm922_vm5, %v908_v55 }
  0xde   : > { %2035 = vmatprep.mubr.msk.bf16.mxu0 %vm922_vm5, %v909_v50 }
  0xe0   : > { %1998 = vmatmul.mubr.msk.bf16.gmra.mrb[20].mxu1 %vm922_vm5, %v2946_v49 }
  0xe1   : > { %2001 = vmatprep.mubr.msk.bf16.mxu1 %vm922_vm5, %v2960_v23 }
  0xe5   : > { %2036 = vmatmul.mubr.msk.bf16.gmra.mrb[24].mxu0 %vm922_vm5, %v910_v29 }
  0xe6   : > { %2039 = vmatprep.mubr.msk.bf16.mxu0 %vm922_vm5, %v911_v5 }
  0xe8   : > { %2002 = vmatmul.mubr.msk.bf16.gmra.mrb[24].mxu1 %vm922_vm5, %v908_v55 }
  0xe9   : > { %2005 = vmatprep.mubr.msk.bf16.mxu1 %vm922_vm5, %v909_v50 }
  0xed   : > { %2040 = vmatmul.mubr.bf16.gmra.mrb[28].mxu0 %v3207_v33 }
  0xf0   : > { %2006 = vmatmul.mubr.msk.bf16.gmra.mrb[28].mxu1 %vm922_vm5, %v910_v29 }
 0x16b   : > { %v1945_v26 = vpop.f32.mrb[0].mxu1 }
 0x16c   : > { %v1009_v30 = vpop.f32.mrb[1].mxu1 }
 0x16d   : > { %v1946_v3 = vpop.f32.mrb[2].mxu1 }
 0x16e   : > { %v1012_v8 = vpop.f32.mrb[3].mxu1 }
 0x173   : > { %v1949_v53 = vpop.f32.mrb[4].mxu1 }
 0x174   : > { %v1025_v19 = vpop.f32.mrb[5].mxu1 }
 0x175   : > { %v1950_v0 = vpop.f32.mrb[6].mxu1 }
 0x176   : > { %v1028_v49 = vpop.f32.mrb[7].mxu1 }
 0x17b   : > { %v3029_v34 = vpop.f32.mrb[8].mxu1 }
 0x17c   : > { %v3031_v32 = vpop.f32.mrb[9].mxu1 }
 0x17d   : > { %v3033_v31 = vpop.f32.mrb[10].mxu1 }
 0x17e   : > { %v3035_v56 = vpop.f32.mrb[11].mxu1 }
 0x183   : > { %v3037_v24 = vpop.f32.mrb[12].mxu1 }
 0x184   : > { %v3039_v11 = vpop.f32.mrb[13].mxu1 }
 0x185   : > { %v3041_v35 = vpop.f32.mrb[14].mxu1 }
 0x186   : > { %v3043_v62 = vpop.f32.mrb[15].mxu1 }
 0x188   : > { %v2013_v46 = vpop.f32.mrb[0].mxu0 }
 0x189   : > { %v2045_v21 = vadd.f32 %v2013_v46, %v1945_v26  ;;  %v1353_v23 = vpop.f32.mrb[1].mxu0 }
 0x18a   : > { %v2046_v2 = vadd.f32 %v1353_v23, %v1009_v30  ;;  %v2014_v44 = vpop.f32.mrb[2].mxu0 }
 0x18b   : > { %1514 = vst.msk [vmem:[%s3050_s17 + $0x10] sm:$0xff] %vm830_vm3, %v2045_v21  ;;  %v2047_v41 = vadd.f32 %v2014_v44, %v1946_v3  ;;  %v1356_v60 = vpop.f32.mrb[3].mxu0  ;;  %v1617_v10 = vmul.f32 %v2045_v21, %v2045_v21  ;;  %v1547_v55 = vsel %vm830_vm3, %v2045_v21, 0.0 }
 0x18c   : > { %1512 = vst.msk [vmem:[%s3050_s17] sm:$0xff] %vm830_vm3, %v2046_v2  ;;  %v1615_v61 = vmul.f32 %v2046_v2, %v2046_v2  ;;  %v2048_v4 = vadd.f32 %v1356_v60, %v1012_v8  ;;  %v1544_v37 = vsel %vm830_vm3, %v2046_v2, 0.0 }
 0x18d   : > { %1515 = vst.msk [vmem:[%s3050_s17 + $0x18] sm:$0xff] %vm830_vm3, %v2047_v41  ;;  %v1618_v40 = vmul.f32 %v2047_v41, %v2047_v41  ;;  %v1650_v51 = vsel %vm830_vm3, %v1617_v10, 0.0  ;;  %v1549_v18 = vsel %vm830_vm3, %v2047_v41, 0.0 }
 0x18e   : > { %1513 = vst.msk [vmem:[%s3050_s17 + $0x8] sm:$0xff] %vm830_vm3, %v2048_v4  ;;  %v1545_v27 = vsel %vm830_vm3, %v2048_v4, 0.0  ;;  %v1616_v22 = vmul.f32 %v2048_v4, %v2048_v4  ;;  %v1647_v25 = vsel %vm830_vm3, %v1615_v61, 0.0 }
 0x18f   : > { %v1546_v20 = vadd.f32 %v1545_v27, %v1544_v37  ;;  %v1652_v38 = vsel %vm830_vm3, %v1618_v40, 0.0 }
 0x190   : > { %v1648_v16 = vsel %vm830_vm3, %v1616_v22, 0.0  ;;  %v2017_v17 = vpop.f32.mrb[4].mxu0 }
 0x191   : > { %v1548_v48 = vadd.f32 %v1547_v55, %v1546_v20  ;;  %v1649_v28 = vadd.f32 %v1648_v16, %v1647_v25  ;;  %v2049_v58 = vadd.f32 %v2017_v17, %v1949_v53  ;;  %v1369_v63 = vpop.f32.mrb[5].mxu0 }
 0x192   : > { %v2050_v45 = vadd.f32 %v1369_v63, %v1025_v19  ;;  %v2018_v50 = vpop.f32.mrb[6].mxu0 }
 0x193   : > { %v1651_v59 = vadd.f32 %v1650_v51, %v1649_v28  ;;  %1518 = vst.msk [vmem:[%s3050_s17 + $0x30] sm:$0xff] %vm830_vm3, %v2049_v58  ;;  %v1550_v52 = vadd.f32 %v1549_v18, %v1548_v48  ;;  %v1372_v36 = vpop.f32.mrb[7].mxu0  ;;  %v2051_v54 = vadd.f32 %v2018_v50, %v1950_v0  ;;  %v1621_v29 = vmul.f32 %v2049_v58, %v2049_v58 }
 0x194   : > { %1516 = vst.msk [vmem:[%s3050_s17 + $0x20] sm:$0xff] %vm830_vm3, %v2050_v45  ;;  %v1551_v47 = vsel %vm830_vm3, %v2050_v45, 0.0  ;;  %v1619_v43 = vmul.f32 %v2050_v45, %v2050_v45  ;;  %v2052_v6 = vadd.f32 %v1372_v36, %v1028_v49  ;;  %v1555_v39 = vsel %vm830_vm3, %v2049_v58, 0.0 }
 0x195   : > { %v1552_v7 = vadd.f32 %v1551_v47, %v1550_v52  ;;  %v1653_v57 = vadd.f32 %v1652_v38, %v1651_v59  ;;  %1519 = vst.msk [vmem:[%s3050_s17 + $0x38] sm:$0xff] %vm830_vm3, %v2051_v54  ;;  %v1622_v42 = vmul.f32 %v2051_v54, %v2051_v54  ;;  %v1557_v3 = vsel %vm830_vm3, %v2051_v54, 0.0 }
 0x196   : > { %v1654_v9 = vsel %vm830_vm3, %v1619_v43, 0.0  ;;  %1517 = vst.msk [vmem:[%s3050_s17 + $0x28] sm:$0xff] %vm830_vm3, %v2052_v6  ;;  %v1553_v12 = vsel %vm830_vm3, %v2052_v6, 0.0  ;;  %v1620_v13 = vmul.f32 %v2052_v6, %v2052_v6  ;;  %v1658_v0 = vsel %vm830_vm3, %v1621_v29, 0.0 }
 0x197   : > { %v1655_v14 = vadd.f32 %v1654_v9, %v1653_v57  ;;  %v1554_v15 = vadd.f32 %v1553_v12, %v1552_v7 }
 0x198   : > { %v2021_v1 = vpop.f32.mrb[8].mxu0  ;;  %v1656_v33 = vsel %vm830_vm3, %v1620_v13, 0.0 }
 0x199   : > { %v1556_v5 = vadd.f32 %v1555_v39, %v1554_v15  ;;  %v2053_v26 = vadd.f32 %v2021_v1, %v3029_v34  ;;  %v1385_v30 = vpop.f32.mrb[9].mxu0  ;;  %v1657_v8 = vadd.f32 %v1656_v33, %v1655_v14 }
 0x19a   : > { %v2054_v53 = vadd.f32 %v1385_v30, %v3031_v32  ;;  %v2022_v19 = vpop.f32.mrb[10].mxu0  ;;  %v1660_v32 = vsel %vm830_vm3, %v1622_v42, 0.0 }
 0x19b   : > { %1522 = vst.msk [vmem:[%s3050_s17 + $0x50] sm:$0xff] %vm830_vm3, %v2053_v26  ;;  %v1558_v49 = vadd.f32 %v1557_v3, %v1556_v5  ;;  %v2055_v46 = vadd.f32 %v2022_v19, %v3033_v31  ;;  %v1388_v21 = vpop.f32.mrb[11].mxu0  ;;  %v1659_v23 = vadd.f32 %v1658_v0, %v1657_v8  ;;  %v1625_v10 = vmul.f32 %v2053_v26, %v2053_v26 }
 0x19c   : > { %1520 = vst.msk [vmem:[%s3050_s17 + $0x40] sm:$0xff] %vm830_vm3, %v2054_v53  ;;  %v1559_v34 = vsel %vm830_vm3, %v2054_v53, 0.0  ;;  %v1623_v2 = vmul.f32 %v2054_v53, %v2054_v53  ;;  %v2056_v44 = vadd.f32 %v1388_v21, %v3035_v56  ;;  %v1563_v27 = vsel %vm830_vm3, %v2053_v26, 0.0 }
 0x19d   : > { %v1560_v41 = vadd.f32 %v1559_v34, %v1558_v49  ;;  %1523 = vst.msk [vmem:[%s3050_s17 + $0x58] sm:$0xff] %vm830_vm3, %v2055_v46  ;;  %v1661_v60 = vadd.f32 %v1660_v32, %v1659_v23  ;;  %v1626_v20 = vmul.f32 %v2055_v46, %v2055_v46  ;;  %v1565_v17 = vsel %vm830_vm3, %v2055_v46, 0.0 }
 0x19e   : > { %v1662_v61 = vsel %vm830_vm3, %v1623_v2, 0.0  ;;  %1521 = vst.msk [vmem:[%s3050_s17 + $0x48] sm:$0xff] %vm830_vm3, %v2056_v44  ;;  %v1561_v31 = vsel %vm830_vm3, %v2056_v44, 0.0  ;;  %v1624_v4 = vmul.f32 %v2056_v44, %v2056_v44  ;;  %v1666_v63 = vsel %vm830_vm3, %v1625_v10, 0.0 }
 0x19f   : > { %v1562_v37 = vadd.f32 %v1561_v31, %v1560_v41  ;;  %v1663_v22 = vadd.f32 %v1662_v61, %v1661_v60 }
 0x1a0   : > { %v1664_v56 = vsel %vm830_vm3, %v1624_v4, 0.0  ;;  %v2025_v40 = vpop.f32.mrb[12].mxu0 }
 0x1a1   : > { %v1564_v55 = vadd.f32 %v1563_v27, %v1562_v37  ;;  %v2057_v25 = vadd.f32 %v2025_v40, %v3037_v24  ;;  %v1401_v16 = vpop.f32.mrb[13].mxu0  ;;  %v1665_v48 = vadd.f32 %v1664_v56, %v1663_v22 }
 0x1a2   : > { %v2058_v28 = vadd.f32 %v1401_v16, %v3039_v11  ;;  %v2026_v58 = vpop.f32.mrb[14].mxu0  ;;  %v1668_v11 = vsel %vm830_vm3, %v1626_v20, 0.0 }
 0x1a3   : > { %1526 = vst.msk [vmem:[%s3050_s17 + $0x70] sm:$0xff] %vm830_vm3, %v2057_v25  ;;  %v1566_v51 = vadd.f32 %v1565_v17, %v1564_v55  ;;  %v2059_v18 = vadd.f32 %v2026_v58, %v3041_v35  ;;  %v1404_v45 = vpop.f32.mrb[15].mxu0  ;;  %v1667_v50 = vadd.f32 %v1666_v63, %v1665_v48  ;;  %v1629_v54 = vmul.f32 %v2057_v25, %v2057_v25 }
 0x1a4   : > { %1524 = vst.msk [vmem:[%s3050_s17 + $0x60] sm:$0xff] %vm830_vm3, %v2058_v28  ;;  %v1567_v24 = vsel %vm830_vm3, %v2058_v28, 0.0  ;;  %v1627_v38 = vmul.f32 %v2058_v28, %v2058_v28  ;;  %v2060_v59 = vadd.f32 %v1404_v45, %v3043_v62  ;;  %v1571_v7 = vsel %vm830_vm3, %v2057_v25, 0.0 }
 0x1a5   : > { %v1568_v52 = vadd.f32 %v1567_v24, %v1566_v51  ;;  %1527 = vst.msk [vmem:[%s3050_s17 + $0x78] sm:$0xff] %vm830_vm3, %v2059_v18  ;;  %v1669_v36 = vadd.f32 %v1668_v11, %v1667_v50  ;;  %v1630_v12 = vmul.f32 %v2059_v18, %v2059_v18  ;;  %v1573_v15 = vsel %vm830_vm3, %v2059_v18, 0.0 }
 0x1a6   : > { %v1670_v47 = vsel %vm830_vm3, %v1627_v38, 0.0  ;;  %1525 = vst.msk [vmem:[%s3050_s17 + $0x68] sm:$0xff] %vm830_vm3, %v2060_v59  ;;  %v1569_v35 = vsel %vm830_vm3, %v2060_v59, 0.0  ;;  %v1628_v43 = vmul.f32 %v2060_v59, %v2060_v59  ;;  %v1674_v1 = vsel %vm830_vm3, %v1629_v54, 0.0 }
 0x1a7   : > { %v1570_v6 = vadd.f32 %v1569_v35, %v1568_v52  ;;  %v1671_v57 = vadd.f32 %v1670_v47, %v1669_v36  ;;  %v1676_v8 = vsel %vm830_vm3, %v1630_v12, 0.0 }
 0x1a8   : > { %v1672_v62 = vsel %vm830_vm3, %v1628_v43, 0.0  ;;  %v2029_v9 = vpop.f32.mrb[16].mxu0 }
 0x1a9   : > { %v1572_v29 = vadd.f32 %v1571_v7, %v1570_v6  ;;  %v1417_v14 = vpop.f32.mrb[17].mxu0  ;;  %v1673_v13 = vadd.f32 %v1672_v62, %v1671_v57 }
 0x1aa   : > { %v2030_v39 = vpop.f32.mrb[18].mxu0 }
 0x1ab   : > { %v1995_v42 = vpop.f32.mrb[16].mxu1  ;;  %v1420_v5 = vpop.f32.mrb[19].mxu0  ;;  %v1574_v33 = vadd.f32 %v1573_v15, %v1572_v29  ;;  %v1675_v26 = vadd.f32 %v1674_v1, %v1673_v13 }
 0x1ac   : > { %v2061_v30 = vadd.f32 %v2029_v9, %v1995_v42  ;;  %v1245_v3 = vpop.f32.mrb[17].mxu1 }
 0x1ad   : > { %v2062_v53 = vadd.f32 %v1417_v14, %v1245_v3  ;;  %v1996_v19 = vpop.f32.mrb[18].mxu1  ;;  %v1677_v0 = vadd.f32 %v1676_v8, %v1675_v26 }
 0x1ae   : > { %1530 = vst.msk [vmem:[%s3050_s17 + $0x90] sm:$0xff] %vm830_vm3, %v2061_v30  ;;  %v2063_v49 = vadd.f32 %v2030_v39, %v1996_v19  ;;  %v1248_v46 = vpop.f32.mrb[19].mxu1  ;;  %v1633_v32 = vmul.f32 %v2061_v30, %v2061_v30  ;;  %v1579_v22 = vsel %vm830_vm3, %v2061_v30, 0.0 }
 0x1af   : > { %1528 = vst.msk [vmem:[%s3050_s17 + $0x80] sm:$0xff] %vm830_vm3, %v2062_v53  ;;  %v1575_v21 = vsel %vm830_vm3, %v2062_v53, 0.0  ;;  %v1631_v23 = vmul.f32 %v2062_v53, %v2062_v53  ;;  %v2064_v34 = vadd.f32 %v1420_v5, %v1248_v46 }
 0x1b0   : > { %v1576_v2 = vadd.f32 %v1575_v21, %v1574_v33  ;;  %1531 = vst.msk [vmem:[%s3050_s17 + $0x98] sm:$0xff] %vm830_vm3, %v2063_v49  ;;  %v2033_v44 = vpop.f32.mrb[20].mxu0  ;;  %v1634_v10 = vmul.f32 %v2063_v49, %v2063_v49  ;;  %v1682_v48 = vsel %vm830_vm3, %v1633_v32, 0.0  ;;  %v1581_v28 = vsel %vm830_vm3, %v2063_v49, 0.0 }
 0x1b1   : > { %v1678_v41 = vsel %vm830_vm3, %v1631_v23, 0.0  ;;  %1529 = vst.msk [vmem:[%s3050_s17 + $0x88] sm:$0xff] %vm830_vm3, %v2064_v34  ;;  %v1577_v60 = vsel %vm830_vm3, %v2064_v34, 0.0  ;;  %v1632_v61 = vmul.f32 %v2064_v34, %v2064_v34  ;;  %v1433_v31 = vpop.f32.mrb[21].mxu0 }
 0x1b2   : > { %v1679_v4 = vadd.f32 %v1678_v41, %v1677_v0  ;;  %v1578_v37 = vadd.f32 %v1577_v60, %v1576_v2  ;;  %v2034_v27 = vpop.f32.mrb[22].mxu0  ;;  %v1684_v51 = vsel %vm830_vm3, %v1634_v10, 0.0 }
 0x1b3   : > { %v1680_v56 = vsel %vm830_vm3, %v1632_v61, 0.0  ;;  %v1999_v40 = vpop.f32.mrb[20].mxu1  ;;  %v1436_v20 = vpop.f32.mrb[23].mxu0 }
 0x1b4   : > { %v1580_v55 = vadd.f32 %v1579_v22, %v1578_v37  ;;  %v1681_v25 = vadd.f32 %v1680_v56, %v1679_v4  ;;  %v2065_v16 = vadd.f32 %v2033_v44, %v1999_v40  ;;  %v1261_v17 = vpop.f32.mrb[21].mxu1 }
 0x1b5   : > { %v2066_v58 = vadd.f32 %v1433_v31, %v1261_v17  ;;  %v2000_v63 = vpop.f32.mrb[22].mxu1 }
 0x1b6   : > { %v1683_v18 = vadd.f32 %v1682_v48, %v1681_v25  ;;  %1534 = vst.msk [vmem:[%s3050_s17 + $0xb0] sm:$0xff] %vm830_vm3, %v2065_v16  ;;  %v1582_v45 = vadd.f32 %v1581_v28, %v1580_v55  ;;  %v1264_v50 = vpop.f32.mrb[23].mxu1  ;;  %v2067_v59 = vadd.f32 %v2034_v27, %v2000_v63  ;;  %v1637_v6 = vmul.f32 %v2065_v16, %v2065_v16 }
 0x1b7   : > { %1532 = vst.msk [vmem:[%s3050_s17 + $0xa0] sm:$0xff] %vm830_vm3, %v2066_v58  ;;  %v1583_v24 = vsel %vm830_vm3, %v2066_v58, 0.0  ;;  %v1635_v38 = vmul.f32 %v2066_v58, %v2066_v58  ;;  %v2068_v11 = vadd.f32 %v1436_v20, %v1264_v50  ;;  %v1587_v12 = vsel %vm830_vm3, %v2065_v16, 0.0 }
 0x1b8   : > { %v1584_v52 = vadd.f32 %v1583_v24, %v1582_v45  ;;  %v1685_v36 = vadd.f32 %v1684_v51, %v1683_v18  ;;  %v2037_v47 = vpop.f32.mrb[24].mxu0  ;;  %1535 = vst.msk [vmem:[%s3050_s17 + $0xb8] sm:$0xff] %vm830_vm3, %v2067_v59  ;;  %v1638_v15 = vmul.f32 %v2067_v59, %v2067_v59  ;;  %v1589_v5 = vsel %vm830_vm3, %v2067_v59, 0.0 }
 0x1b9   : > { %v1686_v35 = vsel %vm830_vm3, %v1635_v38, 0.0  ;;  %1533 = vst.msk [vmem:[%s3050_s17 + $0xa8] sm:$0xff] %vm830_vm3, %v2068_v11  ;;  %v1585_v43 = vsel %vm830_vm3, %v2068_v11, 0.0  ;;  %v1449_v54 = vpop.f32.mrb[25].mxu0  ;;  %v1636_v62 = vmul.f32 %v2068_v11, %v2068_v11  ;;  %v1690_v3 = vsel %vm830_vm3, %v1637_v6, 0.0 }
 0x1ba   : > { %v1687_v7 = vadd.f32 %v1686_v35, %v1685_v36  ;;  %v1586_v57 = vadd.f32 %v1585_v43, %v1584_v52  ;;  %v2038_v9 = vpop.f32.mrb[26].mxu0  ;;  %v1692_v23 = vsel %vm830_vm3, %v1638_v15, 0.0 }
 0x1bb   : > { %v2003_v29 = vpop.f32.mrb[24].mxu1  ;;  %v1452_v14 = vpop.f32.mrb[27].mxu0  ;;  %v1688_v39 = vsel %vm830_vm3, %v1636_v62, 0.0 }
 0x1bc   : > { %v1588_v13 = vadd.f32 %v1587_v12, %v1586_v57  ;;  %v2069_v1 = vadd.f32 %v2037_v47, %v2003_v29  ;;  %v1277_v42 = vpop.f32.mrb[25].mxu1  ;;  %v1689_v33 = vadd.f32 %v1688_v39, %v1687_v7 }
 0x1bd   : > { %v2070_v26 = vadd.f32 %v1449_v54, %v1277_v42  ;;  %v2004_v30 = vpop.f32.mrb[26].mxu1 }
 0x1be   : > { %1538 = vst.msk [vmem:[%s3050_s17 + $0xd0] sm:$0xff] %vm830_vm3, %v2069_v1  ;;  %v1590_v8 = vadd.f32 %v1589_v5, %v1588_v13  ;;  %v2071_v53 = vadd.f32 %v2038_v9, %v2004_v30  ;;  %v1280_v19 = vpop.f32.mrb[27].mxu1  ;;  %v1691_v0 = vadd.f32 %v1690_v3, %v1689_v33  ;;  %v1641_v31 = vmul.f32 %v2069_v1, %v2069_v1 }
 0x1bf   : > { %1536 = vst.msk [vmem:[%s3050_s17 + $0xc0] sm:$0xff] %vm830_vm3, %v2070_v26  ;;  %v1591_v49 = vsel %vm830_vm3, %v2070_v26, 0.0  ;;  %v1639_v46 = vmul.f32 %v2070_v26, %v2070_v26  ;;  %v2072_v21 = vadd.f32 %v1452_v14, %v1280_v19  ;;  %v1595_v37 = vsel %vm830_vm3, %v2069_v1, 0.0 }
 0x1c0   : > { %v1592_v34 = vadd.f32 %v1591_v49, %v1590_v8  ;;  %1539 = vst.msk [vmem:[%s3050_s17 + $0xd8] sm:$0xff] %vm830_vm3, %v2071_v53  ;;  %v2041_v2 = vpop.f32.mrb[28].mxu0  ;;  %v1693_v44 = vadd.f32 %v1692_v23, %v1691_v0  ;;  %v1642_v20 = vmul.f32 %v2071_v53, %v2071_v53  ;;  %v1597_v17 = vsel %vm830_vm3, %v2071_v53, 0.0 }
 0x1c1   : > { %v1694_v32 = vsel %vm830_vm3, %v1639_v46, 0.0  ;;  %1537 = vst.msk [vmem:[%s3050_s17 + $0xc8] sm:$0xff] %vm830_vm3, %v2072_v21  ;;  %v1593_v41 = vsel %vm830_vm3, %v2072_v21, 0.0  ;;  %v1640_v60 = vmul.f32 %v2072_v21, %v2072_v21  ;;  %v1465_v61 = vpop.f32.mrb[29].mxu0  ;;  %v1698_v63 = vsel %vm830_vm3, %v1641_v31, 0.0 }
 0x1c2   : > { %v1594_v4 = vadd.f32 %v1593_v41, %v1592_v34  ;;  %v2042_v10 = vpop.f32.mrb[30].mxu0  ;;  %v1695_v27 = vadd.f32 %v1694_v32, %v1693_v44  ;;  %v1700_v11 = vsel %vm830_vm3, %v1642_v20, 0.0 }
 0x1c3   : > { %v1696_v22 = vsel %vm830_vm3, %v1640_v60, 0.0  ;;  %v2007_v56 = vpop.f32.mrb[28].mxu1  ;;  %v1468_v40 = vpop.f32.mrb[31].mxu0 }
 0x1c4   : > { %v1596_v55 = vadd.f32 %v1595_v37, %v1594_v4  ;;  %v2073_v25 = vadd.f32 %v2041_v2, %v2007_v56  ;;  %v1293_v16 = vpop.f32.mrb[29].mxu1  ;;  %v1697_v48 = vadd.f32 %v1696_v22, %v1695_v27 }
 0x1c5   : > { %v2074_v28 = vadd.f32 %v1465_v61, %v1293_v16  ;;  %v2008_v58 = vpop.f32.mrb[30].mxu1 }
 0x1c6   : > { %1542 = vst.msk [vmem:[%s3050_s17 + $0xf0] sm:$0xff] %vm830_vm3, %v2073_v25  ;;  %v1598_v51 = vadd.f32 %v1597_v17, %v1596_v55  ;;  %v2075_v18 = vadd.f32 %v2042_v10, %v2008_v58  ;;  %v1296_v45 = vpop.f32.mrb[31].mxu1  ;;  %v1699_v50 = vadd.f32 %v1698_v63, %v1697_v48  ;;  %v1645_v54 = vmul.f32 %v2073_v25, %v2073_v25 }
 0x1c7   : > { %1540 = vst.msk [vmem:[%s3050_s17 + $0xe0] sm:$0xff] %vm830_vm3, %v2074_v28  ;;  %v1599_v24 = vsel %vm830_vm3, %v2074_v28, 0.0  ;;  %v1643_v38 = vmul.f32 %v2074_v28, %v2074_v28  ;;  %v2076_v59 = vadd.f32 %v1468_v40, %v1296_v45  ;;  %v1603_v7 = vsel %vm830_vm3, %v2073_v25, 0.0 }
 0x1c8   : > { %v1600_v52 = vadd.f32 %v1599_v24, %v1598_v51  ;;  %1543 = vst.msk [vmem:[%s3050_s17 + $0xf8] sm:$0xff] %vm830_vm3, %v2075_v18  ;;  %v1701_v36 = vadd.f32 %v1700_v11, %v1699_v50  ;;  %v1646_v9 = vmul.f32 %v2075_v18, %v2075_v18  ;;  %v1605_v29 = vsel %vm830_vm3, %v2075_v18, 0.0 }
 0x1c9   : > { %v1702_v47 = vsel %vm830_vm3, %v1643_v38, 0.0  ;;  %1541 = vst.msk [vmem:[%s3050_s17 + $0xe8] sm:$0xff] %vm830_vm3, %v2076_v59  ;;  %v1601_v35 = vsel %vm830_vm3, %v2076_v59, 0.0  ;;  %v1644_v43 = vmul.f32 %v2076_v59, %v2076_v59  ;;  %v1706_v15 = vsel %vm830_vm3, %v1645_v54, 0.0 }
 0x1ca   : > { %v1602_v6 = vadd.f32 %v1601_v35, %v1600_v52  ;;  %v1703_v57 = vadd.f32 %v1702_v47, %v1701_v36  ;;  %v1708_v1 = vsel %vm830_vm3, %v1646_v9, 0.0 }
 0x1cb   : > { %v1704_v62 = vsel %vm830_vm3, %v1644_v43, 0.0 }
 0x1cc   : > { %v1604_v12 = vadd.f32 %v1603_v7, %v1602_v6  ;;  %v1705_v14 = vadd.f32 %v1704_v62, %v1703_v57 }
 0x1ce   : > { %v1606_v13 = vadd.f32 %v1605_v29, %v1604_v12  ;;  %v1707_v39 = vadd.f32 %v1706_v15, %v1705_v14 }
 0x1d0   : > { %v1607_v42 = vrot.slane %v1606_v13, 4  ;;  %v1709_v5 = vadd.f32 %v1708_v1, %v1707_v39 }
 0x1d2   : > { %v1608_v33 = vadd.f32 %v1607_v42, %v1606_v13  ;;  %v1710_v26 = vrot.slane %v1709_v5, 4 }
 0x1d4   : > { %v1609_v30 = vrot.slane %v1608_v33, 2  ;;  %v1711_v3 = vadd.f32 %v1710_v26, %v1709_v5 }
 0x1d6   : > { %v1610_v8 = vadd.f32 %v1609_v30, %v1608_v33  ;;  %v1712_v53 = vrot.slane %v1711_v3, 2 }
 0x1d8   : > { %v1611_v19 = vrot.slane %v1610_v8, 1  ;;  %v1713_v0 = vadd.f32 %v1712_v53, %v1711_v3 }
 0x1da   : > { %v1612_v49 = vadd.f32 %v1611_v19, %v1610_v8  ;;  %v1714_v46 = vrot.slane %v1713_v0, 1 }
 0x1dc   : > { %1614 = vst.msk [vmem:[%s265_s20] sm:$0x1] %vm1613_vm6, %v1612_v49  ;;  %v1715_v21 = vadd.f32 %v1714_v46, %v1713_v0 }
 0x1de   : > { %1716 = vst.msk [vmem:[%s268_s25] sm:$0x1] %vm1613_vm6, %v1715_v21 }
 0x1df PF: > { %s17_s21 = sadd.s32 1, %s2293_s21  }
 0x1e0   : > { %p14_p4 = scmp.ge.s32.totalorder %s17_s21, 4  }
 0x1e2   :  { %16 = sbr.rel (!%p14_p4) target bundleno = 1 (0x1), region = 92 }

// kernel: preact_block_forward.5
= control target key start
LH: loop header
LB: loop body
LE: loop exit
PB: predicated region body
PF: predicated region fallthrough
CT: control target
= control target key end

     0   :  { %s2160_s18 = smov 0   ;;  %s2977_s0 = inlined_call_operand.vmem [shape: f32[2,16,16,4], index: 0, kind: input, shape index: {}]   ;;  %s2978_s1 = inlined_call_operand.vmem [shape: f32[2,16,16,4], index: 1, kind: input, shape index: {}]   ;;  %s2979_s2 = inlined_call_operand.vmem [shape: f32[1,4], index: 2, kind: input, shape index: {}]   ;;  %s2980_s3 = inlined_call_operand.vmem [shape: f32[1,4], index: 3, kind: input, shape index: {}]   ;;  %s2981_s4 = inlined_call_operand.vmem [shape: bf16[3,12,4], index: 4, kind: input, shape index: {}]   ;;  %s2982_s5 = inlined_call_operand.vmem [shape: f32[2,16,16,4], index: 5, kind: output, shape index: {}]  }
   0x1 LB: > { %s1651_s19 = sadd.s32 4294967295, %s2125_s18   ;;  %p1655_p0 = scmp.ge.s32.totalorder %s2125_s18, 1  ;;  %s2125_s18 = sphi %s2160_s18, %s15_s18  }
   0x2   : > { %p197_p1 = scmp.lt.s32.totalorder %s2125_s18, 3 }
   0x4   : > { %p198_p2 = pnand %p1655_p0, %p197_p1 }
   0x5   : > { %p230_p3 = scmp.lt.s32.totalorder (!%p198_p2), %s1651_s19, 1  ;;  %v2173_v0 = vld [vmem:[%s2979_s2] ss:$0 sm:$0xff] (!%p198_p2)  ;;  %vm947_vm0 = vcmask (!%p198_p2), 1045504   ;;  %v2983_v22 = vmov (!%p198_p2), 0   ;;  %vm517_vm1 = vcmask (!%p198_p2), 1046528  }
   0x6   : > { %201 = sbr.rel (%p198_p2) target bundleno = 460 (0x1cc), region = 40  ;;  %v2178_v1 = vld [vmem:[%s2981_s4] sm:$0x3f] (!%p198_p2)   ;;  %1809 = vmatprep.mubr.bf16.mxu0 (!%p198_p2), %v2983_v22  ;;  %s2128_s30 = smov (!%p198_p2), 4   ;;  %v2261_v54 = vld [vmem:[%s2981_s4 + $0x8] sm:$0x3f] (!%p198_p2)  }
   0x7   : > { %v2189_v2 = vld [vmem:[%s2980_s3] ss:$0 sm:$0xff] (!%p198_p2)  ;;  %1942 = vmatprep.subr.msk.bf16.mxu0 (!%p198_p2), %vm947_vm0, %v2178_v1  ;;  %v2198_v6 = vsel (!%p198_p2), %vm947_vm0, %v2178_v1, 0  ;;  %v2270_v59 = vld [vmem:[%s2981_s4 + $0x10] sm:$0x3f] (!%p198_p2)   ;;  %s2129_s10 = smov (!%p198_p2), 8   ;;  %1941 = vmatprep.subr.msk.bf16.mxu1 (!%p198_p2), %vm947_vm0, %v2261_v54 }
   0x8   : > { %1808 = vmatpush3.bf16.msra.mxu0 (!%p198_p2), %v2198_v6  ;;  %vm420_vm2 = vcmask (!%p198_p2), 1040384   ;;  %vm806_vm3 = vcmask (!%p198_p2), 31744   ;;  %vm839_vm4 = vcmask (!%p198_p2), 64512   ;;  %vm898_vm5 = vcmask (!%p198_p2), 97280  }
   0x9   : > { %1944 = vmatprep.subr.msk.bf16.mxu0 (!%p198_p2), %vm947_vm0, %v2270_v59 }
   0xd   : > { %s2986_s19 = smov (!%p230_p3, %s1651_s19), 1 }
   0xe   : > { %s2168_s20 = sshll.u32 %s2986_s19, 8 }
   0xf   : > { %s2184_s27 = scalar_lea.vmem %s2977_s0, %s2168_s20  ;;  %s2864_s13 = scalar_lea.vmem %s2978_s1, %s2168_s20 }
  0x10   : > { %v246_v3 = vld [vmem:[%s2184_s27] sm:$0xff]  ;;  %v247_v4 = vld [vmem:[%s2184_s27 + $0x8] sm:$0xff]  ;;  %v248_v5 = vld [vmem:[%s2184_s27 + $0x10] sm:$0xff]  ;;  %s2874_s16 = scalar_lea.vmem %s2982_s5, %s2168_s20 }
  0x11   : > { %v285_v7 = vmul.f32 %v2173_v0, %v246_v3  ;;  %v286_v8 = vmul.f32 %v2173_v0, %v247_v4  ;;  %v249_v9 = vld [vmem:[%s2184_s27 + $0x18] sm:$0xff]  ;;  %v287_v10 = vmul.f32 %v2173_v0, %v248_v5  ;;  %v250_v11 = vld [vmem:[%s2184_s27 + $0x20] sm:$0xff]  ;;  %v251_v12 = vld [vmem:[%s2184_s27 + $0x28] sm:$0xff] }
  0x12   : > { %v288_v13 = vmul.f32 %v2173_v0, %v249_v9  ;;  %v289_v14 = vmul.f32 %v2173_v0, %v250_v11  ;;  %v290_v15 = vmul.f32 %v2173_v0, %v251_v12  ;;  %v252_v16 = vld [vmem:[%s2184_s27 + $0x30] sm:$0xff]  ;;  %v253_v17 = vld [vmem:[%s2184_s27 + $0x38] sm:$0xff]  ;;  %v254_v45 = vld [vmem:[%s2184_s27 + $0x40] sm:$0xff] }
  0x13   : > { %v324_v18 = vadd.f32 %v2189_v2, %v285_v7  ;;  %v325_v19 = vadd.f32 %v2189_v2, %v286_v8  ;;  %v326_v20 = vadd.f32 %v2189_v2, %v287_v10  ;;  %v291_v21 = vmul.f32 %v2173_v0, %v252_v16  ;;  %v255_v46 = vld [vmem:[%s2184_s27 + $0x48] sm:$0xff]  ;;  %v256_v47 = vld [vmem:[%s2184_s27 + $0x50] sm:$0xff]  ;;  %v257_v52 = vld [vmem:[%s2184_s27 + $0x58] sm:$0xff] }
  0x14   : > { %v327_v23 = vadd.f32 %v2189_v2, %v288_v13  ;;  %v328_v24 = vadd.f32 %v2189_v2, %v289_v14  ;;  %v329_v25 = vadd.f32 %v2189_v2, %v290_v15  ;;  %v292_v26 = vmul.f32 %v2173_v0, %v253_v17  ;;  %v258_v53 = vld [vmem:[%s2184_s27 + $0x60] sm:$0xff]  ;;  %v259_v7 = vld [vmem:[%s2184_s27 + $0x68] sm:$0xff]  ;;  %v260_v9 = vld [vmem:[%s2184_s27 + $0x70] sm:$0xff] }
  0x15   : > { %v2221_v27 = vmax.f32 %v324_v18, 0.0  ;;  %v2223_v28 = vmax.f32 %v325_v19, 0.0  ;;  %v2225_v29 = vmax.f32 %v326_v20, 0.0  ;;  %v330_v30 = vadd.f32 %v2189_v2, %v291_v21  ;;  %v261_v14 = vld [vmem:[%s2184_s27 + $0x78] sm:$0xff] }
  0x16   : > { %v2228_v31 = vmax.f32 %v327_v23, 0.0  ;;  %v2230_v32 = vmax.f32 %v328_v24, 0.0  ;;  %v331_v33 = vadd.f32 %v2189_v2, %v292_v26  ;;  %v2237_v37 = vmax.f32 %v329_v25, 0.0 }
  0x17   : > { %v1956_v34 = vpack.i.bf16 %v2223_v28, %v2221_v27  ;;  %v518_v35 = vrot.slane %v2221_v27, 1  ;;  %v519_v36 = vrot.slane %v2223_v28, 1  ;;  %v521_v39 = vrot.slane %v2225_v29, 1 }
  0x18   : > { %v1961_v38 = vpack.i.bf16 %v2228_v31, %v2225_v29  ;;  %v522_v40 = vrot.slane %v2228_v31, 1  ;;  %v2246_v43 = vmax.f32 %v330_v30, 0.0  ;;  %v2248_v44 = vmax.f32 %v331_v33, 0.0 }
  0x19   : > { %1957 = vrot.lane.b32.xlu0 %v1956_v34, %s2128_s30  ;;  %v520_v41 = vsel %vm517_vm1, %v518_v35, %v519_v36  ;;  %v582_v42 = vsel %vm517_vm1, %v519_v36, 0.0  ;;  %v524_v51 = vrot.slane %v2230_v32, 1  ;;  %v1966_v56 = vpack.i.bf16 %v2237_v37, %v2230_v32  ;;  %v262_v36 = vld [vmem:[%s2184_s27 + $0x80] sm:$0xff] }
  0x1a   : > { %v1971_v48 = vpack.i.bf16 %v582_v42, %v520_v41  ;;  %v523_v49 = vsel %vm517_vm1, %v521_v39, %v522_v40  ;;  %v583_v50 = vsel %vm517_vm1, %v522_v40, 0.0  ;;  %v525_v57 = vrot.slane %v2237_v37, 1 }
  0x1b   : > { %v1976_v55 = vpack.i.bf16 %v583_v50, %v523_v49  ;;  %v527_v58 = vrot.slane %v2246_v43, 1  ;;  %v528_v60 = vrot.slane %v2248_v44, 1  ;;  %v293_v61 = vmul.f32 %v2173_v0, %v254_v45  ;;  %v264_v50 = vld [vmem:[%s2184_s27 + $0x90] sm:$0xff] }
  0x1c   : > { %1972 = vrot.lane.b32.xlu1 %v1971_v48, %s2129_s10  ;;  %v294_v62 = vmul.f32 %v2173_v0, %v255_v46  ;;  %v295_v63 = vmul.f32 %v2173_v0, %v256_v47  ;;  %v526_v3 = vsel %vm517_vm1, %v524_v51, %v525_v57  ;;  %v584_v4 = vsel %vm517_vm1, %v525_v57, 0.0  ;;  %v263_v48 = vld [vmem:[%s2184_s27 + $0x88] sm:$0xff]  ;;  %v265_v51 = vld [vmem:[%s2184_s27 + $0x98] sm:$0xff] }
  0x1d   : > { %1962 = vrot.lane.b32.xlu0 %v1961_v38, %s2128_s30  ;;  %v296_v5 = vmul.f32 %v2173_v0, %v257_v52  ;;  %v297_v8 = vmul.f32 %v2173_v0, %v258_v53  ;;  %v1981_v10 = vpack.i.bf16 %v2248_v44, %v2246_v43  ;;  %v1986_v11 = vpack.i.bf16 %v584_v4, %v526_v3 }
  0x1e   : > { %v529_v12 = vsel %vm517_vm1, %v527_v58, %v528_v60  ;;  %v332_v13 = vadd.f32 %v2189_v2, %v293_v61  ;;  %v585_v15 = vsel %vm517_vm1, %v528_v60, 0.0  ;;  %v333_v16 = vadd.f32 %v2189_v2, %v294_v62 }
  0x1f   : > { %v334_v17 = vadd.f32 %v2189_v2, %v295_v63  ;;  %v335_v18 = vadd.f32 %v2189_v2, %v296_v5  ;;  %v298_v20 = vmul.f32 %v2173_v0, %v259_v7  ;;  %v336_v21 = vadd.f32 %v2189_v2, %v297_v8  ;;  %v266_v8 = vld [vmem:[%s2184_s27 + $0xa0] sm:$0xff] }
  0x20   : > { %1977 = vrot.lane.b32.xlu1 %v1976_v55, %s2129_s10  ;;  %v2298_v19 = vmax.f32 %v332_v13, 0.0  ;;  %v299_v23 = vmul.f32 %v2173_v0, %v260_v9  ;;  %v2304_v24 = vmax.f32 %v333_v16, 0.0  ;;  %v300_v30 = vmul.f32 %v2173_v0, %v261_v14  ;;  %v269_v16 = vld [vmem:[%s2184_s27 + $0xb8] sm:$0xff] }
  0x21   : > { %1967 = vrot.lane.b32.xlu0 %v1966_v56, %s2128_s30  ;;  %v2306_v25 = vmax.f32 %v334_v17, 0.0  ;;  %v2308_v26 = vmax.f32 %v335_v18, 0.0  ;;  %v337_v34 = vadd.f32 %v2189_v2, %v298_v20  ;;  %v2317_v40 = vmax.f32 %v336_v21, 0.0 }
  0x22   : > { %v530_v33 = vrot.slane %v2298_v19, 1  ;;  %v338_v35 = vadd.f32 %v2189_v2, %v299_v23  ;;  %v531_v38 = vrot.slane %v2304_v24, 1  ;;  %v1996_v41 = vpack.i.bf16 %v585_v15, %v529_v12  ;;  %v268_v12 = vld [vmem:[%s2184_s27 + $0xb0] sm:$0xff] }
  0x23   : > { %v533_v39 = vrot.slane %v2306_v25, 1  ;;  %v534_v42 = vrot.slane %v2308_v26, 1  ;;  %v2321_v45 = vmax.f32 %v337_v34, 0.0  ;;  %v339_v46 = vadd.f32 %v2189_v2, %v300_v30 }
  0x24   : > { %1982 = vrot.lane.b32.xlu1 %v1981_v10, %s2128_s30  ;;  %v1991_v47 = vpack.i.bf16 %v2304_v24, %v2298_v19  ;;  %v301_v49 = vmul.f32 %v2173_v0, %v262_v36  ;;  %v2001_v52 = vpack.i.bf16 %v2308_v26, %v2306_v25  ;;  %v532_v53 = vsel %vm517_vm1, %v530_v33, %v531_v38 }
  0x25   : > { %1987 = vrot.lane.b32.xlu0 %v1986_v11, %s2129_s10  ;;  %v586_v55 = vsel %vm517_vm1, %v531_v38, 0.0  ;;  %v2335_v56 = vmax.f32 %v338_v35, 0.0  ;;  %v535_v57 = vsel %vm517_vm1, %v533_v39, %v534_v42  ;;  %v587_v58 = vsel %vm517_vm1, %v534_v42, 0.0  ;;  %v267_v11 = vld [vmem:[%s2184_s27 + $0xa8] sm:$0xff] }
  0x26   : > { %v2339_v60 = vmax.f32 %v339_v46, 0.0  ;;  %v536_v61 = vrot.slane %v2317_v40, 1  ;;  %v537_v62 = vrot.slane %v2321_v45, 1  ;;  %v302_v63 = vmul.f32 %v2173_v0, %v263_v48 }
  0x27   : > { %v303_v3 = vmul.f32 %v2173_v0, %v264_v50  ;;  %v304_v4 = vmul.f32 %v2173_v0, %v265_v51  ;;  %v2006_v5 = vpack.i.bf16 %v586_v55, %v532_v53  ;;  %v340_v7 = vadd.f32 %v2189_v2, %v301_v49  ;;  %v270_v49 = vld [vmem:[%s2184_s27 + $0xc0] sm:$0xff]  ;;  %v271_v50 = vld [vmem:[%s2184_s27 + $0xc8] sm:$0xff]  ;;  %v272_v55 = vld [vmem:[%s2184_s27 + $0xd0] sm:$0xff] }
  0x28   : > { %1997 = vrot.lane.b32.xlu1 %v1996_v41, %s2129_s10  ;;  %v341_v9 = vadd.f32 %v2189_v2, %v302_v63  ;;  %v2011_v13 = vpack.i.bf16 %v587_v58, %v535_v57  ;;  %v2016_v14 = vpack.i.bf16 %v2321_v45, %v2317_v40  ;;  %v538_v17 = vsel %vm517_vm1, %v536_v61, %v537_v62 }
  0x29   : > { %1992 = vrot.lane.b32.xlu0 %v1991_v47, %s2128_s30  ;;  %v342_v10 = vadd.f32 %v2189_v2, %v303_v3  ;;  %v343_v15 = vadd.f32 %v2189_v2, %v304_v4  ;;  %v539_v18 = vrot.slane %v2335_v56, 1  ;;  %v540_v20 = vrot.slane %v2339_v60, 1 }
  0x2a   : > { %v305_v21 = vmul.f32 %v2173_v0, %v266_v8  ;;  %v588_v23 = vsel %vm517_vm1, %v537_v62, 0.0  ;;  %v2365_v30 = vmax.f32 %v340_v7, 0.0  ;;  %v306_v33 = vmul.f32 %v2173_v0, %v267_v11 }
  0x2b   : > { %v307_v34 = vmul.f32 %v2173_v0, %v268_v12  ;;  %v2369_v35 = vmax.f32 %v341_v9, 0.0  ;;  %v2371_v36 = vmax.f32 %v342_v10, 0.0  ;;  %v2373_v38 = vmax.f32 %v343_v15, 0.0 }
  0x2c   : > { %2002 = vrot.lane.b32.xlu1 %v2001_v52, %s2128_s30  ;;  %v308_v39 = vmul.f32 %v2173_v0, %v269_v16  ;;  %v2021_v41 = vpack.i.bf16 %v2339_v60, %v2335_v56  ;;  %v541_v42 = vsel %vm517_vm1, %v539_v18, %v540_v20  ;;  %v589_v46 = vsel %vm517_vm1, %v540_v20, 0.0  ;;  %v274_v20 = vld [vmem:[%s2184_s27 + $0xe0] sm:$0xff] }
  0x2d   : > { %2007 = vrot.lane.b32.xlu0 %v2006_v5, %s2129_s10  ;;  %v344_v47 = vadd.f32 %v2189_v2, %v305_v21  ;;  %v345_v48 = vadd.f32 %v2189_v2, %v306_v33  ;;  %v2026_v51 = vpack.i.bf16 %v588_v23, %v538_v17  ;;  %v346_v52 = vadd.f32 %v2189_v2, %v307_v34  ;;  %v273_v5 = vld [vmem:[%s2184_s27 + $0xd8] sm:$0xff] }
  0x2e   : > { %v347_v53 = vadd.f32 %v2189_v2, %v308_v39  ;;  %v542_v57 = vrot.slane %v2365_v30, 1  ;;  %v543_v58 = vrot.slane %v2369_v35, 1  ;;  %v545_v61 = vrot.slane %v2371_v36, 1  ;;  %v275_v39 = vld [vmem:[%s2184_s27 + $0xe8] sm:$0xff] }
  0x2f   : > { %v546_v62 = vrot.slane %v2373_v38, 1  ;;  %v2031_v63 = vpack.i.bf16 %v589_v46, %v541_v42  ;;  %v309_v3 = vmul.f32 %v2173_v0, %v270_v49  ;;  %v310_v4 = vmul.f32 %v2173_v0, %v271_v50 }
  0x30   : > { %2012 = vrot.lane.b32.xlu1 %v2011_v13, %s2129_s10  ;;  %v2036_v7 = vpack.i.bf16 %v2369_v35, %v2365_v30  ;;  %v2399_v8 = vmax.f32 %v344_v47, 0.0  ;;  %v2401_v9 = vmax.f32 %v345_v48, 0.0  ;;  %v311_v10 = vmul.f32 %v2173_v0, %v272_v55 }
  0x31   : > { %2017 = vrot.lane.b32.xlu0 %v2016_v14, %s2128_s30  ;;  %v2405_v11 = vmax.f32 %v346_v52, 0.0  ;;  %v2407_v12 = vmax.f32 %v347_v53, 0.0  ;;  %v348_v13 = vadd.f32 %v2189_v2, %v309_v3  ;;  %v349_v14 = vadd.f32 %v2189_v2, %v310_v4  ;;  %v276_v52 = vld [vmem:[%s2184_s27 + $0xf0] sm:$0xff]  ;;  %v277_v3 = vld [vmem:[%s2184_s27 + $0xf8] sm:$0xff] }
  0x32   : > { %v544_v15 = vsel %vm517_vm1, %v542_v57, %v543_v58  ;;  %v590_v16 = vsel %vm517_vm1, %v543_v58, 0.0  ;;  %v547_v17 = vsel %vm517_vm1, %v545_v61, %v546_v62  ;;  %v312_v18 = vmul.f32 %v2173_v0, %v273_v5 }
  0x33   : > { %v591_v21 = vsel %vm517_vm1, %v546_v62, 0.0  ;;  %v2417_v23 = vmax.f32 %v348_v13, 0.0  ;;  %v2419_v33 = vmax.f32 %v349_v14, 0.0  ;;  %v350_v34 = vadd.f32 %v2189_v2, %v311_v10 }
  0x34   : > { %2022 = vrot.lane.b32.xlu1 %v2021_v41, %s2128_s30  ;;  %v2041_v41 = vpack.i.bf16 %v2373_v38, %v2371_v36  ;;  %v548_v42 = vrot.slane %v2399_v8, 1  ;;  %v549_v46 = vrot.slane %v2401_v9, 1  ;;  %v351_v47 = vadd.f32 %v2189_v2, %v312_v18 }
  0x35   : > { %2027 = vrot.lane.b32.xlu0 %v2026_v51, %s2129_s10  ;;  %v2046_v48 = vpack.i.bf16 %v590_v16, %v544_v15  ;;  %v551_v49 = vrot.slane %v2405_v11, 1  ;;  %v552_v50 = vrot.slane %v2407_v12, 1  ;;  %v313_v51 = vmul.f32 %v2173_v0, %v274_v20 }
  0x36   : > { %v422_v53 = vrot.slane %v2223_v28, 7  ;;  %v2051_v55 = vpack.i.bf16 %v591_v21, %v547_v17  ;;  %v314_v57 = vmul.f32 %v2173_v0, %v275_v39  ;;  %v2436_v58 = vmax.f32 %v350_v34, 0.0 }
  0x37   : > { %v2438_v61 = vmax.f32 %v351_v47, 0.0  ;;  %v554_v62 = vrot.slane %v2417_v23, 1  ;;  %v2056_v4 = vpack.i.bf16 %v2401_v9, %v2399_v8  ;;  %v2061_v28 = vpack.i.bf16 %v2407_v12, %v2405_v11 }
  0x38   : > { %2032 = vrot.lane.b32.xlu1 %v2031_v63, %s2129_s10  ;;  %v555_v63 = vrot.slane %v2419_v33, 1  ;;  %v550_v5 = vsel %vm517_vm1, %v548_v42, %v549_v46  ;;  %v592_v10 = vsel %vm517_vm1, %v549_v46, 0.0  ;;  %v553_v13 = vsel %vm517_vm1, %v551_v49, %v552_v50 }
  0x39   : > { %2037 = vrot.lane.b32.xlu0 %v2036_v7, %s2128_s30  ;;  %v315_v7 = vmul.f32 %v2173_v0, %v276_v52  ;;  %v352_v14 = vadd.f32 %v2189_v2, %v313_v51  ;;  %v424_v15 = vrot.slane %v2225_v29, 7  ;;  %v593_v16 = vsel %vm517_vm1, %v552_v50, 0.0 }
  0x3a   : > { %v353_v17 = vadd.f32 %v2189_v2, %v314_v57  ;;  %v316_v18 = vmul.f32 %v2173_v0, %v277_v3  ;;  %v425_v20 = vrot.slane %v2228_v31, 7  ;;  %v2460_v21 = vsel %vm517_vm1, %v554_v62, %v555_v63 }
  0x3b   : > { %v2463_v34 = vsel %vm517_vm1, %v555_v63, 0.0  ;;  %v557_v39 = vrot.slane %v2436_v58, 1  ;;  %v2066_v42 = vpack.i.bf16 %v592_v10, %v550_v5  ;;  %v354_v46 = vadd.f32 %v2189_v2, %v315_v7 }
  0x3c   : > { %2042 = vrot.lane.b32.xlu1 %v2041_v41, %s2128_s30  ;;  %v558_v41 = vrot.slane %v2438_v61, 1  ;;  %v2472_v0 = vsel %vm420_vm2, %v424_v15, %v425_v20  ;;  %v427_v31 = vrot.slane %v2230_v32, 7  ;;  %v2071_v47 = vpack.i.bf16 %v593_v16, %v553_v13 }
  0x3d   : > { %2047 = vrot.lane.b32.xlu0 %v2046_v48, %s2129_s10  ;;  %v2076_v48 = vpack.i.bf16 %v2419_v33, %v2417_v23  ;;  %v2081_v49 = vpack.i.bf16 %v2438_v61, %v2436_v58  ;;  %v2480_v50 = vmax.f32 %v352_v14, 0.0  ;;  %v2086_v51 = vpack.i.bf16 %v2463_v34, %v2460_v21 }
  0x3e   : > { %v2484_v52 = vmax.f32 %v353_v17, 0.0  ;;  %v949_v57 = vsel %vm947_vm0, %v2261_v54, 0  ;;  %v559_v62 = vsel %vm517_vm1, %v557_v39, %v558_v41  ;;  %v595_v63 = vsel %vm517_vm1, %v558_v41, 0.0 }
  0x3f   : > { %v355_v3 = vadd.f32 %v2189_v2, %v316_v18  ;;  %1774 = vmatpush3.bf16.msra.mxu1 %v949_v57  ;;  %v2494_v5 = vmax.f32 %v354_v46, 0.0  ;;  %v430_v54 = vrot.slane %v2246_v43, 7  ;;  %v431_v7 = vrot.slane %v2248_v44, 7 }
  0x40   : > { %2052 = vrot.lane.b32.xlu1 %v2051_v55, %s2129_s10  ;;  %v428_v55 = vrot.slane %v2237_v37, 7  ;;  %1943 = vmatprep.subr.msk.bf16.mxu1 %vm947_vm0, %v2178_v1  ;;  %v560_v2 = vrot.slane %v2480_v50, 1  ;;  %v2514_v10 = vsel %vm947_vm0, %v2270_v59, 0  ;;  %v433_v13 = vrot.slane %v2298_v19, 7 }
  0x41   : > { %2057 = vrot.lane.b32.xlu0 %v2056_v4, %s2128_s30  ;;  %v421_v4 = vrot.slane %v2221_v27, 7  ;;  %v2091_v14 = vpack.i.bf16 %v595_v63, %v559_v62  ;;  %v2520_v1 = vsel %vm420_vm2, %v430_v54, %v431_v7  ;;  %v434_v44 = vrot.slane %v2304_v24, 7 }
  0x42   : > { %v2499_v37 = vsel %vm420_vm2, %v427_v31, %v428_v55  ;;  %v436_v16 = vrot.slane %v2306_v25, 7  ;;  %v561_v17 = vrot.slane %v2484_v52, 1  ;;  %v439_v18 = vrot.slane %v2317_v40, 7 }
  0x43   : > { %v440_v59 = vrot.slane %v2321_v45, 7  ;;  %v2096_v20 = vpack.i.bf16 %v2484_v52, %v2480_v50  ;;  %v2534_v21 = vsel %vm420_vm2, %v433_v13, %v434_v44  ;;  %v442_v24 = vrot.slane %v2335_v56, 7 }
  0x44   : > { %2062 = vrot.lane.b32.xlu1 %v2061_v28, %s2128_s30  ;;  %v2510_v28 = vsel %vm420_vm2, %v421_v4, %v422_v53  ;;  %v437_v53 = vrot.slane %v2308_v26, 7  ;;  %v443_v34 = vrot.slane %v2339_v60, 7  ;;  %v387_v26 = vmax.f32 %v355_v3, 0.0 }
  0x45   : > { %2067 = vrot.lane.b32.xlu0 %v2066_v42, %s2129_s10  ;;  %v2547_v39 = vsel %vm420_vm2, %v439_v18, %v440_v59  ;;  %v445_v41 = vrot.slane %v2365_v30, 7  ;;  %v563_v42 = vrot.slane %v2494_v5, 1  ;;  %v446_v46 = vrot.slane %v2369_v35, 7 }
  0x46   : > { %v2542_v45 = vsel %vm420_vm2, %v436_v16, %v437_v53  ;;  %v2554_v60 = vsel %vm420_vm2, %v442_v24, %v443_v34  ;;  %v449_v55 = vrot.slane %v2373_v38, 7  ;;  %v451_v57 = vrot.slane %v2399_v8, 7 }
  0x47   : > { %v452_v62 = vrot.slane %v2401_v9, 7  ;;  %v596_v63 = vsel %vm517_vm1, %v561_v17, 0.0  ;;  %v2567_v3 = vsel %vm420_vm2, %v445_v41, %v446_v46  ;;  %v454_v35 = vrot.slane %v2405_v11, 7 }
  0x48   : > { %2072 = vrot.lane.b32.xlu1 %v2071_v47, %s2129_s10  ;;  %v448_v47 = vrot.slane %v2371_v36, 7  ;;  %v455_v7 = vrot.slane %v2407_v12, 7  ;;  %v564_v38 = vrot.slane %v387_v26, 1  ;;  %v458_v12 = vrot.slane %v2419_v33, 7 }
  0x49   : > { %2077 = vrot.lane.b32.xlu0 %v2076_v48, %s2128_s30  ;;  %v562_v48 = vsel %vm517_vm1, %v560_v2, %v561_v17  ;;  %v457_v2 = vrot.slane %v2417_v23, 7  ;;  %v2101_v17 = vpack.i.bf16 %v387_v26, %v2494_v5  ;;  %v461_v53 = vrot.slane %v2438_v61, 7 }
  0x4a   : > { %v2575_v9 = vsel %vm420_vm2, %v448_v47, %v449_v55  ;;  %v2586_v44 = vsel %vm420_vm2, %v454_v35, %v455_v7  ;;  %v463_v59 = vrot.slane %v2480_v50, 7  ;;  %v464_v34 = vrot.slane %v2484_v52, 7 }
  0x4b   : > { %v2106_v46 = vpack.i.bf16 %v596_v63, %v562_v48  ;;  %v2598_v55 = vsel %vm420_vm2, %v457_v2, %v458_v12  ;;  %v466_v33 = vrot.slane %v2494_v5, 7  ;;  %v565_v7 = vsel %vm517_vm1, %v563_v42, %v564_v38 }
  0x4c   : > { %2082 = vrot.lane.b32.xlu1 %v2081_v49, %s2128_s30  ;;  %v2580_v49 = vsel %vm420_vm2, %v451_v57, %v452_v62  ;;  %v467_v62 = vrot.slane %v387_v26, 7  ;;  %v597_v61 = vsel %vm517_vm1, %v564_v38, 0.0  ;;  %v501_v48 = vsel %vm420_vm2, 0.0, %v421_v4 }
  0x4d   : > { %2087 = vrot.lane.b32.xlu0 %v2086_v51, %s2129_s10  ;;  %v460_v51 = vrot.slane %v2436_v58, 7 }
  0x4e   : > { %v2617_v26 = vsel %vm420_vm2, %v466_v33, %v467_v62 }
  0x4f   : > { %v2607_v52 = vsel %vm420_vm2, %v460_v51, %v461_v53 }
  0x50   : > { %2092 = vrot.lane.b32.xlu1 %v2091_v14, %s2129_s10  ;;  %v2612_v14 = vsel %vm420_vm2, %v463_v59, %v464_v34 }
  0x51   : > { %2097 = vrot.lane.b32.xlu0 %v2096_v20, %s2128_s30  ;;  %v2111_v20 = vpack.i.bf16 %v597_v61, %v565_v7 }
  0x54   : > { %2102 = vrot.lane.b32.xlu1 %v2101_v17, %s2128_s30 }
  0x55   : > { %2107 = vrot.lane.b32.xlu0 %v2106_v46, %s2129_s10  ;;  %v502_v46 = vsel %vm420_vm2, 0.0, %v424_v15  ;;  %v503_v15 = vsel %vm420_vm2, 0.0, %v427_v31 }
  0x58   : > { %2112 = vrot.lane.b32.xlu1 %v2111_v20, %s2129_s10 }
  0x8b   : > { %v1958_v42 = vpop.permute.xlu0 %1957 }
  0x8c   : > { %v1960_v63 = vunpack.i.h.bf16 %v1958_v42  ;;  %v1959_v38 = vunpack.i.l.bf16 %v1958_v42 }
  0x8e   : > { %v1973_v12 = vpop.permute.xlu1 %1972  ;;  %v807_v53 = vsel %vm806_vm3, %v501_v48, %v1959_v38  ;;  %v808_v17 = vsel %vm806_vm3, %v2510_v28, %v1960_v63 }
  0x8f   : > { %v1975_v34 = vunpack.i.h.bf16 %v1973_v12  ;;  %v1974_v62 = vunpack.i.l.bf16 %v1973_v12  ;;  %v1963_v7 = vpop.permute.xlu0 %1962 }
  0x90   : > { %v1965_v61 = vunpack.i.h.bf16 %v1963_v7  ;;  %v1964_v27 = vunpack.i.l.bf16 %v1963_v7 }
  0x91   : > { %v840_v4 = vsel %vm839_vm4, %v807_v53, %v1974_v62  ;;  %v841_v20 = vsel %vm839_vm4, %v808_v17, %v1975_v34 }
  0x92   : > { %v810_v42 = vsel %vm806_vm3, %v2472_v0, %v1965_v61  ;;  %v809_v48 = vsel %vm806_vm3, %v502_v46, %v1964_v27  ;;  %v1978_v28 = vpop.permute.xlu1 %1977  ;;  %v872_v63 = vpack.c.bf16 %v841_v20, %v840_v4 }
  0x93   : > { %v1980_v38 = vunpack.i.h.bf16 %v1978_v28  ;;  %v1979_v12 = vunpack.i.l.bf16 %v1978_v28  ;;  %v1968_v29 = vpop.permute.xlu0 %1967 }
  0x94   : > { %v1970_v7 = vunpack.i.h.bf16 %v1968_v29  ;;  %v1969_v22 = vunpack.i.l.bf16 %v1968_v29  ;;  %1775 = vmatprep.mubr.msk.bf16.mxu1 %vm898_vm5, %v872_v63  ;;  %1810 = vmatmul.mubr.msk.bf16.vlgmr.msra.gmra.mrb[0].mxu0 %vm898_vm5, %v872_v63  ;;  %v505_v63 = vsel %vm420_vm2, 0.0, %v433_v13 }
  0x95   : > { %v843_v53 = vsel %vm839_vm4, %v810_v42, %v1980_v38  ;;  %v842_v0 = vsel %vm839_vm4, %v809_v48, %v1979_v12  ;;  %1842 = vmatpush3.bf16.msra.mxu0 %v2514_v10  ;;  %v504_v10 = vsel %vm420_vm2, 0.0, %v430_v54 }
  0x96   : > { %v2644_v17 = vpack.c.bf16 %v843_v53, %v842_v0  ;;  %v1983_v34 = vpop.permute.xlu1 %1982  ;;  %v812_v32 = vsel %vm806_vm3, %v2499_v37, %v1970_v7  ;;  %v811_v31 = vsel %vm806_vm3, %v503_v15, %v1969_v22 }
  0x97   : > { %v1988_v62 = vpop.permute.xlu0 %1987  ;;  %v1985_v46 = vunpack.i.h.bf16 %v1983_v34  ;;  %v1984_v61 = vunpack.i.l.bf16 %v1983_v34 }
  0x98   : > { %v1990_v27 = vunpack.i.h.bf16 %v1988_v62  ;;  %v1989_v4 = vunpack.i.l.bf16 %v1988_v62  ;;  %1776 = vmatmul.mubr.msk.bf16.vlgmr.msra.gmra.mrb[0].mxu1 %vm898_vm5, %v2644_v17  ;;  %1813 = vmatprep.mubr.msk.bf16.mxu0 %vm898_vm5, %v2644_v17  ;;  %v506_v62 = vsel %vm420_vm2, 0.0, %v436_v16 }
  0x99   : > { %1876 = vmatpush3.bf16.msra.mxu1 %v2198_v6  ;;  %v814_v43 = vsel %vm806_vm3, %v2520_v1, %v1985_v46  ;;  %v813_v54 = vsel %vm806_vm3, %v504_v10, %v1984_v61 }
  0x9a   : > { %v844_v37 = vsel %vm839_vm4, %v811_v31, %v1989_v4  ;;  %v845_v22 = vsel %vm839_vm4, %v812_v32, %v1990_v27  ;;  %v1998_v20 = vpop.permute.xlu1 %1997 }
  0x9b   : > { %v2659_v42 = vpack.c.bf16 %v845_v22, %v844_v37  ;;  %v2000_v48 = vunpack.i.h.bf16 %v1998_v20  ;;  %v1999_v28 = vunpack.i.l.bf16 %v1998_v20  ;;  %v1993_v38 = vpop.permute.xlu0 %1992  ;;  %v507_v37 = vsel %vm420_vm2, 0.0, %v439_v18 }
  0x9c   : > { %v1995_v6 = vunpack.i.h.bf16 %v1993_v38  ;;  %v1994_v12 = vunpack.i.l.bf16 %v1993_v38 }
  0x9d   : > { %v846_v29 = vsel %vm839_vm4, %v813_v54, %v1999_v28  ;;  %v847_v15 = vsel %vm839_vm4, %v814_v43, %v2000_v48  ;;  %1779 = vmatprep.mubr.msk.bf16.mxu1 %vm898_vm5, %v2659_v42  ;;  %1814 = vmatmul.mubr.msk.bf16.gmra.mrb[4].mxu0 %vm898_vm5, %v2659_v42 }
  0x9e   : > { %v2673_v19 = vpack.c.bf16 %v847_v15, %v846_v29  ;;  %v2003_v13 = vpop.permute.xlu1 %2002  ;;  %v816_v1 = vsel %vm806_vm3, %v2534_v21, %v1995_v6  ;;  %v815_v7 = vsel %vm806_vm3, %v505_v63, %v1994_v12  ;;  %v508_v15 = vsel %vm420_vm2, 0.0, %v442_v24 }
  0x9f   : > { %v2008_v53 = vpop.permute.xlu0 %2007  ;;  %v2005_v0 = vunpack.i.h.bf16 %v2003_v13  ;;  %v2004_v34 = vunpack.i.l.bf16 %v2003_v13 }
  0xa0   : > { %v2010_v32 = vunpack.i.h.bf16 %v2008_v53  ;;  %v2009_v31 = vunpack.i.l.bf16 %v2008_v53  ;;  %1780 = vmatmul.mubr.msk.bf16.gmra.mrb[4].mxu1 %vm898_vm5, %v2673_v19  ;;  %1817 = vmatprep.mubr.msk.bf16.mxu0 %vm898_vm5, %v2673_v19 }
  0xa1   : > { %v818_v20 = vsel %vm806_vm3, %v2542_v45, %v2005_v0  ;;  %v817_v25 = vsel %vm806_vm3, %v506_v62, %v2004_v34  ;;  %v509_v34 = vsel %vm420_vm2, 0.0, %v445_v41 }
  0xa2   : > { %v848_v46 = vsel %vm839_vm4, %v815_v7, %v2009_v31  ;;  %v849_v21 = vsel %vm839_vm4, %v816_v1, %v2010_v32  ;;  %v2013_v61 = vpop.permute.xlu1 %2012 }
  0xa3   : > { %v2687_v27 = vpack.c.bf16 %v849_v21, %v848_v46  ;;  %v2015_v4 = vunpack.i.h.bf16 %v2013_v61  ;;  %v2014_v10 = vunpack.i.l.bf16 %v2013_v61  ;;  %v2018_v22 = vpop.permute.xlu0 %2017 }
  0xa4   : > { %v2020_v16 = vunpack.i.h.bf16 %v2018_v22  ;;  %v2019_v48 = vunpack.i.l.bf16 %v2018_v22 }
  0xa5   : > { %v850_v28 = vsel %vm839_vm4, %v817_v25, %v2014_v10  ;;  %v851_v63 = vsel %vm839_vm4, %v818_v20, %v2015_v4  ;;  %1783 = vmatprep.mubr.msk.bf16.mxu1 %vm898_vm5, %v2687_v27  ;;  %1818 = vmatmul.mubr.msk.bf16.gmra.mrb[8].mxu0 %vm898_vm5, %v2687_v27  ;;  %v510_v25 = vsel %vm420_vm2, 0.0, %v448_v47 }
  0xa6   : > { %v2701_v40 = vpack.c.bf16 %v851_v63, %v850_v28  ;;  %v2023_v18 = vpop.permute.xlu1 %2022  ;;  %v820_v45 = vsel %vm806_vm3, %v2547_v39, %v2020_v16  ;;  %v819_v38 = vsel %vm806_vm3, %v507_v37, %v2019_v48 }
  0xa7   : > { %v2028_v43 = vpop.permute.xlu0 %2027  ;;  %v2025_v54 = vunpack.i.h.bf16 %v2023_v18  ;;  %v2024_v6 = vunpack.i.l.bf16 %v2023_v18  ;;  %v511_v18 = vsel %vm420_vm2, 0.0, %v451_v57 }
  0xa8   : > { %v2030_v12 = vunpack.i.h.bf16 %v2028_v43  ;;  %v2029_v29 = vunpack.i.l.bf16 %v2028_v43  ;;  %1784 = vmatmul.mubr.msk.bf16.gmra.mrb[8].mxu1 %vm898_vm5, %v2701_v40  ;;  %1821 = vmatprep.mubr.msk.bf16.mxu0 %vm898_vm5, %v2701_v40 }
  0xa9   : > { %v822_v31 = vsel %vm806_vm3, %v2554_v60, %v2025_v54  ;;  %v821_v56 = vsel %vm806_vm3, %v508_v15, %v2024_v6 }
  0xaa   : > { %v852_v13 = vsel %vm839_vm4, %v819_v38, %v2029_v29  ;;  %v853_v39 = vsel %vm839_vm4, %v820_v45, %v2030_v12  ;;  %v2033_v1 = vpop.permute.xlu1 %2032 }
  0xab   : > { %v2715_v7 = vpack.c.bf16 %v853_v39, %v852_v13  ;;  %v2035_v53 = vunpack.i.h.bf16 %v2033_v1  ;;  %v2034_v0 = vunpack.i.l.bf16 %v2033_v1  ;;  %v2038_v32 = vpop.permute.xlu0 %2037 }
  0xac   : > { %v2040_v24 = vunpack.i.h.bf16 %v2038_v32  ;;  %v2039_v62 = vunpack.i.l.bf16 %v2038_v32 }
  0xad   : > { %v854_v46 = vsel %vm839_vm4, %v821_v56, %v2034_v0  ;;  %v855_v21 = vsel %vm839_vm4, %v822_v31, %v2035_v53  ;;  %1787 = vmatprep.mubr.msk.bf16.mxu1 %vm898_vm5, %v2715_v7  ;;  %1822 = vmatmul.mubr.msk.bf16.gmra.mrb[12].mxu0 %vm898_vm5, %v2715_v7  ;;  %v513_v31 = vsel %vm420_vm2, 0.0, %v457_v2 }
  0xae   : > { %v2729_v30 = vpack.c.bf16 %v855_v21, %v854_v46  ;;  %v2043_v41 = vpop.permute.xlu1 %2042  ;;  %1843 = vmatprep.mubr.msk.bf16.mxu0 %vm898_vm5, %v2644_v17  ;;  %v824_v60 = vsel %vm806_vm3, %v2567_v3, %v2040_v24  ;;  %v823_v61 = vsel %vm806_vm3, %v509_v34, %v2039_v62 }
  0xaf   : > { %v2048_v4 = vpop.permute.xlu0 %2047  ;;  %v2045_v10 = vunpack.i.h.bf16 %v2043_v41  ;;  %v2044_v37 = vunpack.i.l.bf16 %v2043_v41 }
  0xb0   : > { %v2050_v22 = vunpack.i.h.bf16 %v2048_v4  ;;  %v2049_v20 = vunpack.i.l.bf16 %v2048_v4  ;;  %1788 = vmatmul.mubr.msk.bf16.gmra.mrb[12].mxu1 %vm898_vm5, %v2729_v30 }
  0xb1   : > { %v826_v38 = vsel %vm806_vm3, %v2575_v9, %v2045_v10  ;;  %v825_v36 = vsel %vm806_vm3, %v510_v25, %v2044_v37 }
  0xb2   : > { %v856_v16 = vsel %vm839_vm4, %v823_v61, %v2049_v20  ;;  %v857_v17 = vsel %vm839_vm4, %v824_v60, %v2050_v22  ;;  %v2053_v48 = vpop.permute.xlu1 %2052 }
  0xb3   : > { %v2743_v3 = vpack.c.bf16 %v857_v17, %v856_v16  ;;  %v2055_v28 = vunpack.i.h.bf16 %v2053_v48  ;;  %v2054_v63 = vunpack.i.l.bf16 %v2053_v48  ;;  %v2058_v45 = vpop.permute.xlu0 %2057  ;;  %v515_v17 = vsel %vm420_vm2, 0.0, %v463_v59 }
  0xb4   : > { %v2060_v47 = vunpack.i.h.bf16 %v2058_v45  ;;  %v2059_v43 = vunpack.i.l.bf16 %v2058_v45 }
  0xb5   : > { %v858_v54 = vsel %vm839_vm4, %v825_v36, %v2054_v63  ;;  %v859_v6 = vsel %vm839_vm4, %v826_v38, %v2055_v28  ;;  %1791 = vmatprep.mubr.msk.bf16.mxu1 %vm898_vm5, %v2743_v3  ;;  %1844 = vmatmul.mubr.msk.bf16.vlgmr.msra.gmra.mrb[0].mxu0 %vm898_vm5, %v2659_v42  ;;  %v512_v42 = vsel %vm420_vm2, 0.0, %v454_v35 }
  0xb6   : > { %v2757_v8 = vpack.c.bf16 %v859_v6, %v858_v54  ;;  %v2063_v57 = vpop.permute.xlu1 %2062  ;;  %1847 = vmatprep.mubr.msk.bf16.mxu0 %vm898_vm5, %v2673_v19  ;;  %v828_v9 = vsel %vm806_vm3, %v2580_v49, %v2060_v47  ;;  %v827_v12 = vsel %vm806_vm3, %v511_v18, %v2059_v43 }
  0xb7   : > { %v2068_v29 = vpop.permute.xlu0 %2067  ;;  %v2065_v15 = vunpack.i.h.bf16 %v2063_v57  ;;  %v2064_v13 = vunpack.i.l.bf16 %v2063_v57 }
  0xb8   : > { %v2070_v39 = vunpack.i.h.bf16 %v2068_v29  ;;  %v2069_v1 = vunpack.i.l.bf16 %v2068_v29  ;;  %1792 = vmatmul.mubr.msk.bf16.gmra.mrb[16].mxu1 %vm898_vm5, %v2757_v8 }
  0xb9   : > { %v830_v24 = vsel %vm806_vm3, %v2586_v44, %v2065_v15  ;;  %v829_v11 = vsel %vm806_vm3, %v512_v42, %v2064_v13 }
  0xba   : > { %v860_v53 = vsel %vm839_vm4, %v827_v12, %v2069_v1  ;;  %v861_v19 = vsel %vm839_vm4, %v828_v9, %v2070_v39  ;;  %v2073_v0 = vpop.permute.xlu1 %2072 }
  0xbb   : > { %v2771_v49 = vpack.c.bf16 %v861_v19, %v860_v53  ;;  %v2075_v34 = vunpack.i.h.bf16 %v2073_v0  ;;  %v2074_v32 = vunpack.i.l.bf16 %v2073_v0  ;;  %v2078_v56 = vpop.permute.xlu0 %2077 }
  0xbc   : > { %v2080_v35 = vunpack.i.h.bf16 %v2078_v56  ;;  %v2079_v62 = vunpack.i.l.bf16 %v2078_v56 }
  0xbd   : > { %v862_v46 = vsel %vm839_vm4, %v829_v11, %v2074_v32  ;;  %v863_v21 = vsel %vm839_vm4, %v830_v24, %v2075_v34  ;;  %1795 = vmatprep.mubr.msk.bf16.mxu1 %vm898_vm5, %v2771_v49  ;;  %1848 = vmatmul.mubr.msk.bf16.gmra.mrb[4].mxu0 %vm898_vm5, %v2687_v27  ;;  %v514_v27 = vsel %vm420_vm2, 0.0, %v460_v51 }
  0xbe   : > { %v2785_v23 = vpack.c.bf16 %v863_v21, %v862_v46  ;;  %v2083_v2 = vpop.permute.xlu1 %2082  ;;  %1851 = vmatprep.mubr.msk.bf16.mxu0 %vm898_vm5, %v2701_v40  ;;  %v832_v44 = vsel %vm806_vm3, %v2598_v55, %v2080_v35  ;;  %v831_v41 = vsel %vm806_vm3, %v513_v31, %v2079_v62  ;;  %v1490_v21 = vld [vmem:[%s2864_s13 + $0x10] sm:$0xff] }
  0xbf   : > { %v2088_v60 = vpop.permute.xlu0 %2087  ;;  %v2085_v61 = vunpack.i.h.bf16 %v2083_v2  ;;  %v2084_v4 = vunpack.i.l.bf16 %v2083_v2 }
  0xc0   : > { %v2090_v10 = vunpack.i.h.bf16 %v2088_v60  ;;  %v2089_v37 = vunpack.i.l.bf16 %v2088_v60  ;;  %1796 = vmatmul.mubr.msk.bf16.gmra.mrb[20].mxu1 %vm898_vm5, %v2785_v23 }
  0xc1   : > { %v834_v28 = vsel %vm806_vm3, %v2607_v52, %v2085_v61  ;;  %v833_v58 = vsel %vm806_vm3, %v514_v27, %v2084_v4  ;;  %v1491_v61 = vld [vmem:[%s2864_s13 + $0x18] sm:$0xff]  ;;  %v1489_v27 = vld [vmem:[%s2864_s13 + $0x8] sm:$0xff] }
  0xc2   : > { %v864_v22 = vsel %vm839_vm4, %v831_v41, %v2089_v37  ;;  %v865_v40 = vsel %vm839_vm4, %v832_v44, %v2090_v10  ;;  %v2093_v20 = vpop.permute.xlu1 %2092  ;;  %v1488_v44 = vld [vmem:[%s2864_s13] sm:$0xff] }
  0xc3   : > { %v884_v55 = vpack.c.bf16 %v865_v40, %v864_v22  ;;  %v2095_v25 = vunpack.i.h.bf16 %v2093_v20  ;;  %v2094_v16 = vunpack.i.l.bf16 %v2093_v20  ;;  %v2098_v48 = vpop.permute.xlu0 %2097 }
  0xc4   : > { %v2100_v63 = vunpack.i.h.bf16 %v2098_v48  ;;  %v2099_v51 = vunpack.i.l.bf16 %v2098_v48 }
  0xc5   : > { %v866_v18 = vsel %vm839_vm4, %v833_v58, %v2094_v16  ;;  %v867_v45 = vsel %vm839_vm4, %v834_v28, %v2095_v25  ;;  %1799 = vmatprep.mubr.msk.bf16.mxu1 %vm898_vm5, %v884_v55  ;;  %1852 = vmatmul.mubr.msk.bf16.gmra.mrb[8].mxu0 %vm898_vm5, %v2715_v7  ;;  %v516_v7 = vsel %vm420_vm2, 0.0, %v466_v33  ;;  %v2984_v33 = vmov 0   ;;  %v1494_v16 = vld [vmem:[%s2864_s13 + $0x30] sm:$0xff]  ;;  %v1492_v28 = vld [vmem:[%s2864_s13 + $0x20] sm:$0xff] }
  0xc6   : > { %v885_v50 = vpack.c.bf16 %v867_v45, %v866_v18  ;;  %v2103_v38 = vpop.permute.xlu1 %2102  ;;  %1855 = vmatprep.mubr.msk.bf16.mxu0 %vm898_vm5, %v2729_v30  ;;  %v836_v59 = vsel %vm806_vm3, %v2612_v14, %v2100_v63  ;;  %v835_v52 = vsel %vm806_vm3, %v515_v17, %v2099_v51  ;;  %v1495_v51 = vld [vmem:[%s2864_s13 + $0x38] sm:$0xff] }
  0xc7   : > { %v2108_v36 = vpop.permute.xlu0 %2107  ;;  %v2105_v47 = vunpack.i.h.bf16 %v2103_v38  ;;  %v2104_v43 = vunpack.i.l.bf16 %v2103_v38  ;;  %v1493_v38 = vld [vmem:[%s2864_s13 + $0x28] sm:$0xff] }
  0xc8   : > { %v2110_v54 = vunpack.i.h.bf16 %v2108_v36  ;;  %v2109_v6 = vunpack.i.l.bf16 %v2108_v36  ;;  %1800 = vmatmul.mubr.msk.bf16.gmra.mrb[24].mxu1 %vm898_vm5, %v885_v50 }
  0xc9   : > { %v838_v13 = vsel %vm806_vm3, %v2617_v26, %v2105_v47  ;;  %v837_v39 = vsel %vm806_vm3, %v516_v7, %v2104_v43 }
  0xca   : > { %v868_v57 = vsel %vm839_vm4, %v835_v52, %v2109_v6  ;;  %v869_v9 = vsel %vm839_vm4, %v836_v59, %v2110_v54  ;;  %v2113_v12 = vpop.permute.xlu1 %2112  ;;  %v1498_v54 = vld [vmem:[%s2864_s13 + $0x50] sm:$0xff] }
  0xcb   : > { %v886_v29 = vpack.c.bf16 %v869_v9, %v868_v57  ;;  %v2115_v14 = vunpack.i.h.bf16 %v2113_v12  ;;  %v2114_v15 = vunpack.i.l.bf16 %v2113_v12  ;;  %v1496_v57 = vld [vmem:[%s2864_s13 + $0x40] sm:$0xff] }
  0xcd   : > { %v870_v1 = vsel %vm839_vm4, %v837_v39, %v2114_v15  ;;  %v871_v42 = vsel %vm839_vm4, %v838_v13, %v2115_v14  ;;  %1803 = vmatprep.mubr.msk.bf16.mxu1 %vm898_vm5, %v886_v29  ;;  %1856 = vmatmul.mubr.msk.bf16.gmra.mrb[12].mxu0 %vm898_vm5, %v2743_v3  ;;  %v1497_v39 = vld [vmem:[%s2864_s13 + $0x48] sm:$0xff] }
  0xce   : > { %v887_v5 = vpack.c.bf16 %v871_v42, %v870_v1  ;;  %1859 = vmatprep.mubr.msk.bf16.mxu0 %vm898_vm5, %v2757_v8 }
  0xd0   : > { %1804 = vmatmul.mubr.msk.bf16.gmra.mrb[28].mxu1 %vm898_vm5, %v887_v5 }
  0xd1   : > { %1825 = vmatprep.mubr.msk.bf16.mxu1 %vm898_vm5, %v2729_v30 }
  0xd5   : > { %1860 = vmatmul.mubr.msk.bf16.gmra.mrb[16].mxu0 %vm898_vm5, %v2771_v49 }
  0xd6   : > { %1863 = vmatprep.mubr.msk.bf16.mxu0 %vm898_vm5, %v2785_v23 }
  0xd8   : > { %1826 = vmatmul.mubr.msk.bf16.vlgmr.msra.gmra.mrb[16].mxu1 %vm898_vm5, %v2743_v3 }
  0xd9   : > { %1829 = vmatprep.mubr.msk.bf16.mxu1 %vm898_vm5, %v2757_v8 }
  0xdd   : > { %1864 = vmatmul.mubr.msk.bf16.gmra.mrb[20].mxu0 %vm898_vm5, %v884_v55 }
  0xde   : > { %1867 = vmatprep.mubr.msk.bf16.mxu0 %vm898_vm5, %v885_v50 }
  0xe0   : > { %1830 = vmatmul.mubr.msk.bf16.gmra.mrb[20].mxu1 %vm898_vm5, %v2771_v49 }
  0xe1   : > { %1833 = vmatprep.mubr.msk.bf16.mxu1 %vm898_vm5, %v2785_v23 }
  0xe5   : > { %1868 = vmatmul.mubr.msk.bf16.gmra.mrb[24].mxu0 %vm898_vm5, %v886_v29 }
  0xe6   : > { %1871 = vmatprep.mubr.msk.bf16.mxu0 %vm898_vm5, %v887_v5 }
  0xe8   : > { %1834 = vmatmul.mubr.msk.bf16.gmra.mrb[24].mxu1 %vm898_vm5, %v884_v55 }
  0xe9   : > { %1837 = vmatprep.mubr.msk.bf16.mxu1 %vm898_vm5, %v885_v50 }
  0xed   : > { %1872 = vmatmul.mubr.bf16.gmra.mrb[28].mxu0 %v2984_v33 }
  0xf0   : > { %1838 = vmatmul.mubr.msk.bf16.gmra.mrb[28].mxu1 %vm898_vm5, %v886_v29  ;;  %v1499_v29 = vld [vmem:[%s2864_s13 + $0x58] sm:$0xff] }
 0x16b   : > { %v1777_v26 = vpop.f32.mrb[0].mxu1 }
 0x16c   : > { %v985_v30 = vpop.f32.mrb[1].mxu1 }
 0x16d   : > { %v1778_v3 = vpop.f32.mrb[2].mxu1 }
 0x16e   : > { %v988_v8 = vpop.f32.mrb[3].mxu1 }
 0x173   : > { %v1781_v53 = vpop.f32.mrb[4].mxu1 }
 0x174   : > { %v1001_v19 = vpop.f32.mrb[5].mxu1 }
 0x175   : > { %v1782_v0 = vpop.f32.mrb[6].mxu1 }
 0x176   : > { %v1004_v49 = vpop.f32.mrb[7].mxu1 }
 0x17b   : > { %v1785_v34 = vpop.f32.mrb[8].mxu1 }
 0x17c   : > { %v1017_v32 = vpop.f32.mrb[9].mxu1 }
 0x17d   : > { %v1786_v31 = vpop.f32.mrb[10].mxu1 }
 0x17e   : > { %v1020_v56 = vpop.f32.mrb[11].mxu1 }
 0x183   : > { %v2854_v24 = vpop.f32.mrb[12].mxu1 }
 0x184   : > { %v2856_v11 = vpop.f32.mrb[13].mxu1 }
 0x185   : > { %v2858_v35 = vpop.f32.mrb[14].mxu1 }
 0x186   : > { %v2866_v62 = vpop.f32.mrb[15].mxu1 }
 0x188   : > { %v1845_v46 = vpop.f32.mrb[0].mxu0 }
 0x189   : > { %v1877_v23 = vadd.f32 %v1845_v46, %v1777_v26  ;;  %v1329_v2 = vpop.f32.mrb[1].mxu0 }
 0x18a   : > { %v1878_v41 = vadd.f32 %v1329_v2, %v985_v30  ;;  %v1846_v60 = vpop.f32.mrb[2].mxu0  ;;  %v1502_v30 = vld [vmem:[%s2864_s13 + $0x70] sm:$0xff] }
 0x18b   : > { %v1522_v4 = vadd.f32 %v1877_v23, %v1490_v21  ;;  %v1879_v10 = vadd.f32 %v1846_v60, %v1778_v3  ;;  %v1332_v37 = vpop.f32.mrb[3].mxu0 }
 0x18c   : > { %v1520_v22 = vadd.f32 %v1878_v41, %v1488_v44  ;;  %v1880_v40 = vadd.f32 %v1332_v37, %v988_v8  ;;  %v1506_v41 = vld [vmem:[%s2864_s13 + $0x90] sm:$0xff] }
 0x18d   : > { %1554 = vst.msk [vmem:[%s2874_s16 + $0x10] sm:$0xff] %vm806_vm3, %v1522_v4  ;;  %v1523_v20 = vadd.f32 %v1879_v10, %v1491_v61  ;;  %v1504_v4 = vld [vmem:[%s2864_s13 + $0x80] sm:$0xff] }
 0x18e   : > { %1552 = vst.msk [vmem:[%s2874_s16] sm:$0xff] %vm806_vm3, %v1520_v22  ;;  %v1521_v55 = vadd.f32 %v1880_v40, %v1489_v27  ;;  %v1507_v27 = vld [vmem:[%s2864_s13 + $0x98] sm:$0xff] }
 0x18f   : > { %1555 = vst.msk [vmem:[%s2874_s16 + $0x18] sm:$0xff] %vm806_vm3, %v1523_v20 }
 0x190   : > { %1553 = vst.msk [vmem:[%s2874_s16 + $0x8] sm:$0xff] %vm806_vm3, %v1521_v55  ;;  %v1849_v25 = vpop.f32.mrb[4].mxu0  ;;  %v1505_v55 = vld [vmem:[%s2864_s13 + $0x88] sm:$0xff] }
 0x191   : > { %v1881_v17 = vadd.f32 %v1849_v25, %v1781_v53  ;;  %v1345_v48 = vpop.f32.mrb[5].mxu0  ;;  %v1500_v53 = vld [vmem:[%s2864_s13 + $0x60] sm:$0xff] }
 0x192   : > { %v1882_v58 = vadd.f32 %v1345_v48, %v1001_v19  ;;  %v1850_v63 = vpop.f32.mrb[6].mxu0 }
 0x193   : > { %v1526_v18 = vadd.f32 %v1881_v17, %v1494_v16  ;;  %v1883_v45 = vadd.f32 %v1850_v63, %v1782_v0  ;;  %v1348_v50 = vpop.f32.mrb[7].mxu0 }
 0x194   : > { %v1524_v59 = vadd.f32 %v1882_v58, %v1492_v28  ;;  %v1884_v52 = vadd.f32 %v1348_v50, %v1004_v49  ;;  %v1503_v49 = vld [vmem:[%s2864_s13 + $0x78] sm:$0xff] }
 0x195   : > { %1558 = vst.msk [vmem:[%s2874_s16 + $0x30] sm:$0xff] %vm806_vm3, %v1526_v18  ;;  %v1527_v36 = vadd.f32 %v1883_v45, %v1495_v51  ;;  %v1510_v18 = vld [vmem:[%s2864_s13 + $0xb0] sm:$0xff] }
 0x196   : > { %1556 = vst.msk [vmem:[%s2874_s16 + $0x20] sm:$0xff] %vm806_vm3, %v1524_v59  ;;  %v1525_v47 = vadd.f32 %v1884_v52, %v1493_v38  ;;  %v1508_v59 = vld [vmem:[%s2864_s13 + $0xa0] sm:$0xff] }
 0x197   : > { %1559 = vst.msk [vmem:[%s2874_s16 + $0x38] sm:$0xff] %vm806_vm3, %v1527_v36 }
 0x198   : > { %1557 = vst.msk [vmem:[%s2874_s16 + $0x28] sm:$0xff] %vm806_vm3, %v1525_v47  ;;  %v1853_v43 = vpop.f32.mrb[8].mxu0  ;;  %v1511_v47 = vld [vmem:[%s2864_s13 + $0xb8] sm:$0xff] }
 0x199   : > { %v1885_v6 = vadd.f32 %v1853_v43, %v1785_v34  ;;  %v1361_v7 = vpop.f32.mrb[9].mxu0 }
 0x19a   : > { %v1886_v9 = vadd.f32 %v1361_v7, %v1017_v32  ;;  %v1854_v12 = vpop.f32.mrb[10].mxu0  ;;  %v1509_v7 = vld [vmem:[%s2864_s13 + $0xa8] sm:$0xff] }
 0x19b   : > { %v1530_v14 = vadd.f32 %v1885_v6, %v1498_v54  ;;  %v1887_v15 = vadd.f32 %v1854_v12, %v1786_v31  ;;  %v1364_v13 = vpop.f32.mrb[11].mxu0 }
 0x19c   : > { %v1528_v1 = vadd.f32 %v1886_v9, %v1496_v57  ;;  %v1888_v42 = vadd.f32 %v1364_v13, %v1020_v56  ;;  %v1501_v56 = vld [vmem:[%s2864_s13 + $0x68] sm:$0xff] }
 0x19d   : > { %1562 = vst.msk [vmem:[%s2874_s16 + $0x50] sm:$0xff] %vm806_vm3, %v1530_v14  ;;  %v1531_v5 = vadd.f32 %v1887_v15, %v1499_v29 }
 0x19e   : > { %1560 = vst.msk [vmem:[%s2874_s16 + $0x40] sm:$0xff] %vm806_vm3, %v1528_v1  ;;  %v1529_v33 = vadd.f32 %v1888_v42, %v1497_v39  ;;  %v1514_v1 = vld [vmem:[%s2864_s13 + $0xd0] sm:$0xff] }
 0x19f   : > { %1563 = vst.msk [vmem:[%s2874_s16 + $0x58] sm:$0xff] %vm806_vm3, %v1531_v5 }
 0x1a0   : > { %1561 = vst.msk [vmem:[%s2874_s16 + $0x48] sm:$0xff] %vm806_vm3, %v1529_v33  ;;  %v1857_v26 = vpop.f32.mrb[12].mxu0 }
 0x1a1   : > { %v1889_v3 = vadd.f32 %v1857_v26, %v2854_v24  ;;  %v1377_v8 = vpop.f32.mrb[13].mxu0  ;;  %v1512_v26 = vld [vmem:[%s2864_s13 + $0xc0] sm:$0xff] }
 0x1a2   : > { %v1890_v19 = vadd.f32 %v1377_v8, %v2856_v11  ;;  %v1858_v0 = vpop.f32.mrb[14].mxu0  ;;  %v1515_v8 = vld [vmem:[%s2864_s13 + $0xd8] sm:$0xff] }
 0x1a3   : > { %v1534_v34 = vadd.f32 %v1889_v3, %v1502_v30  ;;  %v1891_v32 = vadd.f32 %v1858_v0, %v2858_v35  ;;  %v1380_v31 = vpop.f32.mrb[15].mxu0 }
 0x1a4   : > { %v1532_v46 = vadd.f32 %v1890_v19, %v1500_v53  ;;  %v1892_v21 = vadd.f32 %v1380_v31, %v2866_v62 }
 0x1a5   : > { %1566 = vst.msk [vmem:[%s2874_s16 + $0x70] sm:$0xff] %vm806_vm3, %v1534_v34  ;;  %v1535_v24 = vadd.f32 %v1891_v32, %v1503_v49  ;;  %v1513_v49 = vld [vmem:[%s2864_s13 + $0xc8] sm:$0xff] }
 0x1a6   : > { %1564 = vst.msk [vmem:[%s2874_s16 + $0x60] sm:$0xff] %vm806_vm3, %v1532_v46  ;;  %v1533_v23 = vadd.f32 %v1892_v21, %v1501_v56 }
 0x1a7   : > { %1567 = vst.msk [vmem:[%s2874_s16 + $0x78] sm:$0xff] %vm806_vm3, %v1535_v24 }
 0x1a8   : > { %1565 = vst.msk [vmem:[%s2874_s16 + $0x68] sm:$0xff] %vm806_vm3, %v1533_v23  ;;  %v1861_v11 = vpop.f32.mrb[16].mxu0 }
 0x1a9   : > { %v1393_v35 = vpop.f32.mrb[17].mxu0 }
 0x1aa   : > { %v1862_v2 = vpop.f32.mrb[18].mxu0 }
 0x1ab   : > { %v1827_v44 = vpop.f32.mrb[16].mxu1  ;;  %v1396_v60 = vpop.f32.mrb[19].mxu0 }
 0x1ac   : > { %v1893_v62 = vadd.f32 %v1861_v11, %v1827_v44  ;;  %v1221_v61 = vpop.f32.mrb[17].mxu1  ;;  %v1518_v11 = vld [vmem:[%s2864_s13 + $0xf0] sm:$0xff] }
 0x1ad   : > { %v1894_v10 = vadd.f32 %v1393_v35, %v1221_v61  ;;  %v1828_v37 = vpop.f32.mrb[18].mxu1  ;;  %v1519_v61 = vld [vmem:[%s2864_s13 + $0xf8] sm:$0xff] }
 0x1ae   : > { %v1538_v22 = vadd.f32 %v1893_v62, %v1506_v41  ;;  %v1895_v40 = vadd.f32 %v1862_v2, %v1828_v37  ;;  %v1224_v20 = vpop.f32.mrb[19].mxu1  ;;  %v1516_v41 = vld [vmem:[%s2864_s13 + $0xe0] sm:$0xff] }
 0x1af   : > { %v1536_v25 = vadd.f32 %v1894_v10, %v1504_v4  ;;  %v1896_v16 = vadd.f32 %v1396_v60, %v1224_v20 }
 0x1b0   : > { %1570 = vst.msk [vmem:[%s2874_s16 + $0x90] sm:$0xff] %vm806_vm3, %v1538_v22  ;;  %v1539_v17 = vadd.f32 %v1895_v40, %v1507_v27  ;;  %v1865_v48 = vpop.f32.mrb[20].mxu0  ;;  %v1517_v27 = vld [vmem:[%s2864_s13 + $0xe8] sm:$0xff] }
 0x1b1   : > { %1568 = vst.msk [vmem:[%s2874_s16 + $0x80] sm:$0xff] %vm806_vm3, %v1536_v25  ;;  %v1537_v28 = vadd.f32 %v1896_v16, %v1505_v55  ;;  %v1409_v58 = vpop.f32.mrb[21].mxu0 }
 0x1b2   : > { %1571 = vst.msk [vmem:[%s2874_s16 + $0x98] sm:$0xff] %vm806_vm3, %v1539_v17  ;;  %v1866_v63 = vpop.f32.mrb[22].mxu0 }
 0x1b3   : > { %1569 = vst.msk [vmem:[%s2874_s16 + $0x88] sm:$0xff] %vm806_vm3, %v1537_v28  ;;  %v1831_v51 = vpop.f32.mrb[20].mxu1  ;;  %v1412_v45 = vpop.f32.mrb[23].mxu0 }
 0x1b4   : > { %v1897_v50 = vadd.f32 %v1865_v48, %v1831_v51  ;;  %v1237_v38 = vpop.f32.mrb[21].mxu1 }
 0x1b5   : > { %v1898_v52 = vadd.f32 %v1409_v58, %v1237_v38  ;;  %v1832_v36 = vpop.f32.mrb[22].mxu1 }
 0x1b6   : > { %v1542_v43 = vadd.f32 %v1897_v50, %v1510_v18  ;;  %v1899_v54 = vadd.f32 %v1866_v63, %v1832_v36  ;;  %v1240_v6 = vpop.f32.mrb[23].mxu1 }
 0x1b7   : > { %v1540_v57 = vadd.f32 %v1898_v52, %v1508_v59  ;;  %v1900_v9 = vadd.f32 %v1412_v45, %v1240_v6 }
 0x1b8   : > { %1574 = vst.msk [vmem:[%s2874_s16 + $0xb0] sm:$0xff] %vm806_vm3, %v1542_v43  ;;  %v1543_v12 = vadd.f32 %v1899_v54, %v1511_v47  ;;  %v1869_v29 = vpop.f32.mrb[24].mxu0 }
 0x1b9   : > { %1572 = vst.msk [vmem:[%s2874_s16 + $0xa0] sm:$0xff] %vm806_vm3, %v1540_v57  ;;  %v1541_v14 = vadd.f32 %v1900_v9, %v1509_v7  ;;  %v1425_v15 = vpop.f32.mrb[25].mxu0 }
 0x1ba   : > { %1575 = vst.msk [vmem:[%s2874_s16 + $0xb8] sm:$0xff] %vm806_vm3, %v1543_v12  ;;  %v1870_v13 = vpop.f32.mrb[26].mxu0 }
 0x1bb   : > { %1573 = vst.msk [vmem:[%s2874_s16 + $0xa8] sm:$0xff] %vm806_vm3, %v1541_v14  ;;  %v1835_v39 = vpop.f32.mrb[24].mxu1  ;;  %v1428_v42 = vpop.f32.mrb[27].mxu0 }
 0x1bc   : > { %v1901_v5 = vadd.f32 %v1869_v29, %v1835_v39  ;;  %v1253_v33 = vpop.f32.mrb[25].mxu1 }
 0x1bd   : > { %v1902_v30 = vadd.f32 %v1425_v15, %v1253_v33  ;;  %v1836_v3 = vpop.f32.mrb[26].mxu1 }
 0x1be   : > { %v1546_v53 = vadd.f32 %v1901_v5, %v1514_v1  ;;  %v1903_v19 = vadd.f32 %v1870_v13, %v1836_v3  ;;  %v1256_v0 = vpop.f32.mrb[27].mxu1 }
 0x1bf   : > { %v1544_v34 = vadd.f32 %v1902_v30, %v1512_v26  ;;  %v1904_v32 = vadd.f32 %v1428_v42, %v1256_v0 }
 0x1c0   : > { %1578 = vst.msk [vmem:[%s2874_s16 + $0xd0] sm:$0xff] %vm806_vm3, %v1546_v53  ;;  %v1547_v31 = vadd.f32 %v1903_v19, %v1515_v8  ;;  %v1873_v56 = vpop.f32.mrb[28].mxu0 }
 0x1c1   : > { %1576 = vst.msk [vmem:[%s2874_s16 + $0xc0] sm:$0xff] %vm806_vm3, %v1544_v34  ;;  %v1545_v46 = vadd.f32 %v1904_v32, %v1513_v49  ;;  %v1441_v21 = vpop.f32.mrb[29].mxu0 }
 0x1c2   : > { %1579 = vst.msk [vmem:[%s2874_s16 + $0xd8] sm:$0xff] %vm806_vm3, %v1547_v31  ;;  %v1874_v24 = vpop.f32.mrb[30].mxu0 }
 0x1c3   : > { %1577 = vst.msk [vmem:[%s2874_s16 + $0xc8] sm:$0xff] %vm806_vm3, %v1545_v46  ;;  %v1839_v23 = vpop.f32.mrb[28].mxu1  ;;  %v1444_v35 = vpop.f32.mrb[31].mxu0 }
 0x1c4   : > { %v1905_v2 = vadd.f32 %v1873_v56, %v1839_v23  ;;  %v1269_v44 = vpop.f32.mrb[29].mxu1 }
 0x1c5   : > { %v1906_v60 = vadd.f32 %v1441_v21, %v1269_v44  ;;  %v1840_v62 = vpop.f32.mrb[30].mxu1 }
 0x1c6   : > { %v1550_v4 = vadd.f32 %v1905_v2, %v1518_v11  ;;  %v1907_v10 = vadd.f32 %v1874_v24, %v1840_v62  ;;  %v1272_v37 = vpop.f32.mrb[31].mxu1 }
 0x1c7   : > { %v1548_v22 = vadd.f32 %v1906_v60, %v1516_v41  ;;  %v1908_v40 = vadd.f32 %v1444_v35, %v1272_v37 }
 0x1c8   : > { %1582 = vst.msk [vmem:[%s2874_s16 + $0xf0] sm:$0xff] %vm806_vm3, %v1550_v4  ;;  %v1551_v20 = vadd.f32 %v1907_v10, %v1519_v61 }
 0x1c9   : > { %1580 = vst.msk [vmem:[%s2874_s16 + $0xe0] sm:$0xff] %vm806_vm3, %v1548_v22  ;;  %v1549_v55 = vadd.f32 %v1908_v40, %v1517_v27 }
 0x1ca   : > { %1583 = vst.msk [vmem:[%s2874_s16 + $0xf8] sm:$0xff] %vm806_vm3, %v1551_v20 }
 0x1cb   : > { %1581 = vst.msk [vmem:[%s2874_s16 + $0xe8] sm:$0xff] %vm806_vm3, %v1549_v55 }
 0x1cc PF: > { %s15_s18 = sadd.s32 1, %s2125_s18  }
 0x1cd   : > { %p12_p4 = scmp.ge.s32.totalorder %s15_s18, 4  }
 0x1cf   :  { %14 = sbr.rel (!%p12_p4) target bundleno = 1 (0x1), region = 75 }

</bundles_post_ra>
